<compile_context>
chip_gen: v6e
topology: v6e:2x2x1
jax: 0.10.0
libtpu: 0.0.40
codegen_flags: <defaults>
</compile_context>

<pallas_src>
import jax
import jax.numpy as jnp
from jax import lax
from jax.experimental import pallas as pl
from jax.experimental.pallas import tpu as pltpu

NEG_SLOPE = 0.01          # LeakyReLU default
BN_EPS = 1e-5             # BatchNorm3d default
KSIZE = 3                 # 3x3x3 "same" convolution


def _round_up(x, m):
    return (x + m - 1) // m * m


def _vmem_limit_bytes():
    """Scoped-VMEM limit: ~3/4 of physical VMEM (96 MiB v5e/v6e, 48 MiB v7x)."""
    cap = 64 * 1024 * 1024
    try:
        cap = int(pltpu.get_tpu_info().vmem_capacity_bytes)
    except Exception:
        pass
    return min(cap * 3 // 4, 100 * 1024 * 1024)


def _pick_tile(s, unit, per_col_bytes, budget_bytes):
    """Largest tile ts that is a multiple of `unit`, divides s, is lane-aligned
    (multiple of 128, or equal to s) and whose per-column footprint fits budget."""
    cap = max(budget_bytes // max(per_col_bytes, 1), 1)
    n_units = s // unit
    for k in range(n_units, 0, -1):
        if n_units % k:
            continue
        ts = k * unit
        if ts > cap:
            continue
        if ts % 128 == 0 or ts == s:
            return ts
    # TODO(synk): no feasible tile under the VMEM budget (or no 128-multiple
    # divisor) -> fall back to the full spatial extent as a single block.
    return s


# ----------------------------- Pallas kernels ------------------------------ #

def _make_conv_kernel(cin_p, height, width):
    """Conv3d(k=3,s=1,p=1) + bias + LeakyReLU + partial BN stats for one
    (batch, spatial-tile) block.  The 27-tap operand is built in VMEM from the
    3 host-provided D-tap copies via lane rolls + halo masks, then consumed by
    a single large-K bf16 MXU matmul with f32 accumulation."""

    def kernel(xd_ref, m_ref, w_ref, b_ref, y_ref, stat_ref, p_ref):
        # Build the (27*cin_p, TS) tap operand in the VMEM scratch.
        for kd in range(KSIZE):
            x_kd = xd_ref[0, kd * cin_p:(kd + 1) * cin_p, :]      # (cin_p, TS) bf16
            for kh in range(KSIZE):
                for kw in range(KSIZE):
                    off = (kh - 1) * width + (kw - 1)
                    # tap[:, s] = x_kd[:, s + off]  (cyclic; wraps are masked)
                    tap = x_kd if off == 0 else jnp.roll(x_kd, -off, axis=1)
                    if not (kh == 1 and kw == 1):                 # center tap: all valid
                        r = kh * KSIZE + kw
                        tap = tap * m_ref[r:r + 1, :]             # zero the H/W halo
                    t = (kd * KSIZE + kh) * KSIZE + kw
                    p_ref[pl.ds(t * cin_p, cin_p), :] = tap
        # One large-K MXU matmul: (Cout, 27*cin_p) @ (27*cin_p, TS) -> f32.
        acc = jnp.dot(w_ref[...], p_ref[...],
                      preferred_element_type=jnp.float32)
        acc = acc + b_ref[...]                                    # (Cout, 1) broadcast
        acc = jnp.where(acc >= 0.0, acc, NEG_SLOPE * acc)         # LeakyReLU
        y_ref[0] = acc.astype(y_ref.dtype)
        # Merged per-step partial BatchNorm stats: [:, 0]=sum, [:, 1]=sum of squares.
        stat_ref[0, 0, :, 0:1] = jnp.sum(acc, axis=1, keepdims=True)
        stat_ref[0, 0, :, 1:2] = jnp.sum(acc * acc, axis=1, keepdims=True)

    return kernel


def _bn_affine_kernel(y_ref, scale_ref, shift_ref, o_ref):
    """Elementwise BatchNorm apply: o = y * scale + shift (per channel)."""
    o_ref[...] = y_ref[...] * scale_ref[...] + shift_ref[...]


# ------------------------------ JAX wrappers -------------------------------- #

def _conv_lrelu_stats(x, w, b, mask9, pre_scale=None, pre_shift=None,
                      out_dtype=jnp.float32):
    """Conv3d(k=3, s=1, p=1, bias) + LeakyReLU for one layer.

    Returns (y, channel_sum, channel_sum_sq).  An optional per-channel affine
    (the previous layer's BatchNorm) is applied to x BEFORE zero padding so it
    fuses into the (small, 3x) host-side glue."""
    n, c_in, d, h, wd = x.shape
    c_out = w.shape[0]
    hw = h * wd
    s = d * hw
    cin_p = _round_up(c_in, 16)          # bf16 sublane packing; K = 27*cin_p is 16-aligned
    k_dim = (KSIZE ** 3) * cin_p

    xf = x.astype(jnp.float32)
    if pre_scale is not None:            # previous layer's BN, pre-padding
        xf = (xf * pre_scale.reshape(1, c_in, 1, 1, 1)
              + pre_shift.reshape(1, c_in, 1, 1, 1))

    # 3 D-tap copies (zero padded in depth and in input channels), bf16.
    xp = jnp.pad(xf, ((0, 0), (0, cin_p - c_in), (1, 1), (0, 0), (0, 0)))
    xd = jnp.concatenate([xp[:, :, kd:kd + d] for kd in range(KSIZE)], axis=1)
    xd = xd.reshape(n, KSIZE * cin_p, s).astype(jnp.bfloat16)

    # Weights flattened to (Cout, kd, kh, kw, cin_p) to match the tap ordering.
    w_flat = jnp.transpose(w, (0, 2, 3, 4, 1))
    w_flat = jnp.pad(w_flat, ((0, 0), (0, 0), (0, 0), (0, 0), (0, cin_p - c_in)))
    w_flat = w_flat.reshape(c_out, k_dim).astype(jnp.bfloat16)
    b2 = b.reshape(c_out, 1).astype(jnp.float32)

    # VMEM sizing: resident (double-buffered) weights/bias + per-lane-column
    # cost of the streamed blocks, the tap scratch and in-kernel temporaries.
    vmem_limit = _vmem_limit_bytes()
    y_bytes = jnp.dtype(out_dtype).itemsize
    resident = 2 * (c_out * k_dim * 2 + c_out * 4)
    per_col = (2 * 3 * cin_p * 2          # xd block, double buffered, bf16
               + 2 * 9 * 2                # mask block, double buffered, bf16
               + 27 * cin_p * 2           # tap scratch (single buffer)
               + 12 * cin_p               # tap-construction temporaries
               + (2 * y_bytes + 12) * c_out)   # y (db) + f32 acc / temps
    budget = max(vmem_limit - resident - (6 << 20), 2 << 20)
    ts = _pick_tile(s, hw, per_col, budget)
    n_t = s // ts

    # TODO(synk): for layers with Cout >= 128 the matmul orientation could be
    # flipped to (TS, K) @ (K, Cout) to fill the 256-row MXU on v6e/v7x.
    y, stats = pl.pallas_call(
        _make_conv_kernel(cin_p, h, wd),
        out_shape=(
            jax.ShapeDtypeStruct((n, c_out, s), out_dtype),
            jax.ShapeDtypeStruct((n, n_t, c_out, 2), jnp.float32),
        ),
        grid_spec=pltpu.PrefetchScalarGridSpec(
            num_scalar_prefetch=0,
            grid=(n, n_t),
            in_specs=[
                pl.BlockSpec((1, KSIZE * cin_p, ts), lambda i, j: (i, 0, j)),
                pl.BlockSpec((9, ts), lambda i, j: (0, j)),
                pl.BlockSpec((c_out, k_dim), lambda i, j: (0, 0)),
                pl.BlockSpec((c_out, 1), lambda i, j: (0, 0)),
            ],
            out_specs=(
                pl.BlockSpec((1, c_out, ts), lambda i, j: (i, 0, j)),
                pl.BlockSpec((1, 1, c_out, 2), lambda i, j: (i, j, 0, 0)),
            ),
            scratch_shapes=[pltpu.VMEM((27 * cin_p, ts), jnp.bfloat16)],
        ),
        compiler_params=pltpu.CompilerParams(
            dimension_semantics=("parallel", "parallel"),
            vmem_limit_bytes=vmem_limit),
    )(xd, mask9, w_flat, b2)

    csum = jnp.sum(stats[..., 0], axis=(0, 1))   # (Cout,)
    cssq = jnp.sum(stats[..., 1], axis=(0, 1))   # (Cout,)
    return y.reshape(n, c_out, d, h, wd), csum, cssq


def _bn_scale_shift(csum, cssq, gamma, beta, count):
    """Training-mode BatchNorm3d (biased variance) as per-channel scale/shift."""
    # TODO(synk): running_mean/running_var buffer updates are not modeled
    # (they do not affect the forward output in training mode).
    mean = csum / count
    var = jnp.maximum(cssq / count - mean * mean, 0.0)   # clamp vs cancellation
    inv_std = lax.rsqrt(var + BN_EPS)
    scale = gamma * inv_std
    shift = beta - mean * scale
    return scale, shift


def _bn_apply(y, scale, shift):
    """Standalone BN affine (final layer only); aliases its input buffer."""
    n, c_out, d, h, wd = y.shape
    s = d * h * wd
    vmem_limit = _vmem_limit_bytes()
    per_col = (2 * 4 + 2 * 4 + 8) * c_out      # in + out (double buffered) + temps, f32
    unit = 128 if s % 128 == 0 else s
    ts = _pick_tile(s, unit, per_col, max(vmem_limit - (4 << 20), 2 << 20))
    n_t = s // ts
    out = pl.pallas_call(
        _bn_affine_kernel,
        out_shape=jax.ShapeDtypeStruct((n, c_out, s), jnp.float32),
        grid_spec=pltpu.PrefetchScalarGridSpec(
            num_scalar_prefetch=0,
            grid=(n, n_t),
            in_specs=[
                pl.BlockSpec((1, c_out, ts), lambda i, j: (i, 0, j)),
                pl.BlockSpec((c_out, 1), lambda i, j: (0, 0)),
                pl.BlockSpec((c_out, 1), lambda i, j: (0, 0)),
            ],
            out_specs=pl.BlockSpec((1, c_out, ts), lambda i, j: (i, 0, j)),
        ),
        input_output_aliases={0: 0},
        compiler_params=pltpu.CompilerParams(
            dimension_semantics=("parallel", "parallel"),
            vmem_limit_bytes=vmem_limit),
    )(y.reshape(n, c_out, s).astype(jnp.float32),
      scale.reshape(c_out, 1).astype(jnp.float32),
      shift.reshape(c_out, 1).astype(jnp.float32))
    return out.reshape(n, c_out, d, h, wd)


def init_stacked_block_params(key, features_in, features_out, number_convolutions):
    """Deterministic parameter init (PyTorch-like shapes/init)."""
    params = []
    c_in = features_in
    for _ in range(number_convolutions):
        key, kw_, kb_ = jax.random.split(key, 3)
        fan_in = c_in * KSIZE ** 3
        bound = 1.0 / jnp.sqrt(float(fan_in))
        w = jax.random.uniform(kw_, (features_out, c_in, KSIZE, KSIZE, KSIZE),
                               jnp.float32, -bound, bound)
        b = jax.random.uniform(kb_, (features_out,), jnp.float32, -bound, bound)
        gamma = jnp.ones((features_out,), jnp.float32)
        beta = jnp.zeros((features_out,), jnp.float32)
        params.append({"w": w, "b": b, "gamma": gamma, "beta": beta})
        c_in = features_out
    return params


def stacked_block_forward(x, params):
    """StackedBlock.forward: sequentially apply each ConvolutionalBlock.
    Intermediate BN affines are fused into the next layer's (3x) input glue
    (pre-padding); the final BN runs as a Pallas elementwise kernel."""
    n, c_in, d, h, wd = x.shape
    s = d * h * wd

    # Precomputed H/W halo masks over the flattened spatial axis (shared by
    # every layer, tiny bf16 stream; built with plain XLA ops).
    pos = jnp.arange(s, dtype=jnp.int32)
    hh = (pos // wd) % h
    ww = pos % wd
    rows = []
    for kh in range(KSIZE):
        for kw in range(KSIZE):
            valid = ((hh + kh - 1 >= 0) & (hh + kh - 1 < h) &
                     (ww + kw - 1 >= 0) & (ww + kw - 1 < wd))
            rows.append(valid)
    mask9 = jnp.stack(rows, axis=0).astype(jnp.bfloat16)   # (9, S)

    pending = None   # (scale, shift) of the previous layer's BatchNorm
    num = len(params)
    for li, p in enumerate(params):
        pre_scale, pre_shift = pending if pending is not None else (None, None)
        out_dtype = jnp.bfloat16 if li + 1 < num else jnp.float32
        y, csum, cssq = _conv_lrelu_stats(x, p["w"], p["b"], mask9,
                                          pre_scale, pre_shift, out_dtype)
        count = float(y.shape[0] * y.shape[2] * y.shape[3] * y.shape[4])
        pending = _bn_scale_shift(csum, cssq, p["gamma"], p["beta"], count)
        x = y
    return _bn_apply(x, *pending)


# ------------------------------ reference (JAX) ----------------------------- #

def _reference_forward(x, params):
    for p in params:
        y = lax.conv_general_dilated(
            x, p["w"], window_strides=(1, 1, 1), padding="SAME",
            dimension_numbers=("NCDHW", "OIDHW", "NCDHW"))
        y = y + p["b"].reshape(1, -1, 1, 1, 1)
        y = jnp.where(y >= 0, y, NEG_SLOPE * y)
        mean = jnp.mean(y, axis=(0, 2, 3, 4), keepdims=True)
        var = jnp.mean((y - mean) ** 2, axis=(0, 2, 3, 4), keepdims=True)
        y = (y - mean) / jnp.sqrt(var + BN_EPS)
        y = y * p["gamma"].reshape(1, -1, 1, 1, 1) + p["beta"].reshape(1, -1, 1, 1, 1)
        x = y
    return x


# ---------------------------------- main ------------------------------------ #

if __name__ == "__main__":
    key = jax.random.PRNGKey(0)
    kx, kp = jax.random.split(key)

    N, C_IN, C_OUT, D, H, W = 2, 4, 8, 8, 8, 8
    NUM_CONVS = 2

    x = jax.random.normal(kx, (N, C_IN, D, H, W), jnp.float32)
    params = init_stacked_block_params(kp, C_IN, C_OUT, NUM_CONVS)

    out = jax.jit(stacked_block_forward)(x, params)
    out = jax.block_until_ready(out)

    ref = _reference_forward(x, params)
    assert out.shape == (N, C_OUT, D, H, W)
    # bf16 tap/weight streams + bf16 intermediate activations -> loose tolerance.
    assert bool(jnp.allclose(out, ref, atol=5e-2, rtol=5e-2)), float(
        jnp.max(jnp.abs(out - ref)))

    print("KERNEL_OK")
</pallas_src>

<mosaic_0001>
module attributes {stable_mosaic.version = 11 : i64} {
  func.func @kernel(%arg0: i32, %arg1: i32, %arg2: memref<1x48x512xbf16, #tpu.memory_space<vmem>>, %arg3: memref<9x512xbf16, #tpu.memory_space<vmem>>, %arg4: memref<8x432xbf16, #tpu.memory_space<vmem>>, %arg5: memref<8x1xf32, #tpu.memory_space<vmem>>, %arg6: memref<1x8x512xbf16, #tpu.memory_space<vmem>>, %arg7: memref<1x1x8x2xf32, #tpu.memory_space<vmem>>, %arg8: memref<432x512xbf16, #tpu.memory_space<vmem>>) attributes {dimension_semantics = [#tpu.dimension_semantics<parallel>, #tpu.dimension_semantics<parallel>], iteration_bounds = array<i64: 2, 1>, scalar_prefetch = 0 : i64, scratch_operands = 1 : i64, tpu.core_type = #tpu.core_type<tc>, window_params = [{transform_indices = @transform_0, window_bounds = array<i64: 1, 48, 512>}, {transform_indices = @transform_1, window_bounds = array<i64: 9, 512>}, {pipeline_mode = #tpu.pipeline_mode<synchronous>, transform_indices = @transform_2, window_bounds = array<i64: 8, 432>}, {pipeline_mode = #tpu.pipeline_mode<synchronous>, transform_indices = @transform_3, window_bounds = array<i64: 8, 1>}, {transform_indices = @transform_4, window_bounds = array<i64: 1, 8, 512>}, {transform_indices = @transform_5, window_bounds = array<i64: 1, 1, 8, 2>}]} {
    %c0 = arith.constant 0 : index
    %c0_0 = arith.constant 0 : index
    %c0_1 = arith.constant 0 : index
    %0 = vector.load %arg2[%c0, %c0_0, %c0_1] : memref<1x48x512xbf16, #tpu.memory_space<vmem>>, vector<1x16x512xbf16>
    %1 = vector.shape_cast %0 : vector<1x16x512xbf16> to vector<16x512xbf16>
    %2 = vector.extract_strided_slice %1 {offsets = [0, 503], sizes = [16, 9], strides = [1, 1]} : vector<16x512xbf16> to vector<16x9xbf16>
    %3 = vector.extract_strided_slice %1 {offsets = [0, 0], sizes = [16, 503], strides = [1, 1]} : vector<16x512xbf16> to vector<16x503xbf16>
    %4 = tpu.concatenate %2, %3 in 1 : vector<16x9xbf16>, vector<16x503xbf16> -> vector<16x512xbf16>
    %c0_2 = arith.constant 0 : index
    %c0_3 = arith.constant 0 : index
    %5 = vector.load %arg3[%c0_2, %c0_3] : memref<9x512xbf16, #tpu.memory_space<vmem>>, vector<1x512xbf16>
    %6 = vector.broadcast %5 : vector<1x512xbf16> to vector<16x512xbf16>
    %7 = arith.mulf %4, %6 : vector<16x512xbf16>
    %c0_4 = arith.constant 0 : index
    %c0_5 = arith.constant 0 : index
    %8 = vector.load %arg8[%c0_4, %c0_5] : memref<432x512xbf16, #tpu.memory_space<vmem>>, vector<16x512xbf16>
    tpu.vector_store %arg8[%c0_4, %c0_5], %7 {strides = array<i32>} : memref<432x512xbf16, #tpu.memory_space<vmem>>, vector<16x512xbf16>,
    %9 = vector.extract_strided_slice %1 {offsets = [0, 504], sizes = [16, 8], strides = [1, 1]} : vector<16x512xbf16> to vector<16x8xbf16>
    %10 = vector.extract_strided_slice %1 {offsets = [0, 0], sizes = [16, 504], strides = [1, 1]} : vector<16x512xbf16> to vector<16x504xbf16>
    %11 = tpu.concatenate %9, %10 in 1 : vector<16x8xbf16>, vector<16x504xbf16> -> vector<16x512xbf16>
    %c1 = arith.constant 1 : index
    %c0_6 = arith.constant 0 : index
    %12 = vector.load %arg3[%c1, %c0_6] : memref<9x512xbf16, #tpu.memory_space<vmem>>, vector<1x512xbf16>
    %13 = vector.broadcast %12 : vector<1x512xbf16> to vector<16x512xbf16>
    %14 = arith.mulf %11, %13 : vector<16x512xbf16>
    %c16 = arith.constant 16 : index
    %c0_7 = arith.constant 0 : index
    %15 = vector.load %arg8[%c16, %c0_7] : memref<432x512xbf16, #tpu.memory_space<vmem>>, vector<16x512xbf16>
    tpu.vector_store %arg8[%c16, %c0_7], %14 {strides = array<i32>} : memref<432x512xbf16, #tpu.memory_space<vmem>>, vector<16x512xbf16>,
    %16 = vector.extract_strided_slice %1 {offsets = [0, 505], sizes = [16, 7], strides = [1, 1]} : vector<16x512xbf16> to vector<16x7xbf16>
    %17 = vector.extract_strided_slice %1 {offsets = [0, 0], sizes = [16, 505], strides = [1, 1]} : vector<16x512xbf16> to vector<16x505xbf16>
    %18 = tpu.concatenate %16, %17 in 1 : vector<16x7xbf16>, vector<16x505xbf16> -> vector<16x512xbf16>
    %c2 = arith.constant 2 : index
    %c0_8 = arith.constant 0 : index
    %19 = vector.load %arg3[%c2, %c0_8] : memref<9x512xbf16, #tpu.memory_space<vmem>>, vector<1x512xbf16>
    %20 = vector.broadcast %19 : vector<1x512xbf16> to vector<16x512xbf16>
    %21 = arith.mulf %18, %20 : vector<16x512xbf16>
    %c32 = arith.constant 32 : index
    %c0_9 = arith.constant 0 : index
    %22 = vector.load %arg8[%c32, %c0_9] : memref<432x512xbf16, #tpu.memory_space<vmem>>, vector<16x512xbf16>
    tpu.vector_store %arg8[%c32, %c0_9], %21 {strides = array<i32>} : memref<432x512xbf16, #tpu.memory_space<vmem>>, vector<16x512xbf16>,
    %23 = vector.extract_strided_slice %1 {offsets = [0, 511], sizes = [16, 1], strides = [1, 1]} : vector<16x512xbf16> to vector<16x1xbf16>
    %24 = vector.extract_strided_slice %1 {offsets = [0, 0], sizes = [16, 511], strides = [1, 1]} : vector<16x512xbf16> to vector<16x511xbf16>
    %25 = tpu.concatenate %23, %24 in 1 : vector<16x1xbf16>, vector<16x511xbf16> -> vector<16x512xbf16>
    %c3 = arith.constant 3 : index
    %c0_10 = arith.constant 0 : index
    %26 = vector.load %arg3[%c3, %c0_10] : memref<9x512xbf16, #tpu.memory_space<vmem>>, vector<1x512xbf16>
    %27 = vector.broadcast %26 : vector<1x512xbf16> to vector<16x512xbf16>
    %28 = arith.mulf %25, %27 : vector<16x512xbf16>
    %c48 = arith.constant 48 : index
    %c0_11 = arith.constant 0 : index
    %29 = vector.load %arg8[%c48, %c0_11] : memref<432x512xbf16, #tpu.memory_space<vmem>>, vector<16x512xbf16>
    tpu.vector_store %arg8[%c48, %c0_11], %28 {strides = array<i32>} : memref<432x512xbf16, #tpu.memory_space<vmem>>, vector<16x512xbf16>,
    %c64 = arith.constant 64 : index
    %c0_12 = arith.constant 0 : index
    %30 = vector.load %arg8[%c64, %c0_12] : memref<432x512xbf16, #tpu.memory_space<vmem>>, vector<16x512xbf16>
    tpu.vector_store %arg8[%c64, %c0_12], %1 {strides = array<i32>} : memref<432x512xbf16, #tpu.memory_space<vmem>>, vector<16x512xbf16>,
    %31 = vector.extract_strided_slice %1 {offsets = [0, 1], sizes = [16, 511], strides = [1, 1]} : vector<16x512xbf16> to vector<16x511xbf16>
    %32 = vector.extract_strided_slice %1 {offsets = [0, 0], sizes = [16, 1], strides = [1, 1]} : vector<16x512xbf16> to vector<16x1xbf16>
    %33 = tpu.concatenate %31, %32 in 1 : vector<16x511xbf16>, vector<16x1xbf16> -> vector<16x512xbf16>
    %c5 = arith.constant 5 : index
    %c0_13 = arith.constant 0 : index
    %34 = vector.load %arg3[%c5, %c0_13] : memref<9x512xbf16, #tpu.memory_space<vmem>>, vector<1x512xbf16>
    %35 = vector.broadcast %34 : vector<1x512xbf16> to vector<16x512xbf16>
    %36 = arith.mulf %33, %35 : vector<16x512xbf16>
    %c80 = arith.constant 80 : index
    %c0_14 = arith.constant 0 : index
    %37 = vector.load %arg8[%c80, %c0_14] : memref<432x512xbf16, #tpu.memory_space<vmem>>, vector<16x512xbf16>
    tpu.vector_store %arg8[%c80, %c0_14], %36 {strides = array<i32>} : memref<432x512xbf16, #tpu.memory_space<vmem>>, vector<16x512xbf16>,
    %38 = vector.extract_strided_slice %1 {offsets = [0, 7], sizes = [16, 505], strides = [1, 1]} : vector<16x512xbf16> to vector<16x505xbf16>
    %39 = vector.extract_strided_slice %1 {offsets = [0, 0], sizes = [16, 7], strides = [1, 1]} : vector<16x512xbf16> to vector<16x7xbf16>
    %40 = tpu.concatenate %38, %39 in 1 : vector<16x505xbf16>, vector<16x7xbf16> -> vector<16x512xbf16>
    %c6 = arith.constant 6 : index
    %c0_15 = arith.constant 0 : index
    %41 = vector.load %arg3[%c6, %c0_15] : memref<9x512xbf16, #tpu.memory_space<vmem>>, vector<1x512xbf16>
    %42 = vector.broadcast %41 : vector<1x512xbf16> to vector<16x512xbf16>
    %43 = arith.mulf %40, %42 : vector<16x512xbf16>
    %c96 = arith.constant 96 : index
    %c0_16 = arith.constant 0 : index
    %44 = vector.load %arg8[%c96, %c0_16] : memref<432x512xbf16, #tpu.memory_space<vmem>>, vector<16x512xbf16>
    tpu.vector_store %arg8[%c96, %c0_16], %43 {strides = array<i32>} : memref<432x512xbf16, #tpu.memory_space<vmem>>, vector<16x512xbf16>,
    %45 = vector.extract_strided_slice %1 {offsets = [0, 8], sizes = [16, 504], strides = [1, 1]} : vector<16x512xbf16> to vector<16x504xbf16>
    %46 = vector.extract_strided_slice %1 {offsets = [0, 0], sizes = [16, 8], strides = [1, 1]} : vector<16x512xbf16> to vector<16x8xbf16>
    %47 = tpu.concatenate %45, %46 in 1 : vector<16x504xbf16>, vector<16x8xbf16> -> vector<16x512xbf16>
    %c7 = arith.constant 7 : index
    %c0_17 = arith.constant 0 : index
    %48 = vector.load %arg3[%c7, %c0_17] : memref<9x512xbf16, #tpu.memory_space<vmem>>, vector<1x512xbf16>
    %49 = vector.broadcast %48 : vector<1x512xbf16> to vector<16x512xbf16>
    %50 = arith.mulf %47, %49 : vector<16x512xbf16>
    %c112 = arith.constant 112 : index
    %c0_18 = arith.constant 0 : index
    %51 = vector.load %arg8[%c112, %c0_18] : memref<432x512xbf16, #tpu.memory_space<vmem>>, vector<16x512xbf16>
    tpu.vector_store %arg8[%c112, %c0_18], %50 {strides = array<i32>} : memref<432x512xbf16, #tpu.memory_space<vmem>>, vector<16x512xbf16>,
    %52 = vector.extract_strided_slice %1 {offsets = [0, 9], sizes = [16, 503], strides = [1, 1]} : vector<16x512xbf16> to vector<16x503xbf16>
    %53 = vector.extract_strided_slice %1 {offsets = [0, 0], sizes = [16, 9], strides = [1, 1]} : vector<16x512xbf16> to vector<16x9xbf16>
    %54 = tpu.concatenate %52, %53 in 1 : vector<16x503xbf16>, vector<16x9xbf16> -> vector<16x512xbf16>
    %c8 = arith.constant 8 : index
    %c0_19 = arith.constant 0 : index
    %55 = vector.load %arg3[%c8, %c0_19] : memref<9x512xbf16, #tpu.memory_space<vmem>>, vector<1x512xbf16>
    %56 = vector.broadcast %55 : vector<1x512xbf16> to vector<16x512xbf16>
    %57 = arith.mulf %54, %56 : vector<16x512xbf16>
    %c128 = arith.constant 128 : index
    %c0_20 = arith.constant 0 : index
    %58 = vector.load %arg8[%c128, %c0_20] : memref<432x512xbf16, #tpu.memory_space<vmem>>, vector<16x512xbf16>
    tpu.vector_store %arg8[%c128, %c0_20], %57 {strides = array<i32>} : memref<432x512xbf16, #tpu.memory_space<vmem>>, vector<16x512xbf16>,
    %c0_21 = arith.constant 0 : index
    %c16_22 = arith.constant 16 : index
    %c0_23 = arith.constant 0 : index
    %59 = vector.load %arg2[%c0_21, %c16_22, %c0_23] : memref<1x48x512xbf16, #tpu.memory_space<vmem>>, vector<1x16x512xbf16>
    %60 = vector.shape_cast %59 : vector<1x16x512xbf16> to vector<16x512xbf16>
    %61 = vector.extract_strided_slice %60 {offsets = [0, 503], sizes = [16, 9], strides = [1, 1]} : vector<16x512xbf16> to vector<16x9xbf16>
    %62 = vector.extract_strided_slice %60 {offsets = [0, 0], sizes = [16, 503], strides = [1, 1]} : vector<16x512xbf16> to vector<16x503xbf16>
    %63 = tpu.concatenate %61, %62 in 1 : vector<16x9xbf16>, vector<16x503xbf16> -> vector<16x512xbf16>
    %c0_24 = arith.constant 0 : index
    %c0_25 = arith.constant 0 : index
    %64 = vector.load %arg3[%c0_24, %c0_25] : memref<9x512xbf16, #tpu.memory_space<vmem>>, vector<1x512xbf16>
    %65 = vector.broadcast %64 : vector<1x512xbf16> to vector<16x512xbf16>
    %66 = arith.mulf %63, %65 : vector<16x512xbf16>
    %c144 = arith.constant 144 : index
    %c0_26 = arith.constant 0 : index
    %67 = vector.load %arg8[%c144, %c0_26] : memref<432x512xbf16, #tpu.memory_space<vmem>>, vector<16x512xbf16>
    tpu.vector_store %arg8[%c144, %c0_26], %66 {strides = array<i32>} : memref<432x512xbf16, #tpu.memory_space<vmem>>, vector<16x512xbf16>,
    %68 = vector.extract_strided_slice %60 {offsets = [0, 504], sizes = [16, 8], strides = [1, 1]} : vector<16x512xbf16> to vector<16x8xbf16>
    %69 = vector.extract_strided_slice %60 {offsets = [0, 0], sizes = [16, 504], strides = [1, 1]} : vector<16x512xbf16> to vector<16x504xbf16>
    %70 = tpu.concatenate %68, %69 in 1 : vector<16x8xbf16>, vector<16x504xbf16> -> vector<16x512xbf16>
    %c1_27 = arith.constant 1 : index
    %c0_28 = arith.constant 0 : index
    %71 = vector.load %arg3[%c1_27, %c0_28] : memref<9x512xbf16, #tpu.memory_space<vmem>>, vector<1x512xbf16>
    %72 = vector.broadcast %71 : vector<1x512xbf16> to vector<16x512xbf16>
    %73 = arith.mulf %70, %72 : vector<16x512xbf16>
    %c160 = arith.constant 160 : index
    %c0_29 = arith.constant 0 : index
    %74 = vector.load %arg8[%c160, %c0_29] : memref<432x512xbf16, #tpu.memory_space<vmem>>, vector<16x512xbf16>
    tpu.vector_store %arg8[%c160, %c0_29], %73 {strides = array<i32>} : memref<432x512xbf16, #tpu.memory_space<vmem>>, vector<16x512xbf16>,
    %75 = vector.extract_strided_slice %60 {offsets = [0, 505], sizes = [16, 7], strides = [1, 1]} : vector<16x512xbf16> to vector<16x7xbf16>
    %76 = vector.extract_strided_slice %60 {offsets = [0, 0], sizes = [16, 505], strides = [1, 1]} : vector<16x512xbf16> to vector<16x505xbf16>
    %77 = tpu.concatenate %75, %76 in 1 : vector<16x7xbf16>, vector<16x505xbf16> -> vector<16x512xbf16>
    %c2_30 = arith.constant 2 : index
    %c0_31 = arith.constant 0 : index
    %78 = vector.load %arg3[%c2_30, %c0_31] : memref<9x512xbf16, #tpu.memory_space<vmem>>, vector<1x512xbf16>
    %79 = vector.broadcast %78 : vector<1x512xbf16> to vector<16x512xbf16>
    %80 = arith.mulf %77, %79 : vector<16x512xbf16>
    %c176 = arith.constant 176 : index
    %c0_32 = arith.constant 0 : index
    %81 = vector.load %arg8[%c176, %c0_32] : memref<432x512xbf16, #tpu.memory_space<vmem>>, vector<16x512xbf16>
    tpu.vector_store %arg8[%c176, %c0_32], %80 {strides = array<i32>} : memref<432x512xbf16, #tpu.memory_space<vmem>>, vector<16x512xbf16>,
    %82 = vector.extract_strided_slice %60 {offsets = [0, 511], sizes = [16, 1], strides = [1, 1]} : vector<16x512xbf16> to vector<16x1xbf16>
    %83 = vector.extract_strided_slice %60 {offsets = [0, 0], sizes = [16, 511], strides = [1, 1]} : vector<16x512xbf16> to vector<16x511xbf16>
    %84 = tpu.concatenate %82, %83 in 1 : vector<16x1xbf16>, vector<16x511xbf16> -> vector<16x512xbf16>
    %c3_33 = arith.constant 3 : index
    %c0_34 = arith.constant 0 : index
    %85 = vector.load %arg3[%c3_33, %c0_34] : memref<9x512xbf16, #tpu.memory_space<vmem>>, vector<1x512xbf16>
    %86 = vector.broadcast %85 : vector<1x512xbf16> to vector<16x512xbf16>
    %87 = arith.mulf %84, %86 : vector<16x512xbf16>
    %c192 = arith.constant 192 : index
    %c0_35 = arith.constant 0 : index
    %88 = vector.load %arg8[%c192, %c0_35] : memref<432x512xbf16, #tpu.memory_space<vmem>>, vector<16x512xbf16>
    tpu.vector_store %arg8[%c192, %c0_35], %87 {strides = array<i32>} : memref<432x512xbf16, #tpu.memory_space<vmem>>, vector<16x512xbf16>,
    %c208 = arith.constant 208 : index
    %c0_36 = arith.constant 0 : index
    %89 = vector.load %arg8[%c208, %c0_36] : memref<432x512xbf16, #tpu.memory_space<vmem>>, vector<16x512xbf16>
    tpu.vector_store %arg8[%c208, %c0_36], %60 {strides = array<i32>} : memref<432x512xbf16, #tpu.memory_space<vmem>>, vector<16x512xbf16>,
    %90 = vector.extract_strided_slice %60 {offsets = [0, 1], sizes = [16, 511], strides = [1, 1]} : vector<16x512xbf16> to vector<16x511xbf16>
    %91 = vector.extract_strided_slice %60 {offsets = [0, 0], sizes = [16, 1], strides = [1, 1]} : vector<16x512xbf16> to vector<16x1xbf16>
    %92 = tpu.concatenate %90, %91 in 1 : vector<16x511xbf16>, vector<16x1xbf16> -> vector<16x512xbf16>
    %c5_37 = arith.constant 5 : index
    %c0_38 = arith.constant 0 : index
    %93 = vector.load %arg3[%c5_37, %c0_38] : memref<9x512xbf16, #tpu.memory_space<vmem>>, vector<1x512xbf16>
    %94 = vector.broadcast %93 : vector<1x512xbf16> to vector<16x512xbf16>
    %95 = arith.mulf %92, %94 : vector<16x512xbf16>
    %c224 = arith.constant 224 : index
    %c0_39 = arith.constant 0 : index
    %96 = vector.load %arg8[%c224, %c0_39] : memref<432x512xbf16, #tpu.memory_space<vmem>>, vector<16x512xbf16>
    tpu.vector_store %arg8[%c224, %c0_39], %95 {strides = array<i32>} : memref<432x512xbf16, #tpu.memory_space<vmem>>, vector<16x512xbf16>,
    %97 = vector.extract_strided_slice %60 {offsets = [0, 7], sizes = [16, 505], strides = [1, 1]} : vector<16x512xbf16> to vector<16x505xbf16>
    %98 = vector.extract_strided_slice %60 {offsets = [0, 0], sizes = [16, 7], strides = [1, 1]} : vector<16x512xbf16> to vector<16x7xbf16>
    %99 = tpu.concatenate %97, %98 in 1 : vector<16x505xbf16>, vector<16x7xbf16> -> vector<16x512xbf16>
    %c6_40 = arith.constant 6 : index
    %c0_41 = arith.constant 0 : index
    %100 = vector.load %arg3[%c6_40, %c0_41] : memref<9x512xbf16, #tpu.memory_space<vmem>>, vector<1x512xbf16>
    %101 = vector.broadcast %100 : vector<1x512xbf16> to vector<16x512xbf16>
    %102 = arith.mulf %99, %101 : vector<16x512xbf16>
    %c240 = arith.constant 240 : index
    %c0_42 = arith.constant 0 : index
    %103 = vector.load %arg8[%c240, %c0_42] : memref<432x512xbf16, #tpu.memory_space<vmem>>, vector<16x512xbf16>
    tpu.vector_store %arg8[%c240, %c0_42], %102 {strides = array<i32>} : memref<432x512xbf16, #tpu.memory_space<vmem>>, vector<16x512xbf16>,
    %104 = vector.extract_strided_slice %60 {offsets = [0, 8], sizes = [16, 504], strides = [1, 1]} : vector<16x512xbf16> to vector<16x504xbf16>
    %105 = vector.extract_strided_slice %60 {offsets = [0, 0], sizes = [16, 8], strides = [1, 1]} : vector<16x512xbf16> to vector<16x8xbf16>
    %106 = tpu.concatenate %104, %105 in 1 : vector<16x504xbf16>, vector<16x8xbf16> -> vector<16x512xbf16>
    %c7_43 = arith.constant 7 : index
    %c0_44 = arith.constant 0 : index
    %107 = vector.load %arg3[%c7_43, %c0_44] : memref<9x512xbf16, #tpu.memory_space<vmem>>, vector<1x512xbf16>
    %108 = vector.broadcast %107 : vector<1x512xbf16> to vector<16x512xbf16>
    %109 = arith.mulf %106, %108 : vector<16x512xbf16>
    %c256 = arith.constant 256 : index
    %c0_45 = arith.constant 0 : index
    %110 = vector.load %arg8[%c256, %c0_45] : memref<432x512xbf16, #tpu.memory_space<vmem>>, vector<16x512xbf16>
    tpu.vector_store %arg8[%c256, %c0_45], %109 {strides = array<i32>} : memref<432x512xbf16, #tpu.memory_space<vmem>>, vector<16x512xbf16>,
    %111 = vector.extract_strided_slice %60 {offsets = [0, 9], sizes = [16, 503], strides = [1, 1]} : vector<16x512xbf16> to vector<16x503xbf16>
    %112 = vector.extract_strided_slice %60 {offsets = [0, 0], sizes = [16, 9], strides = [1, 1]} : vector<16x512xbf16> to vector<16x9xbf16>
    %113 = tpu.concatenate %111, %112 in 1 : vector<16x503xbf16>, vector<16x9xbf16> -> vector<16x512xbf16>
    %c8_46 = arith.constant 8 : index
    %c0_47 = arith.constant 0 : index
    %114 = vector.load %arg3[%c8_46, %c0_47] : memref<9x512xbf16, #tpu.memory_space<vmem>>, vector<1x512xbf16>
    %115 = vector.broadcast %114 : vector<1x512xbf16> to vector<16x512xbf16>
    %116 = arith.mulf %113, %115 : vector<16x512xbf16>
    %c272 = arith.constant 272 : index
    %c0_48 = arith.constant 0 : index
    %117 = vector.load %arg8[%c272, %c0_48] : memref<432x512xbf16, #tpu.memory_space<vmem>>, vector<16x512xbf16>
    tpu.vector_store %arg8[%c272, %c0_48], %116 {strides = array<i32>} : memref<432x512xbf16, #tpu.memory_space<vmem>>, vector<16x512xbf16>,
    %c0_49 = arith.constant 0 : index
    %c32_50 = arith.constant 32 : index
    %c0_51 = arith.constant 0 : index
    %118 = vector.load %arg2[%c0_49, %c32_50, %c0_51] : memref<1x48x512xbf16, #tpu.memory_space<vmem>>, vector<1x16x512xbf16>
    %119 = vector.shape_cast %118 : vector<1x16x512xbf16> to vector<16x512xbf16>
    %120 = vector.extract_strided_slice %119 {offsets = [0, 503], sizes = [16, 9], strides = [1, 1]} : vector<16x512xbf16> to vector<16x9xbf16>
    %121 = vector.extract_strided_slice %119 {offsets = [0, 0], sizes = [16, 503], strides = [1, 1]} : vector<16x512xbf16> to vector<16x503xbf16>
    %122 = tpu.concatenate %120, %121 in 1 : vector<16x9xbf16>, vector<16x503xbf16> -> vector<16x512xbf16>
    %c0_52 = arith.constant 0 : index
    %c0_53 = arith.constant 0 : index
    %123 = vector.load %arg3[%c0_52, %c0_53] : memref<9x512xbf16, #tpu.memory_space<vmem>>, vector<1x512xbf16>
    %124 = vector.broadcast %123 : vector<1x512xbf16> to vector<16x512xbf16>
    %125 = arith.mulf %122, %124 : vector<16x512xbf16>
    %c288 = arith.constant 288 : index
    %c0_54 = arith.constant 0 : index
    %126 = vector.load %arg8[%c288, %c0_54] : memref<432x512xbf16, #tpu.memory_space<vmem>>, vector<16x512xbf16>
    tpu.vector_store %arg8[%c288, %c0_54], %125 {strides = array<i32>} : memref<432x512xbf16, #tpu.memory_space<vmem>>, vector<16x512xbf16>,
    %127 = vector.extract_strided_slice %119 {offsets = [0, 504], sizes = [16, 8], strides = [1, 1]} : vector<16x512xbf16> to vector<16x8xbf16>
    %128 = vector.extract_strided_slice %119 {offsets = [0, 0], sizes = [16, 504], strides = [1, 1]} : vector<16x512xbf16> to vector<16x504xbf16>
    %129 = tpu.concatenate %127, %128 in 1 : vector<16x8xbf16>, vector<16x504xbf16> -> vector<16x512xbf16>
    %c1_55 = arith.constant 1 : index
    %c0_56 = arith.constant 0 : index
    %130 = vector.load %arg3[%c1_55, %c0_56] : memref<9x512xbf16, #tpu.memory_space<vmem>>, vector<1x512xbf16>
    %131 = vector.broadcast %130 : vector<1x512xbf16> to vector<16x512xbf16>
    %132 = arith.mulf %129, %131 : vector<16x512xbf16>
    %c304 = arith.constant 304 : index
    %c0_57 = arith.constant 0 : index
    %133 = vector.load %arg8[%c304, %c0_57] : memref<432x512xbf16, #tpu.memory_space<vmem>>, vector<16x512xbf16>
    tpu.vector_store %arg8[%c304, %c0_57], %132 {strides = array<i32>} : memref<432x512xbf16, #tpu.memory_space<vmem>>, vector<16x512xbf16>,
    %134 = vector.extract_strided_slice %119 {offsets = [0, 505], sizes = [16, 7], strides = [1, 1]} : vector<16x512xbf16> to vector<16x7xbf16>
    %135 = vector.extract_strided_slice %119 {offsets = [0, 0], sizes = [16, 505], strides = [1, 1]} : vector<16x512xbf16> to vector<16x505xbf16>
    %136 = tpu.concatenate %134, %135 in 1 : vector<16x7xbf16>, vector<16x505xbf16> -> vector<16x512xbf16>
    %c2_58 = arith.constant 2 : index
    %c0_59 = arith.constant 0 : index
    %137 = vector.load %arg3[%c2_58, %c0_59] : memref<9x512xbf16, #tpu.memory_space<vmem>>, vector<1x512xbf16>
    %138 = vector.broadcast %137 : vector<1x512xbf16> to vector<16x512xbf16>
    %139 = arith.mulf %136, %138 : vector<16x512xbf16>
    %c320 = arith.constant 320 : index
    %c0_60 = arith.constant 0 : index
    %140 = vector.load %arg8[%c320, %c0_60] : memref<432x512xbf16, #tpu.memory_space<vmem>>, vector<16x512xbf16>
    tpu.vector_store %arg8[%c320, %c0_60], %139 {strides = array<i32>} : memref<432x512xbf16, #tpu.memory_space<vmem>>, vector<16x512xbf16>,
    %141 = vector.extract_strided_slice %119 {offsets = [0, 511], sizes = [16, 1], strides = [1, 1]} : vector<16x512xbf16> to vector<16x1xbf16>
    %142 = vector.extract_strided_slice %119 {offsets = [0, 0], sizes = [16, 511], strides = [1, 1]} : vector<16x512xbf16> to vector<16x511xbf16>
    %143 = tpu.concatenate %141, %142 in 1 : vector<16x1xbf16>, vector<16x511xbf16> -> vector<16x512xbf16>
    %c3_61 = arith.constant 3 : index
    %c0_62 = arith.constant 0 : index
    %144 = vector.load %arg3[%c3_61, %c0_62] : memref<9x512xbf16, #tpu.memory_space<vmem>>, vector<1x512xbf16>
    %145 = vector.broadcast %144 : vector<1x512xbf16> to vector<16x512xbf16>
    %146 = arith.mulf %143, %145 : vector<16x512xbf16>
    %c336 = arith.constant 336 : index
    %c0_63 = arith.constant 0 : index
    %147 = vector.load %arg8[%c336, %c0_63] : memref<432x512xbf16, #tpu.memory_space<vmem>>, vector<16x512xbf16>
    tpu.vector_store %arg8[%c336, %c0_63], %146 {strides = array<i32>} : memref<432x512xbf16, #tpu.memory_space<vmem>>, vector<16x512xbf16>,
    %c352 = arith.constant 352 : index
    %c0_64 = arith.constant 0 : index
    %148 = vector.load %arg8[%c352, %c0_64] : memref<432x512xbf16, #tpu.memory_space<vmem>>, vector<16x512xbf16>
    tpu.vector_store %arg8[%c352, %c0_64], %119 {strides = array<i32>} : memref<432x512xbf16, #tpu.memory_space<vmem>>, vector<16x512xbf16>,
    %149 = vector.extract_strided_slice %119 {offsets = [0, 1], sizes = [16, 511], strides = [1, 1]} : vector<16x512xbf16> to vector<16x511xbf16>
    %150 = vector.extract_strided_slice %119 {offsets = [0, 0], sizes = [16, 1], strides = [1, 1]} : vector<16x512xbf16> to vector<16x1xbf16>
    %151 = tpu.concatenate %149, %150 in 1 : vector<16x511xbf16>, vector<16x1xbf16> -> vector<16x512xbf16>
    %c5_65 = arith.constant 5 : index
    %c0_66 = arith.constant 0 : index
    %152 = vector.load %arg3[%c5_65, %c0_66] : memref<9x512xbf16, #tpu.memory_space<vmem>>, vector<1x512xbf16>
    %153 = vector.broadcast %152 : vector<1x512xbf16> to vector<16x512xbf16>
    %154 = arith.mulf %151, %153 : vector<16x512xbf16>
    %c368 = arith.constant 368 : index
    %c0_67 = arith.constant 0 : index
    %155 = vector.load %arg8[%c368, %c0_67] : memref<432x512xbf16, #tpu.memory_space<vmem>>, vector<16x512xbf16>
    tpu.vector_store %arg8[%c368, %c0_67], %154 {strides = array<i32>} : memref<432x512xbf16, #tpu.memory_space<vmem>>, vector<16x512xbf16>,
    %156 = vector.extract_strided_slice %119 {offsets = [0, 7], sizes = [16, 505], strides = [1, 1]} : vector<16x512xbf16> to vector<16x505xbf16>
    %157 = vector.extract_strided_slice %119 {offsets = [0, 0], sizes = [16, 7], strides = [1, 1]} : vector<16x512xbf16> to vector<16x7xbf16>
    %158 = tpu.concatenate %156, %157 in 1 : vector<16x505xbf16>, vector<16x7xbf16> -> vector<16x512xbf16>
    %c6_68 = arith.constant 6 : index
    %c0_69 = arith.constant 0 : index
    %159 = vector.load %arg3[%c6_68, %c0_69] : memref<9x512xbf16, #tpu.memory_space<vmem>>, vector<1x512xbf16>
    %160 = vector.broadcast %159 : vector<1x512xbf16> to vector<16x512xbf16>
    %161 = arith.mulf %158, %160 : vector<16x512xbf16>
    %c384 = arith.constant 384 : index
    %c0_70 = arith.constant 0 : index
    %162 = vector.load %arg8[%c384, %c0_70] : memref<432x512xbf16, #tpu.memory_space<vmem>>, vector<16x512xbf16>
    tpu.vector_store %arg8[%c384, %c0_70], %161 {strides = array<i32>} : memref<432x512xbf16, #tpu.memory_space<vmem>>, vector<16x512xbf16>,
    %163 = vector.extract_strided_slice %119 {offsets = [0, 8], sizes = [16, 504], strides = [1, 1]} : vector<16x512xbf16> to vector<16x504xbf16>
    %164 = vector.extract_strided_slice %119 {offsets = [0, 0], sizes = [16, 8], strides = [1, 1]} : vector<16x512xbf16> to vector<16x8xbf16>
    %165 = tpu.concatenate %163, %164 in 1 : vector<16x504xbf16>, vector<16x8xbf16> -> vector<16x512xbf16>
    %c7_71 = arith.constant 7 : index
    %c0_72 = arith.constant 0 : index
    %166 = vector.load %arg3[%c7_71, %c0_72] : memref<9x512xbf16, #tpu.memory_space<vmem>>, vector<1x512xbf16>
    %167 = vector.broadcast %166 : vector<1x512xbf16> to vector<16x512xbf16>
    %168 = arith.mulf %165, %167 : vector<16x512xbf16>
    %c400 = arith.constant 400 : index
    %c0_73 = arith.constant 0 : index
    %169 = vector.load %arg8[%c400, %c0_73] : memref<432x512xbf16, #tpu.memory_space<vmem>>, vector<16x512xbf16>
    tpu.vector_store %arg8[%c400, %c0_73], %168 {strides = array<i32>} : memref<432x512xbf16, #tpu.memory_space<vmem>>, vector<16x512xbf16>,
    %170 = vector.extract_strided_slice %119 {offsets = [0, 9], sizes = [16, 503], strides = [1, 1]} : vector<16x512xbf16> to vector<16x503xbf16>
    %171 = vector.extract_strided_slice %119 {offsets = [0, 0], sizes = [16, 9], strides = [1, 1]} : vector<16x512xbf16> to vector<16x9xbf16>
    %172 = tpu.concatenate %170, %171 in 1 : vector<16x503xbf16>, vector<16x9xbf16> -> vector<16x512xbf16>
    %c8_74 = arith.constant 8 : index
    %c0_75 = arith.constant 0 : index
    %173 = vector.load %arg3[%c8_74, %c0_75] : memref<9x512xbf16, #tpu.memory_space<vmem>>, vector<1x512xbf16>
    %174 = vector.broadcast %173 : vector<1x512xbf16> to vector<16x512xbf16>
    %175 = arith.mulf %172, %174 : vector<16x512xbf16>
    %c416 = arith.constant 416 : index
    %c0_76 = arith.constant 0 : index
    %176 = vector.load %arg8[%c416, %c0_76] : memref<432x512xbf16, #tpu.memory_space<vmem>>, vector<16x512xbf16>
    tpu.vector_store %arg8[%c416, %c0_76], %175 {strides = array<i32>} : memref<432x512xbf16, #tpu.memory_space<vmem>>, vector<16x512xbf16>,
    %c0_77 = arith.constant 0 : index
    %c0_78 = arith.constant 0 : index
    %177 = vector.load %arg4[%c0_77, %c0_78] : memref<8x432xbf16, #tpu.memory_space<vmem>>, vector<8x432xbf16>
    %c0_79 = arith.constant 0 : index
    %c0_80 = arith.constant 0 : index
    %178 = vector.load %arg8[%c0_79, %c0_80] : memref<432x512xbf16, #tpu.memory_space<vmem>>, vector<432x512xbf16>
    %cst = arith.constant dense<0.000000e+00> : vector<8x512xf32>
    %179 = tpu.matmul %177, %178, %cst {dimension_numbers = #tpu.dot_dimension_numbers<[1], [0], [0], [1], [0, 0, 1, 1], [], []>} : vector<8x432xbf16>, vector<432x512xbf16>, vector<8x512xf32> -> vector<8x512xf32>
    %c0_81 = arith.constant 0 : index
    %c0_82 = arith.constant 0 : index
    %180 = vector.load %arg5[%c0_81, %c0_82] : memref<8x1xf32, #tpu.memory_space<vmem>>, vector<8x1xf32>
    %181 = vector.broadcast %180 : vector<8x1xf32> to vector<8x512xf32>
    %182 = arith.addf %179, %181 : vector<8x512xf32>
    %cst_83 = arith.constant 0.000000e+00 : f32
    %183 = vector.broadcast %cst_83 : f32 to vector<8x512xf32>
    %184 = arith.cmpf oge, %182, %183 : vector<8x512xf32>
    %cst_84 = arith.constant 0.00999999977 : f32
    %185 = vector.broadcast %cst_84 : f32 to vector<8x512xf32>
    %186 = arith.mulf %185, %182 : vector<8x512xf32>
    %187 = arith.select %184, %182, %186 : vector<8x512xi1>, vector<8x512xf32>
    %188 = arith.truncf %187 : vector<8x512xf32> to vector<8x512xbf16>
    %c0_85 = arith.constant 0 : index
    %c0_86 = arith.constant 0 : index
    %c0_87 = arith.constant 0 : index
    %189 = vector.load %arg6[%c0_85, %c0_86, %c0_87] : memref<1x8x512xbf16, #tpu.memory_space<vmem>>, vector<1x8x512xbf16>
    %190 = vector.shape_cast %189 : vector<1x8x512xbf16> to vector<8x512xbf16>
    %191 = vector.shape_cast %188 : vector<8x512xbf16> to vector<1x8x512xbf16>
    tpu.vector_store %arg6[%c0_85, %c0_86, %c0_87], %191 {strides = array<i32>} : memref<1x8x512xbf16, #tpu.memory_space<vmem>>, vector<1x8x512xbf16>,
    %cst_88 = arith.constant dense<0.000000e+00> : vector<8xf32>
    %192 = vector.multi_reduction <add>, %187, %cst_88 [1] : vector<8x512xf32> to vector<8xf32>
    %193 = vector.shape_cast %192 : vector<8xf32> to vector<8x1xf32>
    %c0_89 = arith.constant 0 : index
    %c0_90 = arith.constant 0 : index
    %c0_91 = arith.constant 0 : index
    %c0_92 = arith.constant 0 : index
    %194 = vector.load %arg7[%c0_89, %c0_90, %c0_91, %c0_92] : memref<1x1x8x2xf32, #tpu.memory_space<vmem>>, vector<1x1x8x1xf32>
    %195 = vector.shape_cast %194 : vector<1x1x8x1xf32> to vector<8x1xf32>
    %196 = vector.shape_cast %193 : vector<8x1xf32> to vector<1x1x8x1xf32>
    tpu.vector_store %arg7[%c0_89, %c0_90, %c0_91, %c0_92], %196 {strides = array<i32>} : memref<1x1x8x2xf32, #tpu.memory_space<vmem>>, vector<1x1x8x1xf32>,
    %197 = arith.mulf %187, %187 : vector<8x512xf32>
    %cst_93 = arith.constant dense<0.000000e+00> : vector<8xf32>
    %198 = vector.multi_reduction <add>, %197, %cst_93 [1] : vector<8x512xf32> to vector<8xf32>
    %199 = vector.shape_cast %198 : vector<8xf32> to vector<8x1xf32>
    %c0_94 = arith.constant 0 : index
    %c0_95 = arith.constant 0 : index
    %c0_96 = arith.constant 0 : index
    %c1_97 = arith.constant 1 : index
    %200 = vector.load %arg7[%c0_94, %c0_95, %c0_96, %c1_97] : memref<1x1x8x2xf32, #tpu.memory_space<vmem>>, vector<1x1x8x1xf32>
    %201 = vector.shape_cast %200 : vector<1x1x8x1xf32> to vector<8x1xf32>
    %202 = vector.shape_cast %199 : vector<8x1xf32> to vector<1x1x8x1xf32>
    tpu.vector_store %arg7[%c0_94, %c0_95, %c0_96, %c1_97], %202 {strides = array<i32>} : memref<1x1x8x2xf32, #tpu.memory_space<vmem>>, vector<1x1x8x1xf32>,
    return
  }
  func.func @transform_0(%arg0: i32, %arg1: i32) -> (i32, i32, i32) {
    %c0_i32 = arith.constant 0 : i32
    %c0_i32_0 = arith.constant 0 : i32
    return %arg0, %c0_i32, %arg1 : i32, i32, i32
  }
  func.func @transform_1(%arg0: i32, %arg1: i32) -> (i32, i32) {
    %c0_i32 = arith.constant 0 : i32
    %c0_i32_0 = arith.constant 0 : i32
    return %c0_i32, %arg1 : i32, i32
  }
  func.func @transform_2(%arg0: i32, %arg1: i32) -> (i32, i32) {
    %c0_i32 = arith.constant 0 : i32
    %c0_i32_0 = arith.constant 0 : i32
    %c0_i32_1 = arith.constant 0 : i32
    return %c0_i32, %c0_i32_0 : i32, i32
  }
  func.func @transform_3(%arg0: i32, %arg1: i32) -> (i32, i32) {
    %c0_i32 = arith.constant 0 : i32
    %c0_i32_0 = arith.constant 0 : i32
    %c0_i32_1 = arith.constant 0 : i32
    return %c0_i32, %c0_i32_0 : i32, i32
  }
  func.func @transform_4(%arg0: i32, %arg1: i32) -> (i32, i32, i32) {
    %c0_i32 = arith.constant 0 : i32
    %c0_i32_0 = arith.constant 0 : i32
    return %arg0, %c0_i32, %arg1 : i32, i32, i32
  }
  func.func @transform_5(%arg0: i32, %arg1: i32) -> (i32, i32, i32, i32) {
    %c0_i32 = arith.constant 0 : i32
    %c0_i32_0 = arith.constant 0 : i32
    %c0_i32_1 = arith.constant 0 : i32
    return %arg0, %arg1, %c0_i32, %c0_i32_0 : i32, i32, i32, i32
  }
}

module attributes {stable_mosaic.version = 11 : i64} {
  func.func @kernel(%arg0: i32, %arg1: i32, %arg2: memref<1x48x512xbf16, #tpu.memory_space<vmem>>, %arg3: memref<9x512xbf16, #tpu.memory_space<vmem>>, %arg4: memref<8x432xbf16, #tpu.memory_space<vmem>>, %arg5: memref<8x1xf32, #tpu.memory_space<vmem>>, %arg6: memref<1x8x512xf32, #tpu.memory_space<vmem>>, %arg7: memref<1x1x8x2xf32, #tpu.memory_space<vmem>>, %arg8: memref<432x512xbf16, #tpu.memory_space<vmem>>) attributes {dimension_semantics = [#tpu.dimension_semantics<parallel>, #tpu.dimension_semantics<parallel>], iteration_bounds = array<i64: 2, 1>, scalar_prefetch = 0 : i64, scratch_operands = 1 : i64, tpu.core_type = #tpu.core_type<tc>, window_params = [{transform_indices = @transform_0, window_bounds = array<i64: 1, 48, 512>}, {transform_indices = @transform_1, window_bounds = array<i64: 9, 512>}, {pipeline_mode = #tpu.pipeline_mode<synchronous>, transform_indices = @transform_2, window_bounds = array<i64: 8, 432>}, {pipeline_mode = #tpu.pipeline_mode<synchronous>, transform_indices = @transform_3, window_bounds = array<i64: 8, 1>}, {transform_indices = @transform_4, window_bounds = array<i64: 1, 8, 512>}, {transform_indices = @transform_5, window_bounds = array<i64: 1, 1, 8, 2>}]} {
    %c0 = arith.constant 0 : index
    %c0_0 = arith.constant 0 : index
    %c0_1 = arith.constant 0 : index
    %0 = vector.load %arg2[%c0, %c0_0, %c0_1] : memref<1x48x512xbf16, #tpu.memory_space<vmem>>, vector<1x16x512xbf16>
    %1 = vector.shape_cast %0 : vector<1x16x512xbf16> to vector<16x512xbf16>
    %2 = vector.extract_strided_slice %1 {offsets = [0, 503], sizes = [16, 9], strides = [1, 1]} : vector<16x512xbf16> to vector<16x9xbf16>
    %3 = vector.extract_strided_slice %1 {offsets = [0, 0], sizes = [16, 503], strides = [1, 1]} : vector<16x512xbf16> to vector<16x503xbf16>
    %4 = tpu.concatenate %2, %3 in 1 : vector<16x9xbf16>, vector<16x503xbf16> -> vector<16x512xbf16>
    %c0_2 = arith.constant 0 : index
    %c0_3 = arith.constant 0 : index
    %5 = vector.load %arg3[%c0_2, %c0_3] : memref<9x512xbf16, #tpu.memory_space<vmem>>, vector<1x512xbf16>
    %6 = vector.broadcast %5 : vector<1x512xbf16> to vector<16x512xbf16>
    %7 = arith.mulf %4, %6 : vector<16x512xbf16>
    %c0_4 = arith.constant 0 : index
    %c0_5 = arith.constant 0 : index
    %8 = vector.load %arg8[%c0_4, %c0_5] : memref<432x512xbf16, #tpu.memory_space<vmem>>, vector<16x512xbf16>
    tpu.vector_store %arg8[%c0_4, %c0_5], %7 {strides = array<i32>} : memref<432x512xbf16, #tpu.memory_space<vmem>>, vector<16x512xbf16>,
    %9 = vector.extract_strided_slice %1 {offsets = [0, 504], sizes = [16, 8], strides = [1, 1]} : vector<16x512xbf16> to vector<16x8xbf16>
    %10 = vector.extract_strided_slice %1 {offsets = [0, 0], sizes = [16, 504], strides = [1, 1]} : vector<16x512xbf16> to vector<16x504xbf16>
    %11 = tpu.concatenate %9, %10 in 1 : vector<16x8xbf16>, vector<16x504xbf16> -> vector<16x512xbf16>
    %c1 = arith.constant 1 : index
    %c0_6 = arith.constant 0 : index
    %12 = vector.load %arg3[%c1, %c0_6] : memref<9x512xbf16, #tpu.memory_space<vmem>>, vector<1x512xbf16>
    %13 = vector.broadcast %12 : vector<1x512xbf16> to vector<16x512xbf16>
    %14 = arith.mulf %11, %13 : vector<16x512xbf16>
    %c16 = arith.constant 16 : index
    %c0_7 = arith.constant 0 : index
    %15 = vector.load %arg8[%c16, %c0_7] : memref<432x512xbf16, #tpu.memory_space<vmem>>, vector<16x512xbf16>
    tpu.vector_store %arg8[%c16, %c0_7], %14 {strides = array<i32>} : memref<432x512xbf16, #tpu.memory_space<vmem>>, vector<16x512xbf16>,
    %16 = vector.extract_strided_slice %1 {offsets = [0, 505], sizes = [16, 7], strides = [1, 1]} : vector<16x512xbf16> to vector<16x7xbf16>
    %17 = vector.extract_strided_slice %1 {offsets = [0, 0], sizes = [16, 505], strides = [1, 1]} : vector<16x512xbf16> to vector<16x505xbf16>
    %18 = tpu.concatenate %16, %17 in 1 : vector<16x7xbf16>, vector<16x505xbf16> -> vector<16x512xbf16>
    %c2 = arith.constant 2 : index
    %c0_8 = arith.constant 0 : index
    %19 = vector.load %arg3[%c2, %c0_8] : memref<9x512xbf16, #tpu.memory_space<vmem>>, vector<1x512xbf16>
    %20 = vector.broadcast %19 : vector<1x512xbf16> to vector<16x512xbf16>
    %21 = arith.mulf %18, %20 : vector<16x512xbf16>
    %c32 = arith.constant 32 : index
    %c0_9 = arith.constant 0 : index
    %22 = vector.load %arg8[%c32, %c0_9] : memref<432x512xbf16, #tpu.memory_space<vmem>>, vector<16x512xbf16>
    tpu.vector_store %arg8[%c32, %c0_9], %21 {strides = array<i32>} : memref<432x512xbf16, #tpu.memory_space<vmem>>, vector<16x512xbf16>,
    %23 = vector.extract_strided_slice %1 {offsets = [0, 511], sizes = [16, 1], strides = [1, 1]} : vector<16x512xbf16> to vector<16x1xbf16>
    %24 = vector.extract_strided_slice %1 {offsets = [0, 0], sizes = [16, 511], strides = [1, 1]} : vector<16x512xbf16> to vector<16x511xbf16>
    %25 = tpu.concatenate %23, %24 in 1 : vector<16x1xbf16>, vector<16x511xbf16> -> vector<16x512xbf16>
    %c3 = arith.constant 3 : index
    %c0_10 = arith.constant 0 : index
    %26 = vector.load %arg3[%c3, %c0_10] : memref<9x512xbf16, #tpu.memory_space<vmem>>, vector<1x512xbf16>
    %27 = vector.broadcast %26 : vector<1x512xbf16> to vector<16x512xbf16>
    %28 = arith.mulf %25, %27 : vector<16x512xbf16>
    %c48 = arith.constant 48 : index
    %c0_11 = arith.constant 0 : index
    %29 = vector.load %arg8[%c48, %c0_11] : memref<432x512xbf16, #tpu.memory_space<vmem>>, vector<16x512xbf16>
    tpu.vector_store %arg8[%c48, %c0_11], %28 {strides = array<i32>} : memref<432x512xbf16, #tpu.memory_space<vmem>>, vector<16x512xbf16>,
    %c64 = arith.constant 64 : index
    %c0_12 = arith.constant 0 : index
    %30 = vector.load %arg8[%c64, %c0_12] : memref<432x512xbf16, #tpu.memory_space<vmem>>, vector<16x512xbf16>
    tpu.vector_store %arg8[%c64, %c0_12], %1 {strides = array<i32>} : memref<432x512xbf16, #tpu.memory_space<vmem>>, vector<16x512xbf16>,
    %31 = vector.extract_strided_slice %1 {offsets = [0, 1], sizes = [16, 511], strides = [1, 1]} : vector<16x512xbf16> to vector<16x511xbf16>
    %32 = vector.extract_strided_slice %1 {offsets = [0, 0], sizes = [16, 1], strides = [1, 1]} : vector<16x512xbf16> to vector<16x1xbf16>
    %33 = tpu.concatenate %31, %32 in 1 : vector<16x511xbf16>, vector<16x1xbf16> -> vector<16x512xbf16>
    %c5 = arith.constant 5 : index
    %c0_13 = arith.constant 0 : index
    %34 = vector.load %arg3[%c5, %c0_13] : memref<9x512xbf16, #tpu.memory_space<vmem>>, vector<1x512xbf16>
    %35 = vector.broadcast %34 : vector<1x512xbf16> to vector<16x512xbf16>
    %36 = arith.mulf %33, %35 : vector<16x512xbf16>
    %c80 = arith.constant 80 : index
    %c0_14 = arith.constant 0 : index
    %37 = vector.load %arg8[%c80, %c0_14] : memref<432x512xbf16, #tpu.memory_space<vmem>>, vector<16x512xbf16>
    tpu.vector_store %arg8[%c80, %c0_14], %36 {strides = array<i32>} : memref<432x512xbf16, #tpu.memory_space<vmem>>, vector<16x512xbf16>,
    %38 = vector.extract_strided_slice %1 {offsets = [0, 7], sizes = [16, 505], strides = [1, 1]} : vector<16x512xbf16> to vector<16x505xbf16>
    %39 = vector.extract_strided_slice %1 {offsets = [0, 0], sizes = [16, 7], strides = [1, 1]} : vector<16x512xbf16> to vector<16x7xbf16>
    %40 = tpu.concatenate %38, %39 in 1 : vector<16x505xbf16>, vector<16x7xbf16> -> vector<16x512xbf16>
    %c6 = arith.constant 6 : index
    %c0_15 = arith.constant 0 : index
    %41 = vector.load %arg3[%c6, %c0_15] : memref<9x512xbf16, #tpu.memory_space<vmem>>, vector<1x512xbf16>
    %42 = vector.broadcast %41 : vector<1x512xbf16> to vector<16x512xbf16>
    %43 = arith.mulf %40, %42 : vector<16x512xbf16>
    %c96 = arith.constant 96 : index
    %c0_16 = arith.constant 0 : index
    %44 = vector.load %arg8[%c96, %c0_16] : memref<432x512xbf16, #tpu.memory_space<vmem>>, vector<16x512xbf16>
    tpu.vector_store %arg8[%c96, %c0_16], %43 {strides = array<i32>} : memref<432x512xbf16, #tpu.memory_space<vmem>>, vector<16x512xbf16>,
    %45 = vector.extract_strided_slice %1 {offsets = [0, 8], sizes = [16, 504], strides = [1, 1]} : vector<16x512xbf16> to vector<16x504xbf16>
    %46 = vector.extract_strided_slice %1 {offsets = [0, 0], sizes = [16, 8], strides = [1, 1]} : vector<16x512xbf16> to vector<16x8xbf16>
    %47 = tpu.concatenate %45, %46 in 1 : vector<16x504xbf16>, vector<16x8xbf16> -> vector<16x512xbf16>
    %c7 = arith.constant 7 : index
    %c0_17 = arith.constant 0 : index
    %48 = vector.load %arg3[%c7, %c0_17] : memref<9x512xbf16, #tpu.memory_space<vmem>>, vector<1x512xbf16>
    %49 = vector.broadcast %48 : vector<1x512xbf16> to vector<16x512xbf16>
    %50 = arith.mulf %47, %49 : vector<16x512xbf16>
    %c112 = arith.constant 112 : index
    %c0_18 = arith.constant 0 : index
    %51 = vector.load %arg8[%c112, %c0_18] : memref<432x512xbf16, #tpu.memory_space<vmem>>, vector<16x512xbf16>
    tpu.vector_store %arg8[%c112, %c0_18], %50 {strides = array<i32>} : memref<432x512xbf16, #tpu.memory_space<vmem>>, vector<16x512xbf16>,
    %52 = vector.extract_strided_slice %1 {offsets = [0, 9], sizes = [16, 503], strides = [1, 1]} : vector<16x512xbf16> to vector<16x503xbf16>
    %53 = vector.extract_strided_slice %1 {offsets = [0, 0], sizes = [16, 9], strides = [1, 1]} : vector<16x512xbf16> to vector<16x9xbf16>
    %54 = tpu.concatenate %52, %53 in 1 : vector<16x503xbf16>, vector<16x9xbf16> -> vector<16x512xbf16>
    %c8 = arith.constant 8 : index
    %c0_19 = arith.constant 0 : index
    %55 = vector.load %arg3[%c8, %c0_19] : memref<9x512xbf16, #tpu.memory_space<vmem>>, vector<1x512xbf16>
    %56 = vector.broadcast %55 : vector<1x512xbf16> to vector<16x512xbf16>
    %57 = arith.mulf %54, %56 : vector<16x512xbf16>
    %c128 = arith.constant 128 : index
    %c0_20 = arith.constant 0 : index
    %58 = vector.load %arg8[%c128, %c0_20] : memref<432x512xbf16, #tpu.memory_space<vmem>>, vector<16x512xbf16>
    tpu.vector_store %arg8[%c128, %c0_20], %57 {strides = array<i32>} : memref<432x512xbf16, #tpu.memory_space<vmem>>, vector<16x512xbf16>,
    %c0_21 = arith.constant 0 : index
    %c16_22 = arith.constant 16 : index
    %c0_23 = arith.constant 0 : index
    %59 = vector.load %arg2[%c0_21, %c16_22, %c0_23] : memref<1x48x512xbf16, #tpu.memory_space<vmem>>, vector<1x16x512xbf16>
    %60 = vector.shape_cast %59 : vector<1x16x512xbf16> to vector<16x512xbf16>
    %61 = vector.extract_strided_slice %60 {offsets = [0, 503], sizes = [16, 9], strides = [1, 1]} : vector<16x512xbf16> to vector<16x9xbf16>
    %62 = vector.extract_strided_slice %60 {offsets = [0, 0], sizes = [16, 503], strides = [1, 1]} : vector<16x512xbf16> to vector<16x503xbf16>
    %63 = tpu.concatenate %61, %62 in 1 : vector<16x9xbf16>, vector<16x503xbf16> -> vector<16x512xbf16>
    %c0_24 = arith.constant 0 : index
    %c0_25 = arith.constant 0 : index
    %64 = vector.load %arg3[%c0_24, %c0_25] : memref<9x512xbf16, #tpu.memory_space<vmem>>, vector<1x512xbf16>
    %65 = vector.broadcast %64 : vector<1x512xbf16> to vector<16x512xbf16>
    %66 = arith.mulf %63, %65 : vector<16x512xbf16>
    %c144 = arith.constant 144 : index
    %c0_26 = arith.constant 0 : index
    %67 = vector.load %arg8[%c144, %c0_26] : memref<432x512xbf16, #tpu.memory_space<vmem>>, vector<16x512xbf16>
    tpu.vector_store %arg8[%c144, %c0_26], %66 {strides = array<i32>} : memref<432x512xbf16, #tpu.memory_space<vmem>>, vector<16x512xbf16>,
    %68 = vector.extract_strided_slice %60 {offsets = [0, 504], sizes = [16, 8], strides = [1, 1]} : vector<16x512xbf16> to vector<16x8xbf16>
    %69 = vector.extract_strided_slice %60 {offsets = [0, 0], sizes = [16, 504], strides = [1, 1]} : vector<16x512xbf16> to vector<16x504xbf16>
    %70 = tpu.concatenate %68, %69 in 1 : vector<16x8xbf16>, vector<16x504xbf16> -> vector<16x512xbf16>
    %c1_27 = arith.constant 1 : index
    %c0_28 = arith.constant 0 : index
    %71 = vector.load %arg3[%c1_27, %c0_28] : memref<9x512xbf16, #tpu.memory_space<vmem>>, vector<1x512xbf16>
    %72 = vector.broadcast %71 : vector<1x512xbf16> to vector<16x512xbf16>
    %73 = arith.mulf %70, %72 : vector<16x512xbf16>
    %c160 = arith.constant 160 : index
    %c0_29 = arith.constant 0 : index
    %74 = vector.load %arg8[%c160, %c0_29] : memref<432x512xbf16, #tpu.memory_space<vmem>>, vector<16x512xbf16>
    tpu.vector_store %arg8[%c160, %c0_29], %73 {strides = array<i32>} : memref<432x512xbf16, #tpu.memory_space<vmem>>, vector<16x512xbf16>,
    %75 = vector.extract_strided_slice %60 {offsets = [0, 505], sizes = [16, 7], strides = [1, 1]} : vector<16x512xbf16> to vector<16x7xbf16>
    %76 = vector.extract_strided_slice %60 {offsets = [0, 0], sizes = [16, 505], strides = [1, 1]} : vector<16x512xbf16> to vector<16x505xbf16>
    %77 = tpu.concatenate %75, %76 in 1 : vector<16x7xbf16>, vector<16x505xbf16> -> vector<16x512xbf16>
    %c2_30 = arith.constant 2 : index
    %c0_31 = arith.constant 0 : index
    %78 = vector.load %arg3[%c2_30, %c0_31] : memref<9x512xbf16, #tpu.memory_space<vmem>>, vector<1x512xbf16>
    %79 = vector.broadcast %78 : vector<1x512xbf16> to vector<16x512xbf16>
    %80 = arith.mulf %77, %79 : vector<16x512xbf16>
    %c176 = arith.constant 176 : index
    %c0_32 = arith.constant 0 : index
    %81 = vector.load %arg8[%c176, %c0_32] : memref<432x512xbf16, #tpu.memory_space<vmem>>, vector<16x512xbf16>
    tpu.vector_store %arg8[%c176, %c0_32], %80 {strides = array<i32>} : memref<432x512xbf16, #tpu.memory_space<vmem>>, vector<16x512xbf16>,
    %82 = vector.extract_strided_slice %60 {offsets = [0, 511], sizes = [16, 1], strides = [1, 1]} : vector<16x512xbf16> to vector<16x1xbf16>
    %83 = vector.extract_strided_slice %60 {offsets = [0, 0], sizes = [16, 511], strides = [1, 1]} : vector<16x512xbf16> to vector<16x511xbf16>
    %84 = tpu.concatenate %82, %83 in 1 : vector<16x1xbf16>, vector<16x511xbf16> -> vector<16x512xbf16>
    %c3_33 = arith.constant 3 : index
    %c0_34 = arith.constant 0 : index
    %85 = vector.load %arg3[%c3_33, %c0_34] : memref<9x512xbf16, #tpu.memory_space<vmem>>, vector<1x512xbf16>
    %86 = vector.broadcast %85 : vector<1x512xbf16> to vector<16x512xbf16>
    %87 = arith.mulf %84, %86 : vector<16x512xbf16>
    %c192 = arith.constant 192 : index
    %c0_35 = arith.constant 0 : index
    %88 = vector.load %arg8[%c192, %c0_35] : memref<432x512xbf16, #tpu.memory_space<vmem>>, vector<16x512xbf16>
    tpu.vector_store %arg8[%c192, %c0_35], %87 {strides = array<i32>} : memref<432x512xbf16, #tpu.memory_space<vmem>>, vector<16x512xbf16>,
    %c208 = arith.constant 208 : index
    %c0_36 = arith.constant 0 : index
    %89 = vector.load %arg8[%c208, %c0_36] : memref<432x512xbf16, #tpu.memory_space<vmem>>, vector<16x512xbf16>
    tpu.vector_store %arg8[%c208, %c0_36], %60 {strides = array<i32>} : memref<432x512xbf16, #tpu.memory_space<vmem>>, vector<16x512xbf16>,
    %90 = vector.extract_strided_slice %60 {offsets = [0, 1], sizes = [16, 511], strides = [1, 1]} : vector<16x512xbf16> to vector<16x511xbf16>
    %91 = vector.extract_strided_slice %60 {offsets = [0, 0], sizes = [16, 1], strides = [1, 1]} : vector<16x512xbf16> to vector<16x1xbf16>
    %92 = tpu.concatenate %90, %91 in 1 : vector<16x511xbf16>, vector<16x1xbf16> -> vector<16x512xbf16>
    %c5_37 = arith.constant 5 : index
    %c0_38 = arith.constant 0 : index
    %93 = vector.load %arg3[%c5_37, %c0_38] : memref<9x512xbf16, #tpu.memory_space<vmem>>, vector<1x512xbf16>
    %94 = vector.broadcast %93 : vector<1x512xbf16> to vector<16x512xbf16>
    %95 = arith.mulf %92, %94 : vector<16x512xbf16>
    %c224 = arith.constant 224 : index
    %c0_39 = arith.constant 0 : index
    %96 = vector.load %arg8[%c224, %c0_39] : memref<432x512xbf16, #tpu.memory_space<vmem>>, vector<16x512xbf16>
    tpu.vector_store %arg8[%c224, %c0_39], %95 {strides = array<i32>} : memref<432x512xbf16, #tpu.memory_space<vmem>>, vector<16x512xbf16>,
    %97 = vector.extract_strided_slice %60 {offsets = [0, 7], sizes = [16, 505], strides = [1, 1]} : vector<16x512xbf16> to vector<16x505xbf16>
    %98 = vector.extract_strided_slice %60 {offsets = [0, 0], sizes = [16, 7], strides = [1, 1]} : vector<16x512xbf16> to vector<16x7xbf16>
    %99 = tpu.concatenate %97, %98 in 1 : vector<16x505xbf16>, vector<16x7xbf16> -> vector<16x512xbf16>
    %c6_40 = arith.constant 6 : index
    %c0_41 = arith.constant 0 : index
    %100 = vector.load %arg3[%c6_40, %c0_41] : memref<9x512xbf16, #tpu.memory_space<vmem>>, vector<1x512xbf16>
    %101 = vector.broadcast %100 : vector<1x512xbf16> to vector<16x512xbf16>
    %102 = arith.mulf %99, %101 : vector<16x512xbf16>
    %c240 = arith.constant 240 : index
    %c0_42 = arith.constant 0 : index
    %103 = vector.load %arg8[%c240, %c0_42] : memref<432x512xbf16, #tpu.memory_space<vmem>>, vector<16x512xbf16>
    tpu.vector_store %arg8[%c240, %c0_42], %102 {strides = array<i32>} : memref<432x512xbf16, #tpu.memory_space<vmem>>, vector<16x512xbf16>,
    %104 = vector.extract_strided_slice %60 {offsets = [0, 8], sizes = [16, 504], strides = [1, 1]} : vector<16x512xbf16> to vector<16x504xbf16>
    %105 = vector.extract_strided_slice %60 {offsets = [0, 0], sizes = [16, 8], strides = [1, 1]} : vector<16x512xbf16> to vector<16x8xbf16>
    %106 = tpu.concatenate %104, %105 in 1 : vector<16x504xbf16>, vector<16x8xbf16> -> vector<16x512xbf16>
    %c7_43 = arith.constant 7 : index
    %c0_44 = arith.constant 0 : index
    %107 = vector.load %arg3[%c7_43, %c0_44] : memref<9x512xbf16, #tpu.memory_space<vmem>>, vector<1x512xbf16>
    %108 = vector.broadcast %107 : vector<1x512xbf16> to vector<16x512xbf16>
    %109 = arith.mulf %106, %108 : vector<16x512xbf16>
    %c256 = arith.constant 256 : index
    %c0_45 = arith.constant 0 : index
    %110 = vector.load %arg8[%c256, %c0_45] : memref<432x512xbf16, #tpu.memory_space<vmem>>, vector<16x512xbf16>
    tpu.vector_store %arg8[%c256, %c0_45], %109 {strides = array<i32>} : memref<432x512xbf16, #tpu.memory_space<vmem>>, vector<16x512xbf16>,
    %111 = vector.extract_strided_slice %60 {offsets = [0, 9], sizes = [16, 503], strides = [1, 1]} : vector<16x512xbf16> to vector<16x503xbf16>
    %112 = vector.extract_strided_slice %60 {offsets = [0, 0], sizes = [16, 9], strides = [1, 1]} : vector<16x512xbf16> to vector<16x9xbf16>
    %113 = tpu.concatenate %111, %112 in 1 : vector<16x503xbf16>, vector<16x9xbf16> -> vector<16x512xbf16>
    %c8_46 = arith.constant 8 : index
    %c0_47 = arith.constant 0 : index
    %114 = vector.load %arg3[%c8_46, %c0_47] : memref<9x512xbf16, #tpu.memory_space<vmem>>, vector<1x512xbf16>
    %115 = vector.broadcast %114 : vector<1x512xbf16> to vector<16x512xbf16>
    %116 = arith.mulf %113, %115 : vector<16x512xbf16>
    %c272 = arith.constant 272 : index
    %c0_48 = arith.constant 0 : index
    %117 = vector.load %arg8[%c272, %c0_48] : memref<432x512xbf16, #tpu.memory_space<vmem>>, vector<16x512xbf16>
    tpu.vector_store %arg8[%c272, %c0_48], %116 {strides = array<i32>} : memref<432x512xbf16, #tpu.memory_space<vmem>>, vector<16x512xbf16>,
    %c0_49 = arith.constant 0 : index
    %c32_50 = arith.constant 32 : index
    %c0_51 = arith.constant 0 : index
    %118 = vector.load %arg2[%c0_49, %c32_50, %c0_51] : memref<1x48x512xbf16, #tpu.memory_space<vmem>>, vector<1x16x512xbf16>
    %119 = vector.shape_cast %118 : vector<1x16x512xbf16> to vector<16x512xbf16>
    %120 = vector.extract_strided_slice %119 {offsets = [0, 503], sizes = [16, 9], strides = [1, 1]} : vector<16x512xbf16> to vector<16x9xbf16>
    %121 = vector.extract_strided_slice %119 {offsets = [0, 0], sizes = [16, 503], strides = [1, 1]} : vector<16x512xbf16> to vector<16x503xbf16>
    %122 = tpu.concatenate %120, %121 in 1 : vector<16x9xbf16>, vector<16x503xbf16> -> vector<16x512xbf16>
    %c0_52 = arith.constant 0 : index
    %c0_53 = arith.constant 0 : index
    %123 = vector.load %arg3[%c0_52, %c0_53] : memref<9x512xbf16, #tpu.memory_space<vmem>>, vector<1x512xbf16>
    %124 = vector.broadcast %123 : vector<1x512xbf16> to vector<16x512xbf16>
    %125 = arith.mulf %122, %124 : vector<16x512xbf16>
    %c288 = arith.constant 288 : index
    %c0_54 = arith.constant 0 : index
    %126 = vector.load %arg8[%c288, %c0_54] : memref<432x512xbf16, #tpu.memory_space<vmem>>, vector<16x512xbf16>
    tpu.vector_store %arg8[%c288, %c0_54], %125 {strides = array<i32>} : memref<432x512xbf16, #tpu.memory_space<vmem>>, vector<16x512xbf16>,
    %127 = vector.extract_strided_slice %119 {offsets = [0, 504], sizes = [16, 8], strides = [1, 1]} : vector<16x512xbf16> to vector<16x8xbf16>
    %128 = vector.extract_strided_slice %119 {offsets = [0, 0], sizes = [16, 504], strides = [1, 1]} : vector<16x512xbf16> to vector<16x504xbf16>
    %129 = tpu.concatenate %127, %128 in 1 : vector<16x8xbf16>, vector<16x504xbf16> -> vector<16x512xbf16>
    %c1_55 = arith.constant 1 : index
    %c0_56 = arith.constant 0 : index
    %130 = vector.load %arg3[%c1_55, %c0_56] : memref<9x512xbf16, #tpu.memory_space<vmem>>, vector<1x512xbf16>
    %131 = vector.broadcast %130 : vector<1x512xbf16> to vector<16x512xbf16>
    %132 = arith.mulf %129, %131 : vector<16x512xbf16>
    %c304 = arith.constant 304 : index
    %c0_57 = arith.constant 0 : index
    %133 = vector.load %arg8[%c304, %c0_57] : memref<432x512xbf16, #tpu.memory_space<vmem>>, vector<16x512xbf16>
    tpu.vector_store %arg8[%c304, %c0_57], %132 {strides = array<i32>} : memref<432x512xbf16, #tpu.memory_space<vmem>>, vector<16x512xbf16>,
    %134 = vector.extract_strided_slice %119 {offsets = [0, 505], sizes = [16, 7], strides = [1, 1]} : vector<16x512xbf16> to vector<16x7xbf16>
    %135 = vector.extract_strided_slice %119 {offsets = [0, 0], sizes = [16, 505], strides = [1, 1]} : vector<16x512xbf16> to vector<16x505xbf16>
    %136 = tpu.concatenate %134, %135 in 1 : vector<16x7xbf16>, vector<16x505xbf16> -> vector<16x512xbf16>
    %c2_58 = arith.constant 2 : index
    %c0_59 = arith.constant 0 : index
    %137 = vector.load %arg3[%c2_58, %c0_59] : memref<9x512xbf16, #tpu.memory_space<vmem>>, vector<1x512xbf16>
    %138 = vector.broadcast %137 : vector<1x512xbf16> to vector<16x512xbf16>
    %139 = arith.mulf %136, %138 : vector<16x512xbf16>
    %c320 = arith.constant 320 : index
    %c0_60 = arith.constant 0 : index
    %140 = vector.load %arg8[%c320, %c0_60] : memref<432x512xbf16, #tpu.memory_space<vmem>>, vector<16x512xbf16>
    tpu.vector_store %arg8[%c320, %c0_60], %139 {strides = array<i32>} : memref<432x512xbf16, #tpu.memory_space<vmem>>, vector<16x512xbf16>,
    %141 = vector.extract_strided_slice %119 {offsets = [0, 511], sizes = [16, 1], strides = [1, 1]} : vector<16x512xbf16> to vector<16x1xbf16>
    %142 = vector.extract_strided_slice %119 {offsets = [0, 0], sizes = [16, 511], strides = [1, 1]} : vector<16x512xbf16> to vector<16x511xbf16>
    %143 = tpu.concatenate %141, %142 in 1 : vector<16x1xbf16>, vector<16x511xbf16> -> vector<16x512xbf16>
    %c3_61 = arith.constant 3 : index
    %c0_62 = arith.constant 0 : index
    %144 = vector.load %arg3[%c3_61, %c0_62] : memref<9x512xbf16, #tpu.memory_space<vmem>>, vector<1x512xbf16>
    %145 = vector.broadcast %144 : vector<1x512xbf16> to vector<16x512xbf16>
    %146 = arith.mulf %143, %145 : vector<16x512xbf16>
    %c336 = arith.constant 336 : index
    %c0_63 = arith.constant 0 : index
    %147 = vector.load %arg8[%c336, %c0_63] : memref<432x512xbf16, #tpu.memory_space<vmem>>, vector<16x512xbf16>
    tpu.vector_store %arg8[%c336, %c0_63], %146 {strides = array<i32>} : memref<432x512xbf16, #tpu.memory_space<vmem>>, vector<16x512xbf16>,
    %c352 = arith.constant 352 : index
    %c0_64 = arith.constant 0 : index
    %148 = vector.load %arg8[%c352, %c0_64] : memref<432x512xbf16, #tpu.memory_space<vmem>>, vector<16x512xbf16>
    tpu.vector_store %arg8[%c352, %c0_64], %119 {strides = array<i32>} : memref<432x512xbf16, #tpu.memory_space<vmem>>, vector<16x512xbf16>,
    %149 = vector.extract_strided_slice %119 {offsets = [0, 1], sizes = [16, 511], strides = [1, 1]} : vector<16x512xbf16> to vector<16x511xbf16>
    %150 = vector.extract_strided_slice %119 {offsets = [0, 0], sizes = [16, 1], strides = [1, 1]} : vector<16x512xbf16> to vector<16x1xbf16>
    %151 = tpu.concatenate %149, %150 in 1 : vector<16x511xbf16>, vector<16x1xbf16> -> vector<16x512xbf16>
    %c5_65 = arith.constant 5 : index
    %c0_66 = arith.constant 0 : index
    %152 = vector.load %arg3[%c5_65, %c0_66] : memref<9x512xbf16, #tpu.memory_space<vmem>>, vector<1x512xbf16>
    %153 = vector.broadcast %152 : vector<1x512xbf16> to vector<16x512xbf16>
    %154 = arith.mulf %151, %153 : vector<16x512xbf16>
    %c368 = arith.constant 368 : index
    %c0_67 = arith.constant 0 : index
    %155 = vector.load %arg8[%c368, %c0_67] : memref<432x512xbf16, #tpu.memory_space<vmem>>, vector<16x512xbf16>
    tpu.vector_store %arg8[%c368, %c0_67], %154 {strides = array<i32>} : memref<432x512xbf16, #tpu.memory_space<vmem>>, vector<16x512xbf16>,
    %156 = vector.extract_strided_slice %119 {offsets = [0, 7], sizes = [16, 505], strides = [1, 1]} : vector<16x512xbf16> to vector<16x505xbf16>
    %157 = vector.extract_strided_slice %119 {offsets = [0, 0], sizes = [16, 7], strides = [1, 1]} : vector<16x512xbf16> to vector<16x7xbf16>
    %158 = tpu.concatenate %156, %157 in 1 : vector<16x505xbf16>, vector<16x7xbf16> -> vector<16x512xbf16>
    %c6_68 = arith.constant 6 : index
    %c0_69 = arith.constant 0 : index
    %159 = vector.load %arg3[%c6_68, %c0_69] : memref<9x512xbf16, #tpu.memory_space<vmem>>, vector<1x512xbf16>
    %160 = vector.broadcast %159 : vector<1x512xbf16> to vector<16x512xbf16>
    %161 = arith.mulf %158, %160 : vector<16x512xbf16>
    %c384 = arith.constant 384 : index
    %c0_70 = arith.constant 0 : index
    %162 = vector.load %arg8[%c384, %c0_70] : memref<432x512xbf16, #tpu.memory_space<vmem>>, vector<16x512xbf16>
    tpu.vector_store %arg8[%c384, %c0_70], %161 {strides = array<i32>} : memref<432x512xbf16, #tpu.memory_space<vmem>>, vector<16x512xbf16>,
    %163 = vector.extract_strided_slice %119 {offsets = [0, 8], sizes = [16, 504], strides = [1, 1]} : vector<16x512xbf16> to vector<16x504xbf16>
    %164 = vector.extract_strided_slice %119 {offsets = [0, 0], sizes = [16, 8], strides = [1, 1]} : vector<16x512xbf16> to vector<16x8xbf16>
    %165 = tpu.concatenate %163, %164 in 1 : vector<16x504xbf16>, vector<16x8xbf16> -> vector<16x512xbf16>
    %c7_71 = arith.constant 7 : index
    %c0_72 = arith.constant 0 : index
    %166 = vector.load %arg3[%c7_71, %c0_72] : memref<9x512xbf16, #tpu.memory_space<vmem>>, vector<1x512xbf16>
    %167 = vector.broadcast %166 : vector<1x512xbf16> to vector<16x512xbf16>
    %168 = arith.mulf %165, %167 : vector<16x512xbf16>
    %c400 = arith.constant 400 : index
    %c0_73 = arith.constant 0 : index
    %169 = vector.load %arg8[%c400, %c0_73] : memref<432x512xbf16, #tpu.memory_space<vmem>>, vector<16x512xbf16>
    tpu.vector_store %arg8[%c400, %c0_73], %168 {strides = array<i32>} : memref<432x512xbf16, #tpu.memory_space<vmem>>, vector<16x512xbf16>,
    %170 = vector.extract_strided_slice %119 {offsets = [0, 9], sizes = [16, 503], strides = [1, 1]} : vector<16x512xbf16> to vector<16x503xbf16>
    %171 = vector.extract_strided_slice %119 {offsets = [0, 0], sizes = [16, 9], strides = [1, 1]} : vector<16x512xbf16> to vector<16x9xbf16>
    %172 = tpu.concatenate %170, %171 in 1 : vector<16x503xbf16>, vector<16x9xbf16> -> vector<16x512xbf16>
    %c8_74 = arith.constant 8 : index
    %c0_75 = arith.constant 0 : index
    %173 = vector.load %arg3[%c8_74, %c0_75] : memref<9x512xbf16, #tpu.memory_space<vmem>>, vector<1x512xbf16>
    %174 = vector.broadcast %173 : vector<1x512xbf16> to vector<16x512xbf16>
    %175 = arith.mulf %172, %174 : vector<16x512xbf16>
    %c416 = arith.constant 416 : index
    %c0_76 = arith.constant 0 : index
    %176 = vector.load %arg8[%c416, %c0_76] : memref<432x512xbf16, #tpu.memory_space<vmem>>, vector<16x512xbf16>
    tpu.vector_store %arg8[%c416, %c0_76], %175 {strides = array<i32>} : memref<432x512xbf16, #tpu.memory_space<vmem>>, vector<16x512xbf16>,
    %c0_77 = arith.constant 0 : index
    %c0_78 = arith.constant 0 : index
    %177 = vector.load %arg4[%c0_77, %c0_78] : memref<8x432xbf16, #tpu.memory_space<vmem>>, vector<8x432xbf16>
    %c0_79 = arith.constant 0 : index
    %c0_80 = arith.constant 0 : index
    %178 = vector.load %arg8[%c0_79, %c0_80] : memref<432x512xbf16, #tpu.memory_space<vmem>>, vector<432x512xbf16>
    %cst = arith.constant dense<0.000000e+00> : vector<8x512xf32>
    %179 = tpu.matmul %177, %178, %cst {dimension_numbers = #tpu.dot_dimension_numbers<[1], [0], [0], [1], [0, 0, 1, 1], [], []>} : vector<8x432xbf16>, vector<432x512xbf16>, vector<8x512xf32> -> vector<8x512xf32>
    %c0_81 = arith.constant 0 : index
    %c0_82 = arith.constant 0 : index
    %180 = vector.load %arg5[%c0_81, %c0_82] : memref<8x1xf32, #tpu.memory_space<vmem>>, vector<8x1xf32>
    %181 = vector.broadcast %180 : vector<8x1xf32> to vector<8x512xf32>
    %182 = arith.addf %179, %181 : vector<8x512xf32>
    %cst_83 = arith.constant 0.000000e+00 : f32
    %183 = vector.broadcast %cst_83 : f32 to vector<8x512xf32>
    %184 = arith.cmpf oge, %182, %183 : vector<8x512xf32>
    %cst_84 = arith.constant 0.00999999977 : f32
    %185 = vector.broadcast %cst_84 : f32 to vector<8x512xf32>
    %186 = arith.mulf %185, %182 : vector<8x512xf32>
    %187 = arith.select %184, %182, %186 : vector<8x512xi1>, vector<8x512xf32>
    %c0_85 = arith.constant 0 : index
    %c0_86 = arith.constant 0 : index
    %c0_87 = arith.constant 0 : index
    %188 = vector.load %arg6[%c0_85, %c0_86, %c0_87] : memref<1x8x512xf32, #tpu.memory_space<vmem>>, vector<1x8x512xf32>
    %189 = vector.shape_cast %188 : vector<1x8x512xf32> to vector<8x512xf32>
    %190 = vector.shape_cast %187 : vector<8x512xf32> to vector<1x8x512xf32>
    tpu.vector_store %arg6[%c0_85, %c0_86, %c0_87], %190 {strides = array<i32>} : memref<1x8x512xf32, #tpu.memory_space<vmem>>, vector<1x8x512xf32>,
    %cst_88 = arith.constant dense<0.000000e+00> : vector<8xf32>
    %191 = vector.multi_reduction <add>, %187, %cst_88 [1] : vector<8x512xf32> to vector<8xf32>
    %192 = vector.shape_cast %191 : vector<8xf32> to vector<8x1xf32>
    %c0_89 = arith.constant 0 : index
    %c0_90 = arith.constant 0 : index
    %c0_91 = arith.constant 0 : index
    %c0_92 = arith.constant 0 : index
    %193 = vector.load %arg7[%c0_89, %c0_90, %c0_91, %c0_92] : memref<1x1x8x2xf32, #tpu.memory_space<vmem>>, vector<1x1x8x1xf32>
    %194 = vector.shape_cast %193 : vector<1x1x8x1xf32> to vector<8x1xf32>
    %195 = vector.shape_cast %192 : vector<8x1xf32> to vector<1x1x8x1xf32>
    tpu.vector_store %arg7[%c0_89, %c0_90, %c0_91, %c0_92], %195 {strides = array<i32>} : memref<1x1x8x2xf32, #tpu.memory_space<vmem>>, vector<1x1x8x1xf32>,
    %196 = arith.mulf %187, %187 : vector<8x512xf32>
    %cst_93 = arith.constant dense<0.000000e+00> : vector<8xf32>
    %197 = vector.multi_reduction <add>, %196, %cst_93 [1] : vector<8x512xf32> to vector<8xf32>
    %198 = vector.shape_cast %197 : vector<8xf32> to vector<8x1xf32>
    %c0_94 = arith.constant 0 : index
    %c0_95 = arith.constant 0 : index
    %c0_96 = arith.constant 0 : index
    %c1_97 = arith.constant 1 : index
    %199 = vector.load %arg7[%c0_94, %c0_95, %c0_96, %c1_97] : memref<1x1x8x2xf32, #tpu.memory_space<vmem>>, vector<1x1x8x1xf32>
    %200 = vector.shape_cast %199 : vector<1x1x8x1xf32> to vector<8x1xf32>
    %201 = vector.shape_cast %198 : vector<8x1xf32> to vector<1x1x8x1xf32>
    tpu.vector_store %arg7[%c0_94, %c0_95, %c0_96, %c1_97], %201 {strides = array<i32>} : memref<1x1x8x2xf32, #tpu.memory_space<vmem>>, vector<1x1x8x1xf32>,
    return
  }
  func.func @transform_0(%arg0: i32, %arg1: i32) -> (i32, i32, i32) {
    %c0_i32 = arith.constant 0 : i32
    %c0_i32_0 = arith.constant 0 : i32
    return %arg0, %c0_i32, %arg1 : i32, i32, i32
  }
  func.func @transform_1(%arg0: i32, %arg1: i32) -> (i32, i32) {
    %c0_i32 = arith.constant 0 : i32
    %c0_i32_0 = arith.constant 0 : i32
    return %c0_i32, %arg1 : i32, i32
  }
  func.func @transform_2(%arg0: i32, %arg1: i32) -> (i32, i32) {
    %c0_i32 = arith.constant 0 : i32
    %c0_i32_0 = arith.constant 0 : i32
    %c0_i32_1 = arith.constant 0 : i32
    return %c0_i32, %c0_i32_0 : i32, i32
  }
  func.func @transform_3(%arg0: i32, %arg1: i32) -> (i32, i32) {
    %c0_i32 = arith.constant 0 : i32
    %c0_i32_0 = arith.constant 0 : i32
    %c0_i32_1 = arith.constant 0 : i32
    return %c0_i32, %c0_i32_0 : i32, i32
  }
  func.func @transform_4(%arg0: i32, %arg1: i32) -> (i32, i32, i32) {
    %c0_i32 = arith.constant 0 : i32
    %c0_i32_0 = arith.constant 0 : i32
    return %arg0, %c0_i32, %arg1 : i32, i32, i32
  }
  func.func @transform_5(%arg0: i32, %arg1: i32) -> (i32, i32, i32, i32) {
    %c0_i32 = arith.constant 0 : i32
    %c0_i32_0 = arith.constant 0 : i32
    %c0_i32_1 = arith.constant 0 : i32
    return %arg0, %arg1, %c0_i32, %c0_i32_0 : i32, i32, i32, i32
  }
}

module attributes {stable_mosaic.version = 11 : i64} {
  func.func @_bn_affine_kernel(%arg0: i32, %arg1: i32, %arg2: memref<1x8x512xf32, #tpu.memory_space<vmem>>, %arg3: memref<8x1xf32, #tpu.memory_space<vmem>>, %arg4: memref<8x1xf32, #tpu.memory_space<vmem>>, %arg5: memref<1x8x512xf32, #tpu.memory_space<vmem>>) attributes {dimension_semantics = [#tpu.dimension_semantics<parallel>, #tpu.dimension_semantics<parallel>], iteration_bounds = array<i64: 2, 1>, scalar_prefetch = 0 : i64, scratch_operands = 0 : i64, tpu.core_type = #tpu.core_type<tc>, window_params = [{transform_indices = @transform_0, window_bounds = array<i64: 1, 8, 512>}, {pipeline_mode = #tpu.pipeline_mode<synchronous>, transform_indices = @transform_1, window_bounds = array<i64: 8, 1>}, {pipeline_mode = #tpu.pipeline_mode<synchronous>, transform_indices = @transform_2, window_bounds = array<i64: 8, 1>}, {transform_indices = @transform_3, window_bounds = array<i64: 1, 8, 512>}]} {
    %c0 = arith.constant 0 : index
    %c0_0 = arith.constant 0 : index
    %c0_1 = arith.constant 0 : index
    %0 = vector.load %arg2[%c0, %c0_0, %c0_1] : memref<1x8x512xf32, #tpu.memory_space<vmem>>, vector<1x8x512xf32>
    %c0_2 = arith.constant 0 : index
    %c0_3 = arith.constant 0 : index
    %1 = vector.load %arg3[%c0_2, %c0_3] : memref<8x1xf32, #tpu.memory_space<vmem>>, vector<8x1xf32>
    %2 = vector.shape_cast %1 : vector<8x1xf32> to vector<1x8x1xf32>
    %3 = vector.broadcast %2 : vector<1x8x1xf32> to vector<1x8x512xf32>
    %4 = arith.mulf %0, %3 : vector<1x8x512xf32>
    %c0_4 = arith.constant 0 : index
    %c0_5 = arith.constant 0 : index
    %5 = vector.load %arg4[%c0_4, %c0_5] : memref<8x1xf32, #tpu.memory_space<vmem>>, vector<8x1xf32>
    %6 = vector.shape_cast %5 : vector<8x1xf32> to vector<1x8x1xf32>
    %7 = vector.broadcast %6 : vector<1x8x1xf32> to vector<1x8x512xf32>
    %8 = arith.addf %4, %7 : vector<1x8x512xf32>
    %c0_6 = arith.constant 0 : index
    %c0_7 = arith.constant 0 : index
    %c0_8 = arith.constant 0 : index
    %9 = vector.load %arg5[%c0_6, %c0_7, %c0_8] : memref<1x8x512xf32, #tpu.memory_space<vmem>>, vector<1x8x512xf32>
    tpu.vector_store %arg5[%c0_6, %c0_7, %c0_8], %8 {strides = array<i32>} : memref<1x8x512xf32, #tpu.memory_space<vmem>>, vector<1x8x512xf32>,
    return
  }
  func.func @transform_0(%arg0: i32, %arg1: i32) -> (i32, i32, i32) {
    %c0_i32 = arith.constant 0 : i32
    %c0_i32_0 = arith.constant 0 : i32
    return %arg0, %c0_i32, %arg1 : i32, i32, i32
  }
  func.func @transform_1(%arg0: i32, %arg1: i32) -> (i32, i32) {
    %c0_i32 = arith.constant 0 : i32
    %c0_i32_0 = arith.constant 0 : i32
    %c0_i32_1 = arith.constant 0 : i32
    return %c0_i32, %c0_i32_0 : i32, i32
  }
  func.func @transform_2(%arg0: i32, %arg1: i32) -> (i32, i32) {
    %c0_i32 = arith.constant 0 : i32
    %c0_i32_0 = arith.constant 0 : i32
    %c0_i32_1 = arith.constant 0 : i32
    return %c0_i32, %c0_i32_0 : i32, i32
  }
  func.func @transform_3(%arg0: i32, %arg1: i32) -> (i32, i32, i32) {
    %c0_i32 = arith.constant 0 : i32
    %c0_i32_0 = arith.constant 0 : i32
    return %arg0, %c0_i32, %arg1 : i32, i32, i32
  }
}

</mosaic_0001>

<bundles_post_ra>
// kernel: stacked_block_forward.5
= control target key start
LH: loop header
LB: loop body
LE: loop exit
PB: predicated region body
PF: predicated region fallthrough
CT: control target
= control target key end

     0   :  { %s409_s12 = smov 0   ;;  %s411_s13 = smov 0   ;;  %s448_s0 = inlined_call_operand.vmem [shape: f32[2,8,512], index: 0, kind: input, shape index: {}, may-alias: {0,3}]   ;;  %s449_s1 = inlined_call_operand.vmem [shape: f32[8,1], index: 1, kind: input, shape index: {}]   ;;  %s450_s2 = inlined_call_operand.vmem [shape: f32[8,1], index: 2, kind: input, shape index: {}]   ;;  %s451_s3 = inlined_call_operand.vmem [shape: f32[2,8,512], index: 3, kind: output, shape index: {}, may-alias: {0,3}]  }
   0x1   :  { %s413_s14 = smov 0  }
   0x2 LB: > { %s25_s15 = sadd.s32 1, %s382_s13  ;;  %p329_p0 = scmp.ge.s32.totalorder %s386_s14, 1  ;;  %s386_s14 = sphi %s413_s14, %s13_s14   ;;  %s382_s13 = sphi %s411_s13, %s453_s13   ;;  %s378_s12 = sphi %s409_s12, %s452_s12  }
   0x3   : > { %p27_p1 = scmp.ge.s32.totalorder %s25_s15, 2  ;;  %p158_p2 = scmp.lt.s32.totalorder %s386_s14, 3 }
   0x5   : > { %s455_s15 = smov (%p27_p1, %s25_s15), 0  ;;  %p159_p3 = pnand %p329_p0, %p158_p2 }
   0x6   : > { %p191_p4 = scmp.lt.s32.totalorder (!%p159_p3), %s378_s12, 1 }
   0x7   : > { %162 = sbr.rel (%p159_p3) target bundleno = 146 (0x92), region = 32 }
   0xc   : > { %v214_v0 = vld [vmem:[%s449_s1] sm:$0xff]  ;;  %v388_v1 = vmov 0   ;;  %s457_s12 = smov (!%p191_p4, %s378_s12), 1 }
   0xd   : > { %363 = vset.pattern.permute.xlu0 %v388_v1  ;;  %v224_v2 = vld [vmem:[%s450_s2] sm:$0xff]  ;;  %s336_s20 = sshll.u32 %s457_s12, 5 }
   0xe   : > { %217 = vperm.xlu0 %363, %v214_v0   ;;  %s198_s23 = scalar_lea.vmem %s448_s0, %s336_s20  ;;  %s208_s26 = scalar_lea.vmem %s451_s3, %s336_s20 }
   0xf   : > { %v210_v3 = vld [vmem:[%s198_s23] sm:$0xff]  ;;  %v211_v5 = vld [vmem:[%s198_s23 + $0x8] sm:$0xff]  ;;  %v212_v6 = vld [vmem:[%s198_s23 + $0x10] sm:$0xff] }
  0x10   : > { %v213_v7 = vld [vmem:[%s198_s23 + $0x18] sm:$0xff] }
  0x12   : > { %227 = vperm.xlu0 %363, %v224_v2  }
  0x89   : > { %v218_v4 = vpop.permute.xlu0 %217 }
  0x8a   : > { %v220_v8 = vmul.f32 %v218_v4, %v210_v3  ;;  %v221_v9 = vmul.f32 %v218_v4, %v211_v5  ;;  %v222_v10 = vmul.f32 %v218_v4, %v212_v6  ;;  %v223_v11 = vmul.f32 %v218_v4, %v213_v7 }
  0x8d   : > { %v228_v12 = vpop.permute.xlu0 %227 }
  0x8e   : > { %v230_v13 = vadd.f32 %v228_v12, %v220_v8  ;;  %v231_v14 = vadd.f32 %v228_v12, %v221_v9  ;;  %v232_v15 = vadd.f32 %v228_v12, %v222_v10  ;;  %v233_v16 = vadd.f32 %v228_v12, %v223_v11 }
  0x90   : > { %234 = vst [vmem:[%s208_s26] sm:$0xff] %v230_v13  ;;  %235 = vst [vmem:[%s208_s26 + $0x8] sm:$0xff] %v231_v14 }
  0x91   : > { %236 = vst [vmem:[%s208_s26 + $0x10] sm:$0xff] %v232_v15  ;;  %237 = vst [vmem:[%s208_s26 + $0x18] sm:$0xff] %v233_v16 }
  0x92 PF: > { %s13_s14 = sadd.s32 1, %s386_s14   ;;  %s452_s12 = smov %s382_s13 }
  0x93   : > { %p10_p5 = scmp.ge.s32.totalorder %s13_s14, 4   ;;  %s453_s13 = smov %s455_s15 }
  0x95   :  { %12 = sbr.rel (!%p10_p5) target bundleno = 2 (0x2), region = 62 }

// kernel: stacked_block_forward.3
= control target key start
LH: loop header
LB: loop body
LE: loop exit
PB: predicated region body
PF: predicated region fallthrough
CT: control target
= control target key end

     0   :  { %s4090_s18 = smov 0   ;;  %s4092_s19 = smov 0   ;;  %s5072_s0 = inlined_call_operand.vmem [shape: bf16[2,48,512], index: 0, kind: input, shape index: {}]   ;;  %s5073_s1 = inlined_call_operand.vmem [shape: bf16[9,512], index: 1, kind: input, shape index: {}]   ;;  %s5074_s2 = inlined_call_operand.vmem [shape: bf16[8,432], index: 2, kind: input, shape index: {}]   ;;  %s5075_s3 = inlined_call_operand.vmem [shape: f32[8,1], index: 3, kind: input, shape index: {}]   ;;  %s5076_s4 = inlined_call_operand.vmem [shape: bf16[2,8,512], index: 4, kind: output, shape index: {0}]   ;;  %s5077_s5 = inlined_call_operand.vmem [shape: f32[2,1,8,2], index: 5, kind: output, shape index: {1}]  }
   0x1   :  { %s4094_s20 = smov 0  }
   0x2 LB: > { %s28_s21 = sadd.s32 1, %s4045_s19  ;;  %p3538_p0 = scmp.ge.s32.totalorder %s4049_s20, 1  ;;  %s4049_s20 = sphi %s4094_s20, %s16_s20   ;;  %s4045_s19 = sphi %s4092_s19, %s5142_s19   ;;  %s4041_s18 = sphi %s4090_s18, %s5141_s18  }
   0x3   : > { %p30_p1 = scmp.ge.s32.totalorder %s28_s21, 2  ;;  %p224_p2 = scmp.lt.s32.totalorder %s4049_s20, 3 }
   0x5   : > { %s5144_s21 = smov (%p30_p1, %s28_s21), 0  ;;  %p225_p3 = pnand %p3538_p0, %p224_p2 }
   0x7   : > { %228 = sbr.rel (%p225_p3) target bundleno = 678 (0x2a6), region = 36 }
   0xc   : > { %p273_p4 = scmp.lt.s32.totalorder %s4041_s18, 1  ;;  %s4051_s26 = smov 127   ;;  %v2172_v11 = vld [vmem:[%s5073_s1] sm:$0x44]  ;;  %v4259_v12 = vld [vmem:[%s5074_s2 + $0x8] sm:$0xff]  ;;  %v361_v15 = vlaneseq  ;;  %vm3175_vm0 = vcmask 392192  }
   0xd   : > { %s4052_s27 = smov 120   ;;  %s4053_s28 = smov 121   ;;  %v3716_v13 = vcombine.high %v2172_v11, %v2172_v11  ;;  %v4265_v14 = vcombine.high %v4259_v12, %v4259_v12  ;;  %v3715_v16 = vcombine.low %v2172_v11, %v2172_v11  ;;  %v890_v17 = vld [vmem:[%s5073_s1] sm:$0x88]  ;;  %vm698_vm1 = vcmask 1039360  }
   0xe   : > { %s5146_s18 = smov (!%p273_p4, %s4041_s18), 1  ;;  %s4054_s29 = smov 1   ;;  %v3596_v19 = vcombine.high %v890_v17, %v890_v17  ;;  %v4278_v20 = vshrl.u32 %v361_v15, 7  ;;  %v3595_v22 = vcombine.low %v890_v17, %v890_v17  ;;  %v802_v29 = vld [vmem:[%s5073_s1] sm:$0x88]  ;;  %vm878_vm2 = vcmask 982016  }
   0xf   : > { %s3868_s22 = smul.u32 96, %s5146_s18  ;;  %s4055_s30 = smov 7   ;;  %3859 = vmatprep.mubr.msk.bf16.mxu1 %vm3175_vm0, %v4265_v14  ;;  %v2193_v18 = vshrl.u32 %v3716_v13, 16  ;;  %v2185_v21 = vshrl.u32 %v3715_v16, 16  ;;  %v3588_v36 = vcombine.high %v802_v29, %v802_v29  ;;  %v2078_v38 = vld [vmem:[%s5073_s1] sm:$0x22]  ;;  %v3587_v45 = vcombine.low %v802_v29, %v802_v29 }
  0x10   : > { %s4056_s6 = smov 8   ;;  %s4057_s7 = smov 9   ;;  %v911_v24 = vshrl.u32 %v3596_v19, 16  ;;  %v4285_v25 = vsub.s32 2, %v4278_v20  ;;  %v903_v27 = vshrl.u32 %v3595_v22, 16  ;;  %v4298_v32 = vsub.s32 3, %v4278_v20 }
  0x11   : > { %s4114_s25 = scalar_lea.vmem %s5072_s0, %s3868_s22  ;;  %s4058_s8 = smov 119   ;;  %v2194_v23 = vpack.i.b16 %v2193_v18, %v2193_v18  ;;  %v2186_v26 = vpack.i.b16 %v2185_v21, %v2185_v21  ;;  %v3708_v46 = vcombine.high %v2078_v38, %v2078_v38  ;;  %v822_v48 = vpack.i.b16 %v3588_v36, %v3588_v36  ;;  %v710_v52 = vld [vmem:[%s5073_s1] sm:$0x44] }
  0x12   : > { %v4117_v0 = vld [vmem:[%s4114_s25 + $0x44] ss:$16 sps:$4 sm:$0xff]   ;;  %v4120_v1 = vld [vmem:[%s4114_s25 + $0x40] ss:$16 sps:$4 sm:$0xff]   ;;  %v4125_v2 = vld [vmem:[%s4114_s25 + $0x48] ss:$16 sps:$4 sm:$0xff]   ;;  %v912_v34 = vpack.i.b16 %v911_v24, %v911_v24  ;;  %v904_v37 = vpack.i.b16 %v903_v27, %v903_v27  ;;  %v3707_v50 = vcombine.low %v2078_v38, %v2078_v38  ;;  %v815_v57 = vpack.i.b16 %v3587_v45, %v3587_v45 }
  0x13   : > { %2156 = vrot.lane.b32.xlu0 %v4117_v0, %s4051_s26  ;;  %2154 = vrot.lane.b32.xlu1 %v4120_v1, %s4051_s26  ;;  %v4130_v3 = vld [vmem:[%s4114_s25 + $0x4] ss:$16 sps:$4 sm:$0xff]   ;;  %v4135_v4 = vld [vmem:[%s4114_s25 + $0x8] ss:$16 sps:$4 sm:$0xff]   ;;  %v2199_v33 = vrot.slane %v2194_v23, %v4285_v25  ;;  %v2191_v35 = vrot.slane %v2186_v26, %v4285_v25  ;;  %vm790_vm3 = vcmask 990208   ;;  %v2099_v58 = vshrl.u32 %v3708_v46, 16 }
  0x14   : > { %v4140_v5 = vld [vmem:[%s4114_s25] ss:$16 sps:$4 sm:$0xff]   ;;  %v4155_v6 = vld [vmem:[%s4114_s25 + $0x4c] ss:$16 sps:$4 sm:$0xff]   ;;  %v4199_v8 = vld [vmem:[%s4114_s25 + $0x24] ss:$16 sps:$4 sm:$0xff]   ;;  %v917_v44 = vrot.slane %v912_v34, %v4298_v32  ;;  %v909_v49 = vrot.slane %v904_v37, %v4298_v32  ;;  %v827_v59 = vrot.slane %v822_v48, %v4298_v32  ;;  %v3580_v62 = vcombine.high %v710_v52, %v710_v52 }
  0x15   : > { %v4182_v7 = vld [vmem:[%s4114_s25 + $0xc] ss:$16 sps:$4 sm:$0xff]   ;;  %v4204_v9 = vld [vmem:[%s4114_s25 + $0x28] ss:$16 sps:$4 sm:$0xff]   ;;  %v4209_v10 = vld [vmem:[%s4114_s25 + $0x20] ss:$16 sps:$4 sm:$0xff]   ;;  %v3579_v13 = vcombine.low %v710_v52, %v710_v52  ;;  %v820_v16 = vrot.slane %v815_v57, %v4298_v32  ;;  %v2100_v17 = vpack.i.b16 %v2099_v58, %v2099_v58 }
  0x16   : > { %v4295_v31 = vld [vmem:[%s4114_s25 + $0x2c] ss:$16 sps:$4 sm:$0xff]   ;;  %v2091_v61 = vshrl.u32 %v3707_v50, 16  ;;  %v4340_v15 = vsub.s32 1, %v4278_v20  ;;  %v731_v21 = vshrl.u32 %v3580_v62, 16  ;;  %vm602_vm4 = vcmask 7168  }
  0x17   : > { %2158 = vrot.lane.b32.xlu0 %v4125_v2, %s4051_s26  ;;  %872 = vrot.lane.b32.xlu1 %v4130_v3, %s4052_s27  ;;  %v723_v24 = vshrl.u32 %v3579_v13, 16  ;;  %v4384_v50 = vld [vmem:[%s5074_s2] sm:$0xff]  ;;  %vm514_vm5 = vcmask 56320   ;;  %vm422_vm6 = vcmask 64512   ;;  %vm334_vm7 = vcmask 72704   ;;  %s3542_s10 = sshll.u32 %s5146_s18, 3 }
  0x18   : > { %v2092_v19 = vpack.i.b16 %v2091_v61, %v2091_v61  ;;  %v2105_v27 = vrot.slane %v2100_v17, %v4340_v15  ;;  %v732_v29 = vpack.i.b16 %v731_v21, %v731_v21  ;;  %vm970_vm8 = vcmask 973824  }
  0x19   : > { %v724_v38 = vpack.i.b16 %v723_v24, %v723_v24  ;;  %vm3388_vm13 = vcmask 15368  }
  0x1b   : > { %874 = vrot.lane.b32.xlu0 %v4135_v4, %s4052_s27  ;;  %870 = vrot.lane.b32.xlu1 %v4140_v5, %s4052_s27 }
  0x1f   : > { %784 = vrot.lane.b32.xlu0 %v4130_v3, %s4053_s28  ;;  %786 = vrot.lane.b32.xlu1 %v4135_v4, %s4053_s28 }
  0x23   : > { %782 = vrot.lane.b32.xlu0 %v4140_v5, %s4053_s28  ;;  %2062 = vrot.lane.b32.xlu1 %v4120_v1, %s4054_s29 }
  0x27   : > { %2064 = vrot.lane.b32.xlu0 %v4117_v0, %s4054_s29  ;;  %2060 = vrot.lane.b32.xlu1 %v4155_v6, %s4054_s29 }
  0x2b   : > { %692 = vrot.lane.b32.xlu0 %v4130_v3, %s4051_s26  ;;  %694 = vrot.lane.b32.xlu1 %v4135_v4, %s4051_s26 }
  0x2f   : > { %690 = vrot.lane.b32.xlu0 %v4140_v5, %s4051_s26  ;;  %1976 = vrot.lane.b32.xlu1 %v4120_v1, %s4055_s30 }
  0x33   : > { %1978 = vrot.lane.b32.xlu0 %v4117_v0, %s4055_s30  ;;  %1974 = vrot.lane.b32.xlu1 %v4155_v6, %s4055_s30 }
  0x37   : > { %1886 = vrot.lane.b32.xlu0 %v4120_v1, %s4056_s6  ;;  %1888 = vrot.lane.b32.xlu1 %v4117_v0, %s4056_s6 }
  0x3b   : > { %1884 = vrot.lane.b32.xlu0 %v4155_v6, %s4056_s6  ;;  %596 = vrot.lane.b32.xlu1 %v4140_v5, %s4054_s29 }
  0x3f   : > { %598 = vrot.lane.b32.xlu0 %v4130_v3, %s4054_s29  ;;  %594 = vrot.lane.b32.xlu1 %v4182_v7, %s4054_s29 }
  0x43   : > { %1800 = vrot.lane.b32.xlu0 %v4120_v1, %s4057_s7  ;;  %1802 = vrot.lane.b32.xlu1 %v4117_v0, %s4057_s7 }
  0x47   : > { %1787 = vrot.lane.b32.xlu0 %v4155_v6, %s4057_s7  ;;  %508 = vrot.lane.b32.xlu1 %v4140_v5, %s4055_s30 }
  0x4b   : > { %510 = vrot.lane.b32.xlu0 %v4130_v3, %s4055_s30  ;;  %506 = vrot.lane.b32.xlu1 %v4182_v7, %s4055_s30 }
  0x4f   : > { %1694 = vrot.lane.b32.xlu0 %v4199_v8, %s4058_s8  ;;  %1696 = vrot.lane.b32.xlu1 %v4204_v9, %s4058_s8 }
  0x53   : > { %1692 = vrot.lane.b32.xlu0 %v4209_v10, %s4058_s8  ;;  %416 = vrot.lane.b32.xlu1 %v4140_v5, %s4056_s6 }
  0x57   : > { %418 = vrot.lane.b32.xlu0 %v4130_v3, %s4056_s6  ;;  %414 = vrot.lane.b32.xlu1 %v4182_v7, %s4056_s6 }
  0x5b   : > { %1604 = vrot.lane.b32.xlu0 %v4199_v8, %s4052_s27  ;;  %1606 = vrot.lane.b32.xlu1 %v4204_v9, %s4052_s27 }
  0x5f   : > { %1602 = vrot.lane.b32.xlu0 %v4209_v10, %s4052_s27  ;;  %328 = vrot.lane.b32.xlu1 %v4140_v5, %s4057_s7 }
  0x63   : > { %330 = vrot.lane.b32.xlu0 %v4130_v3, %s4057_s7  ;;  %315 = vrot.lane.b32.xlu1 %v4182_v7, %s4057_s7 }
  0x67   : > { %2422 = vrot.lane.b32.xlu0 %v4117_v0, %s4058_s8  ;;  %2424 = vrot.lane.b32.xlu1 %v4125_v2, %s4058_s8 }
  0x6b   : > { %2420 = vrot.lane.b32.xlu0 %v4120_v1, %s4058_s8  ;;  %1518 = vrot.lane.b32.xlu1 %v4199_v8, %s4053_s28 }
  0x6f   : > { %1520 = vrot.lane.b32.xlu0 %v4204_v9, %s4053_s28  ;;  %1516 = vrot.lane.b32.xlu1 %v4209_v10, %s4053_s28 }
  0x73   : > { %2332 = vrot.lane.b32.xlu0 %v4117_v0, %s4052_s27  ;;  %2334 = vrot.lane.b32.xlu1 %v4125_v2, %s4052_s27 }
  0x77   : > { %2330 = vrot.lane.b32.xlu0 %v4120_v1, %s4052_s27  ;;  %1428 = vrot.lane.b32.xlu1 %v4199_v8, %s4051_s26 }
  0x7b   : > { %1430 = vrot.lane.b32.xlu0 %v4204_v9, %s4051_s26  ;;  %1426 = vrot.lane.b32.xlu1 %v4209_v10, %s4051_s26 }
  0x7f   : > { %2246 = vrot.lane.b32.xlu0 %v4117_v0, %s4053_s28  ;;  %2248 = vrot.lane.b32.xlu1 %v4125_v2, %s4053_s28 }
  0x83   : > { %2244 = vrot.lane.b32.xlu0 %v4120_v1, %s4053_s28  ;;  %876 = vrot.lane.b32.xlu1 %v4182_v7, %s4052_s27 }
  0x85   : > { %v2157_v28 = vpop.permute.xlu0 %2156  ;;  %v4290_v30 = vpop.permute.xlu1 %2154 }
  0x86   : > { %v2162_v39 = vsel %vm698_vm1, %v4290_v30, %v2157_v28 }
  0x87   : > { %1334 = vrot.lane.b32.xlu0 %v4209_v10, %s4054_s29  ;;  %1336 = vrot.lane.b32.xlu1 %v4199_v8, %s4054_s29  ;;  %v2216_v47 = vmul.bf16 %v2191_v35, %v2162_v39  ;;  %v1902_v35 = vld [vmem:[%s5073_s1] sm:$0x11] }
  0x88   : > { %v3692_v46 = vcombine.high %v1902_v35, %v1902_v35 }
  0x89   : > { %v4309_v40 = vpop.permute.xlu0 %2158  ;;  %v873_v41 = vpop.permute.xlu1 %872 }
  0x8a   : > { %v2163_v42 = vsel %vm698_vm1, %v2157_v28, %v4309_v40  ;;  %v2097_v28 = vrot.slane %v2092_v19, %v4340_v15 }
  0x8b   : > { %1332 = vrot.lane.b32.xlu0 %v4295_v31, %s4054_s29  ;;  %v2217_v43 = vmul.bf16 %v2199_v33, %v2163_v42  ;;  %788 = vrot.lane.b32.xlu1 %v4182_v7, %s4053_s28  ;;  %v1992_v33 = vld [vmem:[%s5073_s1] sm:$0x22] }
  0x8c   : > { %v3700_v42 = vcombine.high %v1992_v33, %v1992_v33  ;;  %v3699_v45 = vcombine.low %v1992_v33, %v1992_v33 }
  0x8d   : > { %3220 = vmatprep.subr.bf16.mxu1 %v2217_v43  ;;  %v4319_v51 = vpop.permute.xlu0 %874  ;;  %v4324_v53 = vpop.permute.xlu1 %870 }
  0x8e   : > { %3221 = vmatpush1.bf16.msra.mxu1 %v2216_v47  ;;  %v880_v54 = vsel %vm878_vm2, %v873_v41, %v4319_v51  ;;  %v879_v55 = vsel %vm878_vm2, %v4324_v53, %v873_v41  ;;  %v2005_v58 = vpack.i.b16 %v3699_v45, %v3699_v45 }
  0x8f   : > { %1248 = vrot.lane.b32.xlu0 %v4209_v10, %s4055_s30  ;;  %v935_v56 = vmul.bf16 %v917_v44, %v880_v54  ;;  %3222 = vmatprep.subr.bf16.mxu1 %v4117_v0  ;;  %v934_v60 = vmul.bf16 %v909_v49, %v879_v55  ;;  %v737_v44 = vrot.slane %v732_v29, %v4285_v25 }
  0x90   : > { %1250 = vrot.lane.b32.xlu1 %v4199_v8, %s4055_s30  ;;  %v729_v49 = vrot.slane %v724_v38, %v4285_v25  ;;  %v2012_v54 = vpack.i.b16 %v3700_v42, %v3700_v42  ;;  %v3691_v55 = vcombine.low %v1902_v35, %v1902_v35  ;;  %v2010_v19 = vrot.slane %v2005_v58, %v4340_v15 }
  0x91   : > { %v785_v63 = vpop.permute.xlu0 %784  ;;  %3179 = vmatprep.subr.bf16.mxu0 %v935_v56  ;;  %v4336_v11 = vpop.permute.xlu1 %786  ;;  %v4392_v56 = vcombine.high %v4384_v50, %v4384_v50 }
  0x92   : > { %3180 = vmatpush1.bf16.msra.mxu0 %v934_v60  ;;  %3223 = vmatpush1.bf16.msra.mxu1 %v4120_v1  ;;  %v792_v0 = vsel %vm790_vm3, %v785_v63, %v4336_v11  ;;  %v614_v60 = vld [vmem:[%s5073_s1] sm:$0x22] }
  0x93   : > { %1246 = vrot.lane.b32.xlu0 %v4295_v31, %s4055_s30  ;;  %v843_v18 = vmul.bf16 %v827_v59, %v792_v0  ;;  %v1923_v59 = vshrl.u32 %v3692_v46, 16  ;;  %3211 = vmatprep.mubr.bf16.mxu0 %v4392_v56  ;;  %v2017_v0 = vrot.slane %v2012_v54, %v4340_v15  ;;  %v3572_v17 = vcombine.high %v614_v60, %v614_v60 }
  0x94   : > { %696 = vrot.lane.b32.xlu1 %v4182_v7, %s4051_s26 }
  0x95   : > { %v4349_v1 = vpop.permute.xlu0 %782  ;;  %3181 = vmatprep.subr.bf16.mxu0 %v843_v18  ;;  %v2063_v23 = vpop.permute.xlu1 %2062  ;;  %v4408_v18 = vsub.s32 0, %v4278_v20  ;;  %v1924_v21 = vpack.i.b16 %v1923_v59, %v1923_v59  ;;  %v635_v29 = vshrl.u32 %v3572_v17, 16  ;;  %v526_v59 = vld [vmem:[%s5073_s1] sm:$0x22] }
  0x96   : > { %v791_v22 = vsel %vm790_vm3, %v4349_v1, %v785_v63 }
  0x97   : > { %v842_v26 = vmul.bf16 %v820_v16, %v791_v22  ;;  %1158 = vrot.lane.b32.xlu0 %v4209_v10, %s4056_s6  ;;  %v1915_v16 = vshrl.u32 %v3691_v55, 16  ;;  %v3571_v22 = vcombine.low %v614_v60, %v614_v60  ;;  %v1929_v35 = vrot.slane %v1924_v21, %v4408_v18 }
  0x98   : > { %1160 = vrot.lane.b32.xlu1 %v4199_v8, %s4056_s6  ;;  %v3563_v21 = vcombine.low %v526_v59, %v526_v59 }
  0x99   : > { %v4362_v34 = vpop.permute.xlu0 %2064  ;;  %3182 = vmatpush1.bf16.msra.mxu0 %v842_v26  ;;  %v4369_v37 = vpop.permute.xlu1 %2060 }
  0x9a   : > { %v2068_v36 = vsel %vm602_vm4, %v2063_v23, %v4362_v34  ;;  %v2076_v41 = vsel %vm602_vm4, %v4369_v37, %v2063_v23 }
  0x9b   : > { %v2123_v39 = vmul.bf16 %v2105_v27, %v2068_v36  ;;  %1156 = vrot.lane.b32.xlu0 %v4295_v31, %s4056_s6  ;;  %v2122_v43 = vmul.bf16 %v2097_v28, %v2076_v41  ;;  %v1916_v28 = vpack.i.b16 %v1915_v16, %v1915_v16  ;;  %v627_v36 = vshrl.u32 %v3571_v22, 16 }
  0x9c   : > { %1072 = vrot.lane.b32.xlu1 %v4209_v10, %s4057_s7  ;;  %v3564_v16 = vcombine.high %v526_v59, %v526_v59 }
  0x9d   : > { %v693_v47 = vpop.permute.xlu0 %692  ;;  %3224 = vmatprep.subr.bf16.mxu1 %v2123_v39  ;;  %v4378_v48 = vpop.permute.xlu1 %694  ;;  %v1921_v42 = vrot.slane %v1916_v28, %v4408_v18 }
  0x9e   : > { %3225 = vmatpush1.bf16.msra.mxu1 %v2122_v43  ;;  %v700_v52 = vsel %vm698_vm1, %v693_v47, %v4378_v48  ;;  %v636_v43 = vpack.i.b16 %v635_v29, %v635_v29  ;;  %v546_v29 = vpack.i.b16 %v3564_v16, %v3564_v16 }
  0x9f   : > { %1074 = vrot.lane.b32.xlu0 %v4199_v8, %s4057_s7  ;;  %v755_v57 = vmul.bf16 %v737_v44, %v700_v52 }
  0xa0   : > { %1059 = vrot.lane.b32.xlu1 %v4295_v31, %s4057_s7  ;;  %v641_v54 = vrot.slane %v636_v43, %v4340_v15 }
  0xa1   : > { %v4399_v61 = vpop.permute.xlu0 %690  ;;  %3183 = vmatprep.subr.bf16.mxu0 %v755_v57  ;;  %v1977_v63 = vpop.permute.xlu1 %1976 }
  0xa2   : > { %v699_v62 = vsel %vm698_vm1, %v4399_v61, %v693_v47 }
  0xa3   : > { %v754_v13 = vmul.bf16 %v729_v49, %v699_v62  ;;  %600 = vrot.lane.b32.xlu0 %v4135_v4, %s4054_s29 }
  0xa4   : > { %964 = vrot.lane.b32.xlu1 %v4130_v3, %s4058_s8 }
  0xa5   : > { %v4413_v23 = vpop.permute.xlu0 %1978  ;;  %3184 = vmatpush1.bf16.msra.mxu0 %v754_v13  ;;  %v4417_v26 = vpop.permute.xlu1 %1974 }
  0xa6   : > { %v1982_v24 = vsel %vm514_vm5, %v1977_v63, %v4413_v23  ;;  %3185 = vmatprep.subr.bf16.mxu0 %v4130_v3  ;;  %v1990_v20 = vsel %vm514_vm5, %v4417_v26, %v1977_v63  ;;  %v1816_v3 = vld [vmem:[%s5073_s1] sm:$0x11] }
  0xa7   : > { %v2033_v27 = vmul.bf16 %v2017_v0, %v1982_v24  ;;  %966 = vrot.lane.b32.xlu0 %v4135_v4, %s4058_s8  ;;  %v2032_v33 = vmul.bf16 %v2010_v19, %v1990_v20  ;;  %v3684_v45 = vcombine.high %v1816_v3, %v1816_v3  ;;  %v3683_v55 = vcombine.low %v1816_v3, %v1816_v3  ;;  %v1710_v24 = vld [vmem:[%s5073_s1 + $0x10] sm:$0x11] }
  0xa8   : > { %962 = vrot.lane.b32.xlu1 %v4140_v5, %s4058_s8 }
  0xa9   : > { %v1887_v38 = vpop.permute.xlu0 %1886  ;;  %3226 = vmatprep.subr.bf16.mxu1 %v2033_v27  ;;  %3186 = vmatpush1.bf16.msra.mxu0 %v4140_v5  ;;  %v4431_v39 = vpop.permute.xlu1 %1888  ;;  %v628_v5 = vpack.i.b16 %v627_v36, %v627_v36  ;;  %v1836_v58 = vpack.i.b16 %v3684_v45, %v3684_v45  ;;  %v3672_v36 = vcombine.high %v1710_v24, %v1710_v24 }
  0xaa   : > { %3227 = vmatpush1.bf16.msra.mxu1 %v2032_v33  ;;  %v1892_v41 = vsel %vm422_vm6, %v1887_v38, %v4431_v39 }
  0xab   : > { %512 = vrot.lane.b32.xlu0 %v4135_v4, %s4055_s30  ;;  %v1947_v44 = vmul.bf16 %v1929_v35, %v1892_v41  ;;  %v633_v57 = vrot.slane %v628_v5, %v4340_v15  ;;  %v1841_v19 = vrot.slane %v1836_v58, %v4408_v18  ;;  %v539_v35 = vpack.i.b16 %v3563_v21, %v3563_v21 }
  0xac   : > { %2160 = vrot.lane.b32.xlu1 %v4155_v6, %s4051_s26  ;;  %v3671_v5 = vcombine.low %v1710_v24, %v1710_v24 }
  0xad   : > { %v4440_v46 = vpop.permute.xlu0 %1884  ;;  %3228 = vmatprep.subr.bf16.mxu1 %v1947_v44  ;;  %v597_v49 = vpop.permute.xlu1 %596  ;;  %v551_v44 = vrot.slane %v546_v29, %v4340_v15 }
  0xae   : > { %5099 = vst [vmem:[#allocation3_spill] sm:$0xff] %v4440_v46  ;;  %v1900_v47 = vsel %vm422_vm6, %v4440_v46, %v1887_v38  ;;  %v434_v38 = vld [vmem:[%s5073_s1] sm:$0x11] }
  0xaf   : > { %v1946_v52 = vmul.bf16 %v1921_v42, %v1900_v47  ;;  %420 = vrot.lane.b32.xlu0 %v4135_v4, %s4056_s6  ;;  %v3556_v45 = vcombine.high %v434_v38, %v434_v38  ;;  %v544_v47 = vrot.slane %v539_v35, %v4340_v15 }
  0xb0   : > { %332 = vrot.lane.b32.xlu1 %v4135_v4, %s4057_s7  ;;  %v1829_v4 = vpack.i.b16 %v3683_v55, %v3683_v55  ;;  %v1620_v55 = vld [vmem:[%s5073_s1] sm:$0x88] }
  0xb1   : > { %v4453_v60 = vpop.permute.xlu0 %598  ;;  %3229 = vmatpush1.bf16.msra.mxu1 %v1946_v52  ;;  %v4457_v63 = vpop.permute.xlu1 %594  ;;  %v3555_v52 = vcombine.low %v434_v38, %v434_v38 }
  0xb2   : > { %v603_v62 = vsel %vm602_vm4, %v597_v49, %v4453_v60  ;;  %v612_v0 = vsel %vm602_vm4, %v4457_v63, %v597_v49  ;;  %v1834_v28 = vrot.slane %v1829_v4, %v4408_v18  ;;  %v1730_v49 = vpack.i.b16 %v3672_v36, %v3672_v36 }
  0xb3   : > { %v659_v13 = vmul.bf16 %v641_v54, %v603_v62  ;;  %2066 = vrot.lane.b32.xlu0 %v4125_v2, %s4054_s29  ;;  %v658_v17 = vmul.bf16 %v633_v57, %v612_v0  ;;  %v1723_v62 = vpack.i.b16 %v3671_v5, %v3671_v5  ;;  %v447_v16 = vshrl.u32 %v3555_v52, 16 }
  0xb4   : > { %1522 = vrot.lane.b32.xlu1 %v4295_v31, %s4053_s28  ;;  %v1735_v4 = vrot.slane %v1730_v49, %v4408_v18 }
  0xb5   : > { %v1801_v22 = vpop.permute.xlu0 %1800  ;;  %3187 = vmatprep.subr.bf16.mxu0 %v659_v13  ;;  %v4469_v27 = vpop.permute.xlu1 %1802  ;;  %v455_v13 = vshrl.u32 %v3556_v45, 16  ;;  %v1728_v24 = vrot.slane %v1723_v62, %v4408_v18  ;;  %v346_v45 = vld [vmem:[%s5073_s1] sm:$0x11] }
  0xb6   : > { %5100 = vst [vmem:[#allocation4_spill] sm:$0xff] %v4469_v27  ;;  %3188 = vmatpush1.bf16.msra.mxu0 %v658_v17  ;;  %v1806_v20 = vsel %vm334_vm7, %v1801_v22, %v4469_v27  ;;  %v3664_v17 = vcombine.high %v1620_v55, %v1620_v55 }
  0xb7   : > { %1980 = vrot.lane.b32.xlu0 %v4125_v2, %s4055_s30  ;;  %v1857_v33 = vmul.bf16 %v1841_v19, %v1806_v20  ;;  %v456_v20 = vpack.i.b16 %v455_v13, %v455_v13 }
  0xb8   : > { %1432 = vrot.lane.b32.xlu1 %v4295_v31, %s4051_s26  ;;  %v1641_v35 = vshrl.u32 %v3664_v17, 16  ;;  %s304_s26 = scalar_lea.vmem %s5077_s5, %s3542_s10 }
  0xb9   : > { %v4481_v3 = vpop.permute.xlu0 %1787  ;;  %3230 = vmatprep.subr.bf16.mxu1 %v1857_v33  ;;  %v509_v42 = vpop.permute.xlu1 %508  ;;  %v448_v33 = vpack.i.b16 %v447_v16, %v447_v16  ;;  %v2438_v16 = vld [vmem:[%s5073_s1 + $0x10] sm:$0x11] }
  0xba   : > { %5101 = vst [vmem:[#allocation5_spill] sm:$0xff] %v4481_v3  ;;  %v1814_v41 = vsel %vm334_vm7, %v4481_v3, %v1801_v22  ;;  %v1642_v5 = vpack.i.b16 %v1641_v35, %v1641_v35 }
  0xbb   : > { %v1856_v43 = vmul.bf16 %v1834_v28, %v1814_v41  ;;  %1890 = vrot.lane.b32.xlu0 %v4125_v2, %s4056_s6  ;;  %v3663_v28 = vcombine.low %v1620_v55, %v1620_v55 }
  0xbc   : > { %1804 = vrot.lane.b32.xlu1 %v4125_v2, %s4057_s7  ;;  %v1647_v13 = vrot.slane %v1642_v5, %v4298_v32 }
  0xbd   : > { %v4491_v54 = vpop.permute.xlu0 %510  ;;  %3231 = vmatpush1.bf16.msra.mxu1 %v1856_v43  ;;  %v4498_v58 = vpop.permute.xlu1 %506  ;;  %v461_v43 = vrot.slane %v456_v20, %v4408_v18 }
  0xbe   : > { %v515_v57 = vsel %vm514_vm5, %v509_v42, %v4491_v54  ;;  %v524_v2 = vsel %vm514_vm5, %v4498_v58, %v509_v42 }
  0xbf   : > { %v567_v59 = vmul.bf16 %v551_v44, %v515_v57  ;;  %1338 = vrot.lane.b32.xlu0 %v4204_v9, %s4054_s29  ;;  %v566_v0 = vmul.bf16 %v544_v47, %v524_v2  ;;  %v1633_v44 = vshrl.u32 %v3663_v28, 16  ;;  %v3548_v2 = vcombine.high %v346_v45, %v346_v45 }
  0xc0   : > { %1698 = vrot.lane.b32.xlu1 %v4295_v31, %s4058_s8  ;;  %v3740_v28 = vcombine.high %v2438_v16, %v2438_v16 }
  0xc1   : > { %v1695_v19 = vpop.permute.xlu0 %1694  ;;  %3189 = vmatprep.subr.bf16.mxu0 %v567_v59  ;;  %v4507_v21 = vpop.permute.xlu1 %1696  ;;  %v1634_v59 = vpack.i.b16 %v1633_v44, %v1633_v44 }
  0xc2   : > { %5102 = vst [vmem:[#allocation6_spill] sm:$0xff] %v4507_v21  ;;  %3190 = vmatpush1.bf16.msra.mxu0 %v566_v0  ;;  %v1701_v22 = vsel %vm970_vm8, %v1695_v19, %v4507_v21  ;;  %v3547_v0 = vcombine.low %v346_v45, %v346_v45  ;;  %v2458_v44 = vpack.i.b16 %v3740_v28, %v3740_v28  ;;  %v2348_v45 = vld [vmem:[%s5073_s1] sm:$0x88] }
  0xc3   : > { %1252 = vrot.lane.b32.xlu0 %v4204_v9, %s4055_s30  ;;  %v1751_v29 = vmul.bf16 %v1735_v4, %v1701_v22  ;;  %v366_v22 = vpack.i.b16 %v3548_v2, %v3548_v2  ;;  %v3731_v28 = vcombine.low %v2348_v45, %v2348_v45 }
  0xc4   : > { %1608 = vrot.lane.b32.xlu1 %v4295_v31, %s4052_s27  ;;  %v453_v31 = vrot.slane %v448_v33, %v4408_v18  ;;  %v359_v20 = vpack.i.b16 %v3547_v0, %v3547_v0  ;;  %v2616_v33 = vld [vmem:[%s5075_s3] sm:$0xff]  ;;  %v2463_v0 = vrot.slane %v2458_v44, %v4408_v18 }
  0xc5   : > { %v4516_v36 = vpop.permute.xlu0 %1692  ;;  %3232 = vmatprep.subr.bf16.mxu1 %v1751_v29  ;;  %v417_v41 = vpop.permute.xlu1 %416  ;;  %v4059_v29 = vmov 0  }
  0xc6   : > { %5103 = vst [vmem:[#allocation7_spill] sm:$0xff] %v4516_v36  ;;  %v1700_v38 = vsel %vm970_vm8, %v4516_v36, %v1695_v19  ;;  %v1639_v19 = vrot.slane %v1634_v59, %v4298_v32  ;;  %3902 = vset.pattern.permute.xlu0 %v4059_v29 }
  0xc7   : > { %v1750_v42 = vmul.bf16 %v1728_v24, %v1700_v38  ;;  %1162 = vrot.lane.b32.xlu0 %v4204_v9, %s4056_s6 }
  0xc8   : > { %2426 = vrot.lane.b32.xlu1 %v4155_v6, %s4058_s8 }
  0xc9   : > { %v4529_v47 = vpop.permute.xlu0 %418  ;;  %3233 = vmatpush1.bf16.msra.mxu1 %v1750_v42  ;;  %v4533_v52 = vpop.permute.xlu1 %414  ;;  %v371_v42 = vrot.slane %v366_v22, %v4408_v18 }
  0xca   : > { %v423_v49 = vsel %vm422_vm6, %v417_v41, %v4529_v47  ;;  %v432_v57 = vsel %vm422_vm6, %v4533_v52, %v417_v41 }
  0xcb   : > { %v479_v55 = vmul.bf16 %v461_v43, %v423_v49  ;;  %1076 = vrot.lane.b32.xlu0 %v4204_v9, %s4057_s7  ;;  %v478_v62 = vmul.bf16 %v453_v31, %v432_v57  ;;  %v3739_v43 = vcombine.low %v2438_v16, %v2438_v16  ;;  %v1534_v31 = vld [vmem:[%s5073_s1] sm:$0x88]  ;;  %v3732_v16 = vcombine.high %v2348_v45, %v2348_v45 }
  0xcc   : > { %2336 = vrot.lane.b32.xlu1 %v4155_v6, %s4052_s27 }
  0xcd   : > { %v1605_v4 = vpop.permute.xlu0 %1604  ;;  %3191 = vmatprep.subr.bf16.mxu0 %v479_v55  ;;  %v4545_v17 = vpop.permute.xlu1 %1606  ;;  %v2451_v2 = vpack.i.b16 %v3739_v43, %v3739_v43 }
  0xce   : > { %5104 = vst [vmem:[#allocation8_spill] sm:$0xff] %v4545_v17  ;;  %3192 = vmatpush1.bf16.msra.mxu0 %v478_v62  ;;  %v1611_v9 = vsel %vm878_vm2, %v1605_v4, %v4545_v17  ;;  %v3656_v62 = vcombine.high %v1534_v31, %v1534_v31 }
  0xcf   : > { %968 = vrot.lane.b32.xlu0 %v4182_v7, %s4058_s8  ;;  %v1665_v24 = vmul.bf16 %v1647_v13, %v1611_v9 }
  0xd0   : > { %2250 = vrot.lane.b32.xlu1 %v4155_v6, %s4053_s28  ;;  %v364_v6 = vrot.slane %v359_v20, %v4408_v18  ;;  %v1554_v20 = vpack.i.b16 %v3656_v62, %v3656_v62 }
  0xd1   : > { %v4557_v35 = vpop.permute.xlu0 %1602  ;;  %3234 = vmatprep.subr.bf16.mxu1 %v1665_v24  ;;  %v329_v38 = vpop.permute.xlu1 %328  ;;  %v2456_v24 = vrot.slane %v2451_v2, %v4408_v18 }
  0xd2   : > { %5105 = vst [vmem:[#allocation9_spill] sm:$0xff] %v4557_v35  ;;  %v1610_v7 = vsel %vm878_vm2, %v4557_v35, %v1605_v4  ;;  %v3655_v4 = vcombine.low %v1534_v31, %v1534_v31  ;;  %v1559_v44 = vrot.slane %v1554_v20, %v4298_v32  ;;  %v2361_v31 = vshrl.u32 %v3731_v28, 16 }
  0xd3   : > { %v1664_v41 = vmul.bf16 %v1639_v19, %v1610_v7  ;;  %2619 = vperm.xlu0 %3902, %v2616_v33   ;;  %v2369_v7 = vshrl.u32 %v3732_v16, 16 }
  0xd4   : > { %v1547_v33 = vpack.i.b16 %v3655_v4, %v3655_v4  ;;  %v2362_v16 = vpack.i.b16 %v2361_v31, %v2361_v31 }
  0xd5   : > { %v4566_v5 = vpop.permute.xlu0 %330  ;;  %3235 = vmatpush1.bf16.msra.mxu1 %v1664_v41  ;;  %v4573_v55 = vpop.permute.xlu1 %315 }
  0xd6   : > { %v335_v49 = vsel %vm334_vm7, %v329_v38, %v4566_v5  ;;  %v344_v59 = vsel %vm334_vm7, %v4573_v55, %v329_v38  ;;  %v1444_v38 = vld [vmem:[%s5073_s1] sm:$0x44]  ;;  %v1552_v45 = vrot.slane %v1547_v33, %v4298_v32  ;;  %v891_v33 = vld [vmem:[%s5073_s1 + $0x8] sm:$0x88] }
  0xd7   : > { %v387_v57 = vmul.bf16 %v371_v42, %v335_v49  ;;  %v386_v13 = vmul.bf16 %v364_v6, %v344_v59  ;;  %v3648_v49 = vcombine.high %v1444_v38, %v1444_v38  ;;  %v3647_v59 = vcombine.low %v1444_v38, %v1444_v38  ;;  %v1350_v38 = vld [vmem:[%s5073_s1] sm:$0x22] }
  0xd9   : > { %v2423_v9 = vpop.permute.xlu0 %2422  ;;  %3193 = vmatprep.subr.bf16.mxu0 %v387_v57  ;;  %v4578_v19 = vpop.permute.xlu1 %2424  ;;  %v2370_v57 = vpack.i.b16 %v2369_v7, %v2369_v7  ;;  %v1457_v20 = vshrl.u32 %v3647_v59, 16  ;;  %v3597_v59 = vcombine.low %v891_v33, %v891_v33 }
  0xda   : > { %5106 = vst [vmem:[#allocation10_spill] sm:$0xff] %v4578_v19  ;;  %3194 = vmatpush1.bf16.msra.mxu0 %v386_v13  ;;  %v2429_v22 = vsel %vm970_vm8, %v2423_v9, %v4578_v19 }
  0xdb   : > { %v2479_v29 = vmul.bf16 %v2463_v0, %v2429_v22  ;;  %v1458_v31 = vpack.i.b16 %v1457_v20, %v1457_v20 }
  0xdd   : > { %v4586_v41 = vpop.permute.xlu0 %2420  ;;  %3246 = vmatprep.subr.bf16.mxu1 %v2479_v29  ;;  %v1519_v43 = vpop.permute.xlu1 %1518  ;;  %v2262_v29 = vld [vmem:[%s5073_s1] sm:$0x88] }
  0xde   : > { %5107 = vst [vmem:[#allocation11_spill] sm:$0xff] %v4586_v41  ;;  %v2428_v42 = vsel %vm970_vm8, %v4586_v41, %v2423_v9  ;;  %v1465_v9 = vshrl.u32 %v3648_v49, 16  ;;  %v3724_v49 = vcombine.high %v2262_v29, %v2262_v29 }
  0xdf   : > { %v2478_v6 = vmul.bf16 %v2456_v24, %v2428_v42  ;;  %v2375_v24 = vrot.slane %v2370_v57, %v4298_v32 }
  0xe1   : > { %v4592_v2 = vpop.permute.xlu0 %1520  ;;  %3247 = vmatpush2.bf16.msra.mxu1 %v2478_v6  ;;  %v4596_v13 = vpop.permute.xlu1 %1516  ;;  %v1466_v6 = vpack.i.b16 %v1465_v9, %v1465_v9  ;;  %v2282_v9 = vpack.i.b16 %v3724_v49, %v3724_v49 }
  0xe2   : > { %v1525_v62 = vsel %vm790_vm3, %v1519_v43, %v4592_v2  ;;  %v1524_v4 = vsel %vm790_vm3, %v4596_v13, %v1519_v43  ;;  %v2367_v43 = vrot.slane %v2362_v16, %v4298_v32  ;;  %v1463_v16 = vrot.slane %v1458_v31, %v4285_v25 }
  0xe3   : > { %v1575_v0 = vmul.bf16 %v1559_v44, %v1525_v62  ;;  %v1574_v22 = vmul.bf16 %v1552_v45, %v1524_v4  ;;  %v3598_v45 = vcombine.high %v891_v33, %v891_v33  ;;  %v3640_v62 = vcombine.high %v1350_v38, %v1350_v38 }
  0xe4   : > { %v1471_v19 = vrot.slane %v1466_v6, %v4285_v25  ;;  %v2287_v31 = vrot.slane %v2282_v9, %v4298_v32 }
  0xe5   : > { %v2333_v28 = vpop.permute.xlu0 %2332  ;;  %3195 = vmatprep.subr.bf16.mxu0 %v1575_v0  ;;  %v4607_v7 = vpop.permute.xlu1 %2334  ;;  %v1371_v41 = vshrl.u32 %v3640_v62, 16 }
  0xe6   : > { %5108 = vst [vmem:[#allocation12_spill] sm:$0xff] %v4607_v7  ;;  %3196 = vmatpush2.bf16.msra.mxu0 %v1574_v22  ;;  %v2339_v42 = vsel %vm878_vm2, %v2333_v28, %v4607_v7  ;;  %v3723_v7 = vcombine.low %v2262_v29, %v2262_v29  ;;  %v3639_v29 = vcombine.low %v1350_v38, %v1350_v38 }
  0xe7   : > { %v2393_v44 = vmul.bf16 %v2375_v24, %v2339_v42  ;;  %v927_v24 = vshrl.u32 %v3598_v45, 16  ;;  %v919_v42 = vshrl.u32 %v3597_v59, 16  ;;  %v803_v45 = vld [vmem:[%s5073_s1 + $0x8] sm:$0x88] }
  0xe8   : > { %v2275_v6 = vpack.i.b16 %v3723_v7, %v3723_v7 }
  0xe9   : > { %v4615_v57 = vpop.permute.xlu0 %2330  ;;  %3248 = vmatprep.subr.bf16.mxu1 %v2393_v44  ;;  %v1429_v4 = vpop.permute.xlu1 %1428  ;;  %v928_v49 = vpack.i.b16 %v927_v24, %v927_v24  ;;  %v920_v62 = vpack.i.b16 %v919_v42, %v919_v42  ;;  %v3590_v42 = vcombine.high %v803_v45, %v803_v45 }
  0xea   : > { %5109 = vst [vmem:[#allocation13_spill] sm:$0xff] %v4615_v57  ;;  %v2338_v0 = vsel %vm878_vm2, %v4615_v57, %v2333_v28  ;;  %v2280_v38 = vrot.slane %v2275_v6, %v4298_v32  ;;  %v4652_v6 = vcombine.low %v4259_v12, %v4259_v12 }
  0xeb   : > { %v2392_v22 = vmul.bf16 %v2367_v43, %v2338_v0  ;;  %v1372_v0 = vpack.i.b16 %v1371_v41, %v1371_v41  ;;  %v1174_v41 = vld [vmem:[%s5073_s1] sm:$0x11]  ;;  %v933_v24 = vrot.slane %v928_v49, %v4298_v32  ;;  %v836_v35 = vpack.i.b16 %v3590_v42, %v3590_v42 }
  0xec   : > { %5112 = vst [vmem:[#allocation16_spill] sm:$0xff] %v4652_v6 }
  0xed   : > { %v4621_v20 = vpop.permute.xlu0 %1430  ;;  %3249 = vmatpush2.bf16.msra.mxu1 %v2392_v22  ;;  %v4625_v17 = vpop.permute.xlu1 %1426 }
  0xee   : > { %v1435_v33 = vsel %vm698_vm1, %v1429_v4, %v4621_v20  ;;  %v1434_v43 = vsel %vm698_vm1, %v4625_v17, %v1429_v4  ;;  %v1363_v4 = vshrl.u32 %v3639_v29, 16 }
  0xef   : > { %v1489_v28 = vmul.bf16 %v1471_v19, %v1435_v33  ;;  %v1488_v44 = vmul.bf16 %v1463_v16, %v1434_v43  ;;  %v711_v19 = vld [vmem:[%s5073_s1 + $0x8] sm:$0x44]  ;;  %v3589_v16 = vcombine.low %v803_v45, %v803_v45  ;;  %v1377_v43 = vrot.slane %v1372_v0, %v4340_v15 }
  0xf0   : > { %v3581_v29 = vcombine.low %v711_v19, %v711_v19  ;;  %v3582_v49 = vcombine.high %v711_v19, %v711_v19  ;;  %v3624_v45 = vcombine.high %v1174_v41, %v1174_v41  ;;  %v1364_v12 = vpack.i.b16 %v1363_v4, %v1363_v4 }
  0xf1   : > { %v2247_v59 = vpop.permute.xlu0 %2246  ;;  %3197 = vmatprep.subr.bf16.mxu0 %v1489_v28  ;;  %v4633_v22 = vpop.permute.xlu1 %2248  ;;  %v925_v28 = vrot.slane %v920_v62, %v4298_v32 }
  0xf2   : > { %5110 = vst [vmem:[#allocation14_spill] sm:$0xff] %v4633_v22  ;;  %3198 = vmatpush2.bf16.msra.mxu0 %v1488_v44  ;;  %v2253_v7 = vsel %vm790_vm3, %v2247_v59, %v4633_v22  ;;  %v1195_v19 = vshrl.u32 %v3624_v45, 16  ;;  %v1369_v4 = vrot.slane %v1364_v12, %v4340_v15 }
  0xf3   : > { %3199 = vmatprep.subr.bf16.mxu0 %v4199_v8  ;;  %v2303_v9 = vmul.bf16 %v2287_v31, %v2253_v7  ;;  %v1264_v8 = vld [vmem:[%s5073_s1] sm:$0x22]  ;;  %v829_v7 = vpack.i.b16 %v3589_v16, %v3589_v16  ;;  %v3623_v16 = vcombine.low %v1174_v41, %v1174_v41  ;;  %v1088_v41 = vld [vmem:[%s5073_s1] sm:$0x11] }
  0xf4   : > { %v3632_v21 = vcombine.high %v1264_v8, %v1264_v8 }
  0xf5   : > { %v4646_v33 = vpop.permute.xlu0 %2244  ;;  %3250 = vmatprep.subr.bf16.mxu1 %v2303_v9  ;;  %v877_v31 = vpop.permute.xlu1 %876  ;;  %v739_v9 = vshrl.u32 %v3581_v29, 16  ;;  %v834_v42 = vrot.slane %v829_v7, %v4298_v32 }
  0xf6   : > { %5111 = vst [vmem:[#allocation15_spill] sm:$0xff] %v4646_v33  ;;  %v2252_v44 = vsel %vm790_vm3, %v4646_v33, %v2247_v59  ;;  %3200 = vmatpush2.bf16.msra.mxu0 %v4209_v10  ;;  %v888_v0 = vsel %vm878_vm2, %v877_v31, %v4324_v53  ;;  %v881_v22 = vsel %vm878_vm2, %v4319_v51, %v877_v31  ;;  %v747_v10 = vshrl.u32 %v3582_v49, 16  ;;  %v615_v51 = vld [vmem:[%s5073_s1 + $0x8] sm:$0x22] }
  0xf7   : > { %v2302_v62 = vmul.bf16 %v2280_v38, %v2252_v44  ;;  %v937_v57 = vmul.bf16 %v933_v24, %v888_v0  ;;  %v3631_v59 = vcombine.low %v1264_v8, %v1264_v8  ;;  %v936_v38 = vmul.bf16 %v925_v28, %v881_v22 }
  0xf8   : > { %v1284_v8 = vpack.i.b16 %v3632_v21, %v3632_v21  ;;  %v740_v28 = vpack.i.b16 %v739_v9, %v739_v9  ;;  %v748_v31 = vpack.i.b16 %v747_v10, %v747_v10  ;;  %v1196_v49 = vpack.i.b16 %v1195_v19, %v1195_v19  ;;  %v2173_v10 = vld [vmem:[%s5073_s1 + $0x8] sm:$0x44] }
  0xf9   : > { %v1335_v36 = vpop.permute.xlu0 %1334  ;;  %3251 = vmatpush2.bf16.msra.mxu1 %v2302_v62  ;;  %v4664_v33 = vpop.permute.xlu1 %1336  ;;  %v1277_v22 = vpack.i.b16 %v3631_v59, %v3631_v59  ;;  %v1187_v0 = vshrl.u32 %v3623_v16, 16  ;;  %v3616_v59 = vcombine.high %v1088_v41, %v1088_v41  ;;  %v4701_v16 = vld [vmem:[%s5073_s1 + $0x8] sm:$0x11] }
  0xfa   : > { %5113 = vst [vmem:[#allocation17_spill] sm:$0xff] %v4664_v33  ;;  %3261 = vmatprep.subr.bf16.mxu1 %v937_v57  ;;  %v1340_v53 = vsel %vm602_vm4, %v1335_v36, %v4664_v33  ;;  %v841_v57 = vrot.slane %v836_v35, %v4298_v32  ;;  %v3573_v35 = vcombine.low %v615_v51, %v615_v51 }
  0xfb   : > { %v1395_v24 = vmul.bf16 %v1377_v43, %v1340_v53 }
  0xfc   : > { %3253 = vmatmul.mubr.bf16.vlgmr.msra.gmra.mxu1 %v4652_v6  ;;  %v643_v53 = vshrl.u32 %v3573_v35, 16 }
  0xfd   : > { %v4675_v29 = vpop.permute.xlu0 %1332  ;;  %3262 = vmatpush1.bf16.msra.mxu1 %v936_v38  ;;  %3293 = vmatprep.mubr.bf16.mxu1 %v4392_v56  ;;  %v789_v44 = vpop.permute.xlu1 %788  ;;  %v1289_v56 = vrot.slane %v1284_v8, %v4340_v15  ;;  %v3574_v38 = vcombine.high %v615_v51, %v615_v51  ;;  %v527_v8 = vld [vmem:[%s5073_s1 + $0x8] sm:$0x22] }
  0xfe   : > { %5114 = vst [vmem:[#allocation18_spill] sm:$0xff] %v4675_v29  ;;  %v1348_v43 = vsel %vm602_vm4, %v4675_v29, %v1335_v36  ;;  %3201 = vmatprep.subr.bf16.mxu0 %v1395_v24  ;;  %v793_v45 = vsel %vm790_vm3, %v4336_v11, %v789_v44  ;;  %v800_v62 = vsel %vm790_vm3, %v789_v44, %v4349_v1 }
  0xff   : > { %v1394_v21 = vmul.bf16 %v1369_v4, %v1348_v43  ;;  %v844_v12 = vmul.bf16 %v834_v42, %v793_v45  ;;  %v845_v7 = vmul.bf16 %v841_v57, %v800_v62  ;;  %v3615_v36 = vcombine.low %v1088_v41, %v1088_v41  ;;  %v982_v4 = vld [vmem:[%s5073_s1 + $0x10] sm:$0x11] }
 0x100   : > { %v1282_v11 = vrot.slane %v1277_v22, %v4340_v15  ;;  %v745_v1 = vrot.slane %v740_v28, %v4285_v25  ;;  %v753_v24 = vrot.slane %v748_v31, %v4285_v25  ;;  %v1201_v42 = vrot.slane %v1196_v49, %v4408_v18 }
 0x101   : > { %v1249_v9 = vpop.permute.xlu0 %1248  ;;  %3202 = vmatpush2.bf16.msra.mxu0 %v1394_v21  ;;  %3263 = vmatprep.subr.bf16.mxu1 %v845_v7  ;;  %v1188_v57 = vpack.i.b16 %v1187_v0, %v1187_v0  ;;  %v1108_v28 = vpack.i.b16 %v3616_v59, %v3616_v59  ;;  %v3717_v41 = vcombine.low %v2173_v10, %v2173_v10  ;;  %v651_v21 = vshrl.u32 %v3574_v38, 16 }
 0x102   : > { %v4691_v19 = vpop.permute.xlu1 %1250  ;;  %3264 = vmatpush1.bf16.msra.mxu1 %v844_v12  ;;  %v3718_v43 = vcombine.high %v2173_v10, %v2173_v10  ;;  %v1101_v35 = vpack.i.b16 %v3615_v36, %v3615_v36  ;;  %v3604_v45 = vcombine.high %v982_v4, %v982_v4  ;;  %v3557_v62 = vcombine.low %v4701_v16, %v4701_v16  ;;  %v347_v10 = vld [vmem:[%s5073_s1 + $0x8] sm:$0x11] }
 0x103   : > { %5115 = vst [vmem:[#allocation19_spill] sm:$0xff] %v4691_v19  ;;  %v1254_v51 = vsel %vm514_vm5, %v1249_v9, %v4691_v19  ;;  %v644_v0 = vpack.i.b16 %v643_v53, %v643_v53  ;;  %v3603_v12 = vcombine.low %v982_v4, %v982_v4  ;;  %v3565_v7 = vcombine.low %v527_v8, %v527_v8 }
 0x104   : > { %v1305_v22 = vmul.bf16 %v1289_v56, %v1254_v51  ;;  %v3566_v38 = vcombine.high %v527_v8, %v527_v8  ;;  %v1193_v53 = vrot.slane %v1188_v57, %v4408_v18  ;;  %v1002_v4 = vpack.i.b16 %v3604_v45, %v3604_v45  ;;  %v2079_v57 = vld [vmem:[%s5073_s1 + $0x8] sm:$0x22] }
 0x105   : > { %v4710_v44 = vpop.permute.xlu0 %1246  ;;  %v4728_v8 = vrot.slane %v1101_v35, %v4408_v18  ;;  %v4021_v35 = vld [vmem:[%s4114_s25 + $0xc] ss:$16 sps:$4 sm:$0xff]  }
 0x106   : > { %5116 = vst [vmem:[#allocation20_spill] sm:$0xff] %v4710_v44  ;;  %v1262_v31 = vsel %vm514_vm5, %v4710_v44, %v1249_v9  ;;  %3203 = vmatprep.subr.bf16.mxu0 %v1305_v22  ;;  %v697_v49 = vpop.permute.xlu1 %696  ;;  %v2201_v9 = vshrl.u32 %v3717_v41, 16  ;;  %v2209_v22 = vshrl.u32 %v3718_v43, 16  ;;  %v553_v43 = vpack.i.b16 %v3565_v7, %v3565_v7 }
 0x107   : > { %v1304_v56 = vmul.bf16 %v1282_v11, %v1262_v31  ;;  %v701_v59 = vsel %vm698_vm1, %v4378_v48, %v697_v49  ;;  %v708_v36 = vsel %vm698_vm1, %v697_v49, %v4399_v61  ;;  %v652_v11 = vpack.i.b16 %v651_v21, %v651_v21 }
 0x108   : > { %v756_v51 = vmul.bf16 %v745_v1, %v701_v59  ;;  %v757_v6 = vmul.bf16 %v753_v24, %v708_v36  ;;  %v463_v48 = vshrl.u32 %v3557_v62, 16  ;;  %v1113_v61 = vrot.slane %v1108_v28, %v4408_v18 }
 0x109   : > { %v1159_v19 = vpop.permute.xlu0 %1158  ;;  %3204 = vmatpush2.bf16.msra.mxu0 %v1304_v56  ;;  %v3558_v1 = vcombine.high %v4701_v16, %v4701_v16  ;;  %v3549_v24 = vcombine.low %v347_v10, %v347_v10  ;;  %v560_v21 = vpack.i.b16 %v3566_v38, %v3566_v38  ;;  %v4738_v28 = vrot.slane %v644_v0, %v4340_v15 }
 0x10a   : > { %3265 = vmatprep.subr.bf16.mxu1 %v757_v6  ;;  %v4724_v31 = vpop.permute.xlu1 %1160  ;;  %v995_v6 = vpack.i.b16 %v3603_v12, %v3603_v12  ;;  %v2202_v62 = vpack.i.b16 %v2201_v9, %v2201_v9  ;;  %v2210_v16 = vpack.i.b16 %v2209_v22, %v2209_v22  ;;  %v4744_v56 = vrot.slane %v652_v11, %v4340_v15  ;;  %v1445_v22 = vld [vmem:[%s5073_s1 + $0x8] sm:$0x44] }
 0x10b   : > { %5117 = vst [vmem:[#allocation21_spill] sm:$0xff] %v4724_v31  ;;  %v1164_v41 = vsel %vm422_vm6, %v1159_v19, %v4724_v31  ;;  %3266 = vmatpush1.bf16.msra.mxu1 %v756_v51  ;;  %v4747_v59 = vrot.slane %v1002_v4, %v4408_v18  ;;  %v464_v12 = vpack.i.b16 %v463_v48, %v463_v48  ;;  %v471_v38 = vshrl.u32 %v3558_v1, 16  ;;  %v4022_v4 = vld [vmem:[%s4114_s25 + $0x8] ss:$16 sps:$4 sm:$0xff]  }
 0x10c   : > { %v1219_v45 = vmul.bf16 %v1201_v42, %v1164_v41  ;;  %3267 = vmatprep.subr.bf16.mxu1 %v4021_v35  ;;  %v3709_v7 = vcombine.low %v2079_v57, %v2079_v57  ;;  %v1535_v42 = vld [vmem:[%s5073_s1 + $0x8] sm:$0x88]  ;;  %v373_v51 = vpack.i.b16 %v3549_v24, %v3549_v24  ;;  %v3710_v9 = vcombine.high %v2079_v57, %v2079_v57 }
 0x10d   : > { %v4741_v49 = vpop.permute.xlu0 %1156  ;;  %v4759_v48 = vrot.slane %v995_v6, %v4408_v18  ;;  %v4762_v41 = vrot.slane %v553_v43, %v4340_v15  ;;  %v4768_v1 = vrot.slane %v2202_v62, %v4285_v25  ;;  %v4771_v24 = vrot.slane %v2210_v16, %v4285_v25 }
 0x10e   : > { %5118 = vst [vmem:[#allocation22_spill] sm:$0xff] %v4741_v49  ;;  %v1172_v0 = vsel %vm422_vm6, %v4741_v49, %v1159_v19  ;;  %3205 = vmatprep.subr.bf16.mxu0 %v1219_v45  ;;  %v1073_v36 = vpop.permute.xlu1 %1072  ;;  %v4765_v19 = vrot.slane %v560_v21, %v4340_v15  ;;  %v3550_v57 = vcombine.high %v347_v10, %v347_v10  ;;  %v2107_v35 = vshrl.u32 %v3709_v7, 16 }
 0x10f   : > { %v1218_v11 = vmul.bf16 %v1193_v53, %v1172_v0  ;;  %3268 = vmatpush1.bf16.msra.mxu1 %v4022_v4  ;;  %v3657_v45 = vcombine.low %v1535_v42, %v1535_v42  ;;  %v1993_v53 = vld [vmem:[%s5073_s1 + $0x8] sm:$0x22]  ;;  %v4780_v43 = vcombine.low %v4384_v50, %v4384_v50  ;;  %v4783_v21 = vrot.slane %v464_v12, %v4408_v18  ;;  %v1903_v50 = vld [vmem:[%s5073_s1 + $0x8] sm:$0x11] }
 0x110   : > { %v3649_v62 = vcombine.low %v1445_v22, %v1445_v22  ;;  %v472_v0 = vpack.i.b16 %v471_v38, %v471_v38  ;;  %v4790_v4 = vrot.slane %v373_v51, %v4408_v18  ;;  %v2115_v31 = vshrl.u32 %v3710_v9, 16 }
 0x111   : > { %v4776_v6 = vpop.permute.xlu0 %1074  ;;  %3206 = vmatpush2.bf16.msra.mxu0 %v1218_v11  ;;  %v3658_v7 = vcombine.high %v1535_v42, %v1535_v42  ;;  %v3701_v49 = vcombine.low %v1993_v53, %v1993_v53  ;;  %v1561_v33 = vpack.i.b16 %v3657_v45, %v3657_v45  ;;  %v3650_v29 = vcombine.high %v1445_v22, %v1445_v22 }
 0x112   : > { %5119 = vst [vmem:[#allocation23_spill] sm:$0xff] %v4776_v6  ;;  %v1078_v10 = vsel %vm334_vm7, %v1073_v36, %v4776_v6  ;;  %v4787_v16 = vpop.permute.xlu1 %1059  ;;  %v380_v6 = vpack.i.b16 %v3550_v57, %v3550_v57  ;;  %v2108_v51 = vpack.i.b16 %v2107_v35, %v2107_v35  ;;  %v3702_v27 = vcombine.high %v1993_v53, %v1993_v53 }
 0x113   : > { %v1129_v11 = vmul.bf16 %v1113_v61, %v1078_v10  ;;  %v1086_v12 = vsel %vm334_vm7, %v4787_v16, %v1073_v36  ;;  %v1473_v9 = vshrl.u32 %v3649_v62, 16  ;;  %v3693_v3 = vcombine.low %v1903_v50, %v1903_v50 }
 0x114   : > { %v1128_v44 = vmul.bf16 %v4728_v8, %v1086_v12  ;;  %v2116_v42 = vpack.i.b16 %v2115_v31, %v2115_v31  ;;  %v3694_v10 = vcombine.high %v1903_v50, %v1903_v50  ;;  %v1817_v8 = vld [vmem:[%s5073_s1 + $0x8] sm:$0x11]  ;;  %v1568_v45 = vpack.i.b16 %v3658_v7, %v3658_v7 }
 0x115   : > { %v601_v38 = vpop.permute.xlu0 %600  ;;  %3207 = vmatprep.subr.bf16.mxu0 %v1129_v11  ;;  %v2019_v53 = vpack.i.b16 %v3701_v49, %v3701_v49  ;;  %v4808_v35 = vrot.slane %v472_v0, %v4408_v18  ;;  %v2026_v62 = vpack.i.b16 %v3702_v27, %v3702_v27  ;;  %v1474_v50 = vpack.i.b16 %v1473_v9, %v1473_v9  ;;  %v1351_v49 = vld [vmem:[%s5073_s1 + $0x8] sm:$0x22] }
 0x116   : > { %v604_v46 = vsel %vm602_vm4, %v4453_v60, %v601_v38  ;;  %v605_v61 = vsel %vm602_vm4, %v601_v38, %v4457_v63  ;;  %v965_v36 = vpop.permute.xlu1 %964  ;;  %3208 = vmatpush2.bf16.msra.mxu0 %v1128_v44  ;;  %v4811_v60 = vrot.slane %v380_v6, %v4408_v18  ;;  %v4814_v63 = vrot.slane %v1561_v33, %v4298_v32 }
 0x117   : > { %v660_v22 = vmul.bf16 %v4738_v28, %v604_v46  ;;  %v661_v57 = vmul.bf16 %v4744_v56, %v605_v61  ;;  %v1481_v44 = vshrl.u32 %v3650_v29, 16  ;;  %v1931_v46 = vshrl.u32 %v3693_v3, 16 }
 0x118   : > { %v3685_v28 = vcombine.low %v1817_v8, %v1817_v8  ;;  %v4826_v33 = vrot.slane %v2108_v51, %v4340_v15  ;;  %v4829_v29 = vrot.slane %v2116_v42, %v4340_v15  ;;  %v1939_v27 = vshrl.u32 %v3694_v10, 16 }
 0x119   : > { %v4816_v31 = vpop.permute.xlu0 %966  ;;  %3269 = vmatprep.subr.bf16.mxu1 %v661_v57  ;;  %v4835_v11 = vrot.slane %v1568_v45, %v4298_v32  ;;  %v4838_v12 = vrot.slane %v2019_v53, %v4340_v15  ;;  %v1482_v38 = vpack.i.b16 %v1481_v44, %v1481_v44  ;;  %v3686_v51 = vcombine.high %v1817_v8, %v1817_v8  ;;  %v1711_v53 = vld [vmem:[%s5073_s1 + $0x18] sm:$0x11] }
 0x11a   : > { %v972_v56 = vsel %vm970_vm8, %v965_v36, %v4816_v31  ;;  %v4823_v6 = vpop.permute.xlu1 %962  ;;  %3270 = vmatpush1.bf16.msra.mxu1 %v660_v22  ;;  %v3641_v9 = vcombine.low %v1351_v49, %v1351_v49  ;;  %v4842_v42 = vrot.slane %v2026_v62, %v4340_v15  ;;  %v1843_v10 = vpack.i.b16 %v3685_v28, %v3685_v28 }
 0x11b   : > { %v1023_v3 = vmul.bf16 %v4747_v59, %v972_v56  ;;  %v971_v0 = vsel %vm970_vm8, %v4823_v6, %v965_v36  ;;  %v4845_v59 = vrot.slane %v1474_v50, %v4285_v25  ;;  %v1932_v36 = vpack.i.b16 %v1931_v46, %v1931_v46 }
 0x11c   : > { %v1022_v7 = vmul.bf16 %v4759_v48, %v971_v0  ;;  %v1940_v8 = vpack.i.b16 %v1939_v27, %v1939_v27  ;;  %v3642_v45 = vcombine.high %v1351_v49, %v1351_v49  ;;  %v1850_v28 = vpack.i.b16 %v3686_v51, %v3686_v51  ;;  %v1621_v0 = vld [vmem:[%s5073_s1 + $0x8] sm:$0x88] }
 0x11d   : > { %v513_v61 = vpop.permute.xlu0 %512  ;;  %3209 = vmatprep.subr.bf16.mxu0 %v1023_v3  ;;  %v1379_v49 = vshrl.u32 %v3641_v9, 16  ;;  %v4874_v27 = vrot.slane %v1932_v36, %v4408_v18  ;;  %v4023_v51 = vld [vmem:[%s4114_s25 + $0x4c] ss:$16 sps:$4 sm:$0xff]   ;;  %v3674_v36 = vcombine.high %v1711_v53, %v1711_v53 }
 0x11e   : > { %v516_v22 = vsel %vm514_vm5, %v4491_v54, %v513_v61  ;;  %v517_v57 = vsel %vm514_vm5, %v513_v61, %v4498_v58  ;;  %v2161_v48 = vpop.permute.xlu1 %2160  ;;  %3210 = vmatpush2.bf16.msra.mxu0 %v1022_v7  ;;  %v1387_v3 = vshrl.u32 %v3642_v45, 16  ;;  %v4891_v9 = vrot.slane %v1850_v28, %v4408_v18 }
 0x11f   : > { %v568_v44 = vmul.bf16 %v4762_v41, %v516_v22  ;;  %v569_v62 = vmul.bf16 %v4765_v19, %v517_v57  ;;  %v2164_v50 = vsel %vm698_vm1, %v4309_v40, %v2161_v48  ;;  %v2170_v54 = vsel %vm698_vm1, %v2161_v48, %v4290_v30 }
 0x120   : > { %v2218_v58 = vmul.bf16 %v4768_v1, %v2164_v50  ;;  %v2219_v46 = vmul.bf16 %v4771_v24, %v2170_v54  ;;  %v4864_v41 = vrot.slane %v1482_v38, %v4285_v25  ;;  %v4867_v19 = vrot.slane %v1843_v10, %v4408_v18  ;;  %v1265_v25 = vld [vmem:[%s5073_s1 + $0x8] sm:$0x22] }
 0x121   : > { %v421_v56 = vpop.permute.xlu0 %420  ;;  %3212 = vmatmul.mubr.bf16.vlgmr.msra.gmra.mxu0 %v4780_v43  ;;  %3271 = vmatprep.subr.bf16.mxu1 %v569_v62  ;;  %v3673_v40 = vcombine.low %v1711_v53, %v1711_v53  ;;  %v4887_v38 = vrot.slane %v1940_v8, %v4408_v18  ;;  %v1380_v61 = vpack.i.b16 %v1379_v49, %v1379_v49  ;;  %v4024_v62 = vld [vmem:[%s4114_s25 + $0x48] ss:$16 sps:$4 sm:$0xff]  }
 0x122   : > { %v424_v30 = vsel %vm422_vm6, %v4529_v47, %v421_v56  ;;  %v425_v1 = vsel %vm422_vm6, %v421_v56, %v4533_v52  ;;  %3302 = vmatprep.subr.bf16.mxu0 %v2219_v46  ;;  %v333_v24 = vpop.permute.xlu1 %332  ;;  %3272 = vmatpush1.bf16.msra.mxu1 %v568_v44  ;;  %v4897_v10 = vcombine.low %v1265_v25, %v1265_v25 }
 0x123   : > { %v480_v47 = vmul.bf16 %v4783_v21, %v424_v30  ;;  %v481_v7 = vmul.bf16 %v4808_v35, %v425_v1  ;;  %v337_v52 = vsel %vm334_vm7, %v333_v24, %v4573_v55  ;;  %3303 = vmatpush1.bf16.msra.mxu0 %v2218_v58  ;;  %3860 = vmatprep.mubr.msk.bf16.mxu0 %vm3175_vm0, %v4265_v14 }
 0x124   : > { %3304 = vmatprep.subr.bf16.mxu0 %v4023_v51  ;;  %v336_v21 = vsel %vm334_vm7, %v4566_v5, %v333_v24  ;;  %v1737_v55 = vpack.i.b16 %v3673_v40, %v3673_v40  ;;  %v3665_v22 = vcombine.low %v1621_v0, %v1621_v0  ;;  %v389_v57 = vmul.bf16 %v4811_v60, %v337_v52  ;;  %v1175_v5 = vld [vmem:[%s5073_s1 + $0x8] sm:$0x11] }
 0x125   : > { %v2067_v35 = vpop.permute.xlu0 %2066  ;;  %3273 = vmatprep.subr.bf16.mxu1 %v481_v7  ;;  %v1388_v14 = vpack.i.b16 %v1387_v3, %v1387_v3  ;;  %v388_v50 = vmul.bf16 %v4790_v4, %v336_v21  ;;  %v1744_v54 = vpack.i.b16 %v3674_v36, %v3674_v36  ;;  %v3634_v58 = vcombine.high %v1265_v25, %v1265_v25 }
 0x126   : > { %v2069_v48 = vsel %vm602_vm4, %v4362_v34, %v2067_v35  ;;  %v2070_v8 = vsel %vm602_vm4, %v2067_v35, %v4369_v37  ;;  %v1523_v45 = vpop.permute.xlu1 %1522  ;;  %3274 = vmatpush1.bf16.msra.mxu1 %v480_v47  ;;  %v3666_v34 = vcombine.high %v1621_v0, %v1621_v0  ;;  %v4914_v37 = vrot.slane %v1380_v61, %v4340_v15 }
 0x127   : > { %v2124_v53 = vmul.bf16 %v4826_v33, %v2069_v48  ;;  %v2125_v44 = vmul.bf16 %v4829_v29, %v2070_v8  ;;  %v1532_v60 = vsel %vm790_vm3, %v1523_v45, %v4596_v13  ;;  %3305 = vmatpush1.bf16.msra.mxu0 %v4024_v62  ;;  %3275 = vmatprep.subr.bf16.mxu1 %v389_v57  ;;  %v1649_v13 = vshrl.u32 %v3665_v22, 16 }
 0x128   : > { %v1526_v46 = vsel %vm790_vm3, %v4592_v2, %v1523_v45  ;;  %v4919_v29 = vrot.slane %v1737_v55, %v4408_v18  ;;  %v3625_v28 = vcombine.low %v1175_v5, %v1175_v5  ;;  %v1577_v49 = vmul.bf16 %v4835_v11, %v1532_v60  ;;  %v2439_v2 = vld [vmem:[%s5073_s1 + $0x18] sm:$0x11]  ;;  %v5121_v55 = vld [vmem:[#allocation5_spill] sm:$0xff] }
 0x129   : > { %v1981_v33 = vpop.permute.xlu0 %1980  ;;  %3306 = vmatprep.subr.bf16.mxu0 %v2125_v44  ;;  %v4927_v30 = vrot.slane %v1388_v14, %v4340_v15  ;;  %v1291_v3 = vpack.i.b16 %v4897_v10, %v4897_v10  ;;  %v1298_v25 = vpack.i.b16 %v3634_v58, %v3634_v58  ;;  %v3626_v0 = vcombine.high %v1175_v5, %v1175_v5  ;;  %v5122_v44 = vld [vmem:[#allocation4_spill] sm:$0xff]  ;;  %v5124_v58 = vld [vmem:[#allocation7_spill] sm:$0xff] }
 0x12a   : > { %v1983_v4 = vsel %vm514_vm5, %v4413_v23, %v1981_v33  ;;  %v1984_v56 = vsel %vm514_vm5, %v1981_v33, %v4417_v26  ;;  %v1433_v40 = vpop.permute.xlu1 %1432  ;;  %3276 = vmatpush1.bf16.msra.mxu1 %v388_v50  ;;  %v1657_v23 = vshrl.u32 %v3666_v34, 16  ;;  %v1576_v26 = vmul.bf16 %v4814_v63, %v1526_v46  ;;  %v5120_v63 = vld [vmem:[#allocation3_spill] sm:$0xff] }
 0x12b   : > { %v2034_v1 = vmul.bf16 %v4838_v12, %v1983_v4  ;;  %v2035_v24 = vmul.bf16 %v4842_v42, %v1984_v56  ;;  %v1442_v11 = vsel %vm698_vm1, %v1433_v40, %v4625_v17  ;;  %3307 = vmatpush1.bf16.msra.mxu0 %v2124_v53  ;;  %3277 = vmatprep.subr.bf16.mxu1 %v1577_v49  ;;  %v1203_v42 = vshrl.u32 %v3625_v28, 16  ;;  %v4025_v28 = vld [vmem:[%s4114_s25 + $0x2c] ss:$16 sps:$4 sm:$0xff]  }
 0x12c   : > { %v1436_v47 = vsel %vm698_vm1, %v4621_v20, %v1433_v40  ;;  %v1650_v12 = vpack.i.b16 %v1649_v13, %v1649_v13  ;;  %v3741_v52 = vcombine.low %v2439_v2, %v2439_v2  ;;  %v1491_v17 = vmul.bf16 %v4864_v41, %v1442_v11  ;;  %v2349_v41 = vld [vmem:[%s5073_s1 + $0x8] sm:$0x88]  ;;  %v5125_v40 = vld [vmem:[#allocation17_spill] sm:$0xff] }
 0x12d   : > { %v1891_v7 = vpop.permute.xlu0 %1890  ;;  %3308 = vmatprep.subr.bf16.mxu0 %v2035_v24  ;;  %v1749_v21 = vrot.slane %v1744_v54, %v4408_v18  ;;  %v1658_v22 = vpack.i.b16 %v1657_v23, %v1657_v23  ;;  %v1490_v57 = vmul.bf16 %v4845_v59, %v1436_v47  ;;  %v3742_v48 = vcombine.high %v2439_v2, %v2439_v2  ;;  %v5123_v54 = vld [vmem:[#allocation18_spill] sm:$0xff] }
 0x12e   : > { %v1893_v51 = vsel %vm422_vm6, %v4431_v39, %v1891_v7  ;;  %v1894_v61 = vsel %vm422_vm6, %v1891_v7, %v5120_v63  ;;  %v1805_v36 = vpop.permute.xlu1 %1804  ;;  %3278 = vmatpush2.bf16.msra.mxu1 %v1576_v26  ;;  %v1089_v39 = vld [vmem:[%s5073_s1 + $0x8] sm:$0x11]  ;;  %v4962_v45 = vrot.slane %v1298_v25, %v4340_v15  ;;  %v4965_v14 = vrot.slane %v1650_v12, %v4298_v32  ;;  %v5126_v26 = vld [vmem:[#allocation6_spill] sm:$0xff]  ;;  %v2263_v12 = vld [vmem:[%s5073_s1 + $0x8] sm:$0x88] }
 0x12f   : > { %v1948_v35 = vmul.bf16 %v4874_v27, %v1893_v51  ;;  %v1949_v20 = vmul.bf16 %v4887_v38, %v1894_v61  ;;  %v1808_v10 = vsel %vm334_vm7, %v1805_v36, %v5121_v55  ;;  %3309 = vmatpush1.bf16.msra.mxu0 %v2034_v1  ;;  %3279 = vmatprep.subr.bf16.mxu1 %v1491_v17  ;;  %v1211_v38 = vshrl.u32 %v3626_v0, 16  ;;  %v4026_v47 = vld [vmem:[%s4114_s25 + $0x28] ss:$16 sps:$4 sm:$0xff]   ;;  %v5129_v55 = vld [vmem:[#allocation19_spill] sm:$0xff]  ;;  %s3865_s25 = sshll.u32 %s5146_s18, 4 }
 0x130   : > { %v4959_v27 = vrot.slane %v1291_v3, %v4340_v15  ;;  %v1204_v5 = vpack.i.b16 %v1203_v42, %v1203_v42  ;;  %v2465_v53 = vpack.i.b16 %v3741_v52, %v3741_v52  ;;  %v1807_v59 = vsel %vm334_vm7, %v5122_v44, %v1805_v36  ;;  %v983_v7 = vld [vmem:[%s5073_s1 + $0x18] sm:$0x11]  ;;  %v5127_v42 = vld [vmem:[#allocation20_spill] sm:$0xff]  ;;  %s5054_s9 = scalar_lea.vmem %s5076_s4, %s3865_s25 }
 0x131   : > { %v1339_v8 = vpop.permute.xlu0 %1338  ;;  %3310 = vmatprep.subr.bf16.mxu0 %v1949_v20  ;;  %v1859_v60 = vmul.bf16 %v4891_v9, %v1808_v10  ;;  %v4970_v34 = vcombine.low %v1089_v39, %v1089_v39  ;;  %v3734_v50 = vcombine.high %v2349_v41, %v2349_v41  ;;  %v1663_v33 = vrot.slane %v1658_v22, %v4298_v32 }
 0x132   : > { %v1699_v62 = vpop.permute.xlu1 %1698  ;;  %3280 = vmatpush2.bf16.msra.mxu1 %v1490_v57  ;;  %v1342_v15 = vsel %vm602_vm4, %v1339_v8, %v5123_v54  ;;  %v3618_v13 = vcombine.high %v1089_v39, %v1089_v39  ;;  %v1212_v9 = vpack.i.b16 %v1211_v38, %v1211_v38  ;;  %v2472_v49 = vpack.i.b16 %v3742_v48, %v3742_v48  ;;  %v5130_v38 = vld [vmem:[#allocation8_spill] sm:$0xff] }
 0x133   : > { %v1708_v46 = vsel %vm970_vm8, %v1699_v62, %v5124_v58  ;;  %3311 = vmatpush1.bf16.msra.mxu0 %v1948_v35  ;;  %3281 = vmatprep.subr.bf16.mxu1 %v4025_v28  ;;  %v3733_v4 = vcombine.low %v2349_v41, %v2349_v41  ;;  %v1858_v56 = vmul.bf16 %v4867_v19, %v1807_v59  ;;  %v2385_v19 = vshrl.u32 %v3734_v50, 16  ;;  %v5132_v59 = vld [vmem:[#allocation11_spill] sm:$0xff] }
 0x134   : > { %3312 = vmatprep.subr.bf16.mxu0 %v1859_v60  ;;  %v1341_v2 = vsel %vm602_vm4, %v5125_v40, %v1339_v8  ;;  %v4982_v24 = vrot.slane %v1204_v5, %v4408_v18  ;;  %v4985_v11 = vrot.slane %v2465_v53, %v4408_v18  ;;  %v1397_v23 = vmul.bf16 %v4927_v30, %v1342_v15  ;;  %v5128_v30 = vld [vmem:[#allocation9_spill] sm:$0xff]  ;;  %v5131_v53 = vld [vmem:[#allocation22_spill] sm:$0xff] }
 0x135   : > { %v1253_v1 = vpop.permute.xlu0 %1252  ;;  %v1702_v3 = vsel %vm970_vm8, %v5126_v26, %v1699_v62  ;;  %v1753_v25 = vmul.bf16 %v1749_v21, %v1708_v46  ;;  %v1115_v51 = vpack.i.b16 %v4970_v34, %v4970_v34  ;;  %v1122_v63 = vpack.i.b16 %v3618_v13, %v3618_v13  ;;  %v5133_v15 = vld [vmem:[#allocation21_spill] sm:$0xff] }
 0x136   : > { %v1609_v0 = vpop.permute.xlu1 %1608  ;;  %3282 = vmatpush2.bf16.msra.mxu1 %v4026_v47  ;;  %v1256_v52 = vsel %vm514_vm5, %v1253_v1, %v5127_v42  ;;  %v1396_v61 = vmul.bf16 %v4914_v37, %v1341_v2  ;;  %v1217_v36 = vrot.slane %v1212_v9, %v4408_v18  ;;  %v2477_v21 = vrot.slane %v2472_v49, %v4408_v18  ;;  %v5134_v9 = vld [vmem:[#allocation10_spill] sm:$0xff]  ;;  %v5135_v2 = vld [vmem:[#allocation13_spill] sm:$0xff]  ;;  %v5136_v47 = vld [vmem:[#allocation23_spill] sm:$0xff] }
 0x137   : > { %v1618_v17 = vsel %vm878_vm2, %v1609_v0, %v5128_v30  ;;  %3313 = vmatpush1.bf16.msra.mxu0 %v1858_v56  ;;  %3283 = vmatprep.subr.bf16.mxu1 %v1397_v23  ;;  %v2377_v35 = vshrl.u32 %v3733_v4, 16  ;;  %v1752_v20 = vmul.bf16 %v4919_v29, %v1702_v3  ;;  %v1255_v10 = vsel %vm514_vm5, %v5129_v55, %v1253_v1 }
 0x138   : > { %3314 = vmatprep.subr.bf16.mxu0 %v1753_v25  ;;  %v3606_v39 = vcombine.high %v983_v7, %v983_v7  ;;  %v3726_v41 = vcombine.high %v2263_v12, %v2263_v12  ;;  %v1307_v57 = vmul.bf16 %v4962_v45, %v1256_v52  ;;  %v1612_v37 = vsel %vm878_vm2, %v5130_v38, %v1609_v0  ;;  %v5137_v52 = vld [vmem:[#allocation12_spill] sm:$0xff] }
 0x139   : > { %v1163_v22 = vpop.permute.xlu0 %1162  ;;  %v1667_v48 = vmul.bf16 %v1663_v33, %v1618_v17  ;;  %v2386_v5 = vpack.i.b16 %v2385_v19, %v2385_v19  ;;  %v1127_v60 = vrot.slane %v1122_v63, %v4408_v18  ;;  %v3605_v62 = vcombine.low %v983_v7, %v983_v7  ;;  %v5138_v63 = vld [vmem:[#allocation15_spill] sm:$0xff] }
 0x13a   : > { %v2427_v8 = vpop.permute.xlu1 %2426  ;;  %3284 = vmatpush2.bf16.msra.mxu1 %v1396_v61  ;;  %v1166_v44 = vsel %vm422_vm6, %v1163_v22, %v5131_v53  ;;  %v1306_v34 = vmul.bf16 %v4959_v27, %v1255_v10  ;;  %v2378_v45 = vpack.i.b16 %v2377_v35, %v2377_v35  ;;  %v3725_v50 = vcombine.low %v2263_v12, %v2263_v12  ;;  %v5139_v10 = vld [vmem:[#allocation14_spill] sm:$0xff] }
 0x13b   : > { %v2436_v29 = vsel %vm970_vm8, %v2427_v8, %v5132_v59  ;;  %3315 = vmatpush1.bf16.msra.mxu0 %v1752_v20  ;;  %3285 = vmatprep.subr.bf16.mxu1 %v1307_v57  ;;  %v1666_v54 = vmul.bf16 %v4965_v14, %v1612_v37  ;;  %v1165_v58 = vsel %vm422_vm6, %v5133_v15, %v1163_v22 }
 0x13c   : > { %3316 = vmatprep.subr.bf16.mxu0 %v1667_v48  ;;  %v1016_v33 = vpack.i.b16 %v3606_v39, %v3606_v39  ;;  %v2296_v13 = vpack.i.b16 %v3726_v41, %v3726_v41  ;;  %v1221_v28 = vmul.bf16 %v1217_v36, %v1166_v44  ;;  %v2430_v49 = vsel %vm970_vm8, %v5134_v9, %v2427_v8 }
 0x13d   : > { %v1077_v46 = vpop.permute.xlu0 %1076  ;;  %v2481_v4 = vmul.bf16 %v2477_v21, %v2436_v29  ;;  %v2391_v56 = vrot.slane %v2386_v5, %v4298_v32  ;;  %v1120_v40 = vrot.slane %v1115_v51, %v4408_v18  ;;  %v1009_v23 = vpack.i.b16 %v3605_v62, %v3605_v62 }
 0x13e   : > { %v2337_v27 = vpop.permute.xlu1 %2336  ;;  %3286 = vmatpush2.bf16.msra.mxu1 %v1306_v34  ;;  %v1080_v14 = vsel %vm334_vm7, %v1077_v46, %v4787_v16  ;;  %v1220_v26 = vmul.bf16 %v4982_v24, %v1165_v58  ;;  %v2383_v3 = vrot.slane %v2378_v45, %v4298_v32  ;;  %v2289_v25 = vpack.i.b16 %v3725_v50, %v3725_v50 }
 0x13f   : > { %v2346_v1 = vsel %vm878_vm2, %v2337_v27, %v5135_v2  ;;  %3317 = vmatpush1.bf16.msra.mxu0 %v1666_v54  ;;  %3287 = vmatprep.subr.bf16.mxu1 %v1221_v28  ;;  %v2480_v0 = vmul.bf16 %v4985_v11, %v2430_v49  ;;  %v1079_v19 = vsel %vm334_vm7, %v5136_v47, %v1077_v46 }
 0x140   : > { %3328 = vmatprep.subr.bf16.mxu0 %v2481_v4  ;;  %v1021_v7 = vrot.slane %v1016_v33, %v4408_v18  ;;  %v2301_v12 = vrot.slane %v2296_v13, %v4298_v32  ;;  %v1131_v42 = vmul.bf16 %v1127_v60, %v1080_v14  ;;  %v2340_v30 = vsel %vm878_vm2, %v5137_v52, %v2337_v27 }
 0x141   : > { %v969_v16 = vpop.permute.xlu0 %968  ;;  %v2395_v24 = vmul.bf16 %v2391_v56, %v2346_v1  ;;  %v1130_v61 = vmul.bf16 %v1120_v40, %v1079_v19  ;;  %v1014_v36 = vrot.slane %v1009_v23, %v4408_v18  ;;  %v2394_v21 = vmul.bf16 %v2383_v3, %v2340_v30  ;;  %v5140_v18 = vld [vmem:[#allocation16_spill] sm:$0xff] }
 0x142   : > { %v980_v17 = vsel %vm970_vm8, %v969_v16, %v4823_v6  ;;  %v2251_v51 = vpop.permute.xlu1 %2250  ;;  %3288 = vmatpush2.bf16.msra.mxu1 %v1220_v26  ;;  %v973_v35 = vsel %vm970_vm8, %v4816_v31, %v969_v16  ;;  %v2294_v55 = vrot.slane %v2289_v25, %v4298_v32 }
 0x143   : > { %v2260_v11 = vsel %vm790_vm3, %v2251_v51, %v5138_v63  ;;  %3329 = vmatpush2.bf16.msra.mxu0 %v2480_v0  ;;  %3289 = vmatprep.subr.bf16.mxu1 %v1131_v42  ;;  %v1025_v20 = vmul.bf16 %v1021_v7, %v980_v17  ;;  %v2254_v6 = vsel %vm790_vm3, %v5139_v10, %v2251_v51 }
 0x144   : > { %3330 = vmatprep.subr.bf16.mxu0 %v2395_v24  ;;  %v2305_v22 = vmul.bf16 %v2301_v12, %v2260_v11  ;;  %v1024_v39 = vmul.bf16 %v1014_v36, %v973_v35  ;;  %v2304_v41 = vmul.bf16 %v2294_v55, %v2254_v6 }
 0x146   : > { %3290 = vmatpush2.bf16.msra.mxu1 %v1130_v61 }
 0x147   : > { %3331 = vmatpush2.bf16.msra.mxu0 %v2394_v21  ;;  %3291 = vmatprep.subr.bf16.mxu1 %v1025_v20 }
 0x148   : > { %3332 = vmatprep.subr.bf16.mxu0 %v2305_v22 }
 0x14a   : > { %3292 = vmatpush2.bf16.msra.mxu1 %v1024_v39 }
 0x14b   : > { %3333 = vmatpush2.bf16.msra.mxu0 %v2304_v41 }
 0x14d   : > { %3294 = vmatmul.mubr.bf16.vlgmr.msra.gmra.mxu1 %v4780_v43 }
 0x14e   : > { %3335 = vmatmul.mubr.bf16.vlgmr.msra.gmra.mxu0 %v5140_v18  ;;  %v2620_v37 = vpop.permute.xlu0 %2619 }
 0x1bc   : > { %v3254_v31 = vpop.f32.mrf.mxu1 }
 0x1be   : > { %v3256_v57 = vpop.f32.mrf.mxu1 }
 0x1c0   : > { %v3258_v32 = vpop.f32.mrf.mxu1 }
 0x1c2   : > { %v3259_v38 = vpop.f32.mrf.mxu1 }
 0x1e1   : > { %v3213_v48 = vpop.f32.mrf.mxu0 }
 0x1e2   : > { %v3214_v8 = vadd.f32 %v3213_v48, %v2620_v37 }
 0x1e3   : > { %v3215_v5 = vpop.f32.mrf.mxu0 }
 0x1e4   : > { %v3255_v53 = vadd.f32 %v3254_v31, %v3214_v8  ;;  %v3216_v44 = vadd.f32 %v3215_v5, %v2620_v37 }
 0x1e5   : > { %v3217_v59 = vpop.f32.mrf.mxu0 }
 0x1e6   : > { %v3347_v29 = vmul.f32 0.01, %v3255_v53  ;;  %v3257_v60 = vadd.f32 %v3256_v57, %v3216_v44  ;;  %vm3343_vm9 = vcmp.ge.f32.partialorder %v3255_v53, 0.0 }
 0x1e7   : > { %v3218_v62 = vpop.f32.mrf.mxu0 }
 0x1e8   : > { %vm3344_vm10 = vcmp.ge.f32.partialorder %v3257_v60, 0.0  ;;  %v3348_v43 = vmul.f32 0.01, %v3257_v60  ;;  %v3351_v34 = vsel %vm3343_vm9, %v3255_v53, %v3347_v29 }
 0x1e9   : > { %v3379_v40 = vmul.f32 %v3351_v34, %v3351_v34 }
 0x1ea   : > { %v3352_v45 = vsel %vm3344_vm10, %v3257_v60, %v3348_v43 }
 0x1eb   : > { %v3866_v50 = vpack.c.bf16 %v3352_v45, %v3351_v34  ;;  %v3380_v9 = vmul.f32 %v3352_v45, %v3352_v45  ;;  %v3373_v2 = vadd.f32 %v3352_v45, %v3351_v34 }
 0x1ed   : > { %3371 = vst [vmem:[%s5054_s9] sm:$0xff] %v3866_v50  ;;  %v3383_v0 = vadd.f32 %v3380_v9, %v3379_v40 }
 0x20d   : > { %v3295_v54 = vpop.f32.mrf.mxu1 }
 0x20e   : > { %v3296_v15 = vadd.f32 %v3295_v54, %v2620_v37  ;;  %v3336_v58 = vpop.f32.mrf.mxu0 }
 0x20f   : > { %v3297_v46 = vpop.f32.mrf.mxu1 }
 0x210   : > { %v3337_v33 = vadd.f32 %v3336_v58, %v3296_v15  ;;  %v3298_v13 = vadd.f32 %v3297_v46, %v2620_v37  ;;  %v3338_v28 = vpop.f32.mrf.mxu0 }
 0x211   : > { %v3299_v49 = vpop.f32.mrf.mxu1 }
 0x212   : > { %vm3345_vm11 = vcmp.ge.f32.partialorder %v3337_v33, 0.0  ;;  %v3349_v4 = vmul.f32 0.01, %v3337_v33  ;;  %v3339_v56 = vadd.f32 %v3338_v28, %v3298_v13  ;;  %v3340_v27 = vpop.f32.mrf.mxu0 }
 0x213   : > { %v3300_v14 = vpop.f32.mrf.mxu1 }
 0x214   : > { %v3353_v1 = vsel %vm3345_vm11, %v3337_v33, %v3349_v4  ;;  %vm3346_vm12 = vcmp.ge.f32.partialorder %v3339_v56, 0.0  ;;  %v3350_v23 = vmul.f32 0.01, %v3339_v56  ;;  %v3341_v26 = vpop.f32.mrf.mxu0 }
 0x215   : > { %v3381_v3 = vmul.f32 %v3353_v1, %v3353_v1  ;;  %v3374_v25 = vadd.f32 %v3373_v2, %v3353_v1 }
 0x216   : > { %v3354_v47 = vsel %vm3346_vm12, %v3339_v56, %v3350_v23 }
 0x217   : > { %v3375_v19 = vadd.f32 %v3374_v25, %v3354_v47  ;;  %v3867_v7 = vpack.c.bf16 %v3354_v47, %v3353_v1  ;;  %v3382_v16 = vmul.f32 %v3354_v47, %v3354_v47  ;;  %v3384_v12 = vadd.f32 %v3383_v0, %v3381_v3 }
 0x219   : > { %3376 = vadd.xlane.f32.xlu1 %v3375_v19  ;;  %3372 = vst [vmem:[%s5054_s9 + $0x8] sm:$0xff] %v3867_v7  ;;  %v3385_v42 = vadd.f32 %v3384_v12, %v3382_v16 }
 0x21b   : > { %3386 = vadd.xlane.f32.xlu0 %v3385_v42 }
 0x2a2   : > { %v3377_v52 = vpop.xlane.xlu1 %3376 }
 0x2a3   : > { %3378 = vst.msk [vmem:[%s304_s26] sm:$0xff] %vm602_vm4, %v3377_v52 }
 0x2a4   : > { %v3387_v30 = vpop.xlane.xlu0 %3386 }
 0x2a5   : > { %3389 = vst.msk [vmem:[%s304_s26] sm:$0xff] %vm3388_vm13, %v3387_v30 }
 0x2a6 PF: > { %s16_s20 = sadd.s32 1, %s4049_s20   ;;  %s5141_s18 = smov %s4045_s19 }
 0x2a7   : > { %p13_p5 = scmp.ge.s32.totalorder %s16_s20, 4   ;;  %s5142_s19 = smov %s5144_s21 }
 0x2a9   :  { %15 = sbr.rel (!%p13_p5) target bundleno = 2 (0x2), region = 81 }

// kernel: stacked_block_forward.4
= control target key start
LH: loop header
LB: loop body
LE: loop exit
PB: predicated region body
PF: predicated region fallthrough
CT: control target
= control target key end

     0   :  { %s4072_s18 = smov 0   ;;  %s4074_s19 = smov 0   ;;  %s5056_s0 = inlined_call_operand.vmem [shape: bf16[2,48,512], index: 0, kind: input, shape index: {}]   ;;  %s5057_s1 = inlined_call_operand.vmem [shape: bf16[9,512], index: 1, kind: input, shape index: {}]   ;;  %s5058_s2 = inlined_call_operand.vmem [shape: bf16[8,432], index: 2, kind: input, shape index: {}]   ;;  %s5059_s3 = inlined_call_operand.vmem [shape: f32[8,1], index: 3, kind: input, shape index: {}]   ;;  %s5060_s4 = inlined_call_operand.vmem [shape: f32[2,8,512], index: 4, kind: output, shape index: {0}]   ;;  %s5061_s5 = inlined_call_operand.vmem [shape: f32[2,1,8,2], index: 5, kind: output, shape index: {1}]  }
   0x1   :  { %s4076_s20 = smov 0  }
   0x2 LB: > { %s28_s21 = sadd.s32 1, %s4027_s19  ;;  %p3524_p0 = scmp.ge.s32.totalorder %s4031_s20, 1  ;;  %s4031_s20 = sphi %s4076_s20, %s16_s20   ;;  %s4027_s19 = sphi %s4074_s19, %s5126_s19   ;;  %s4023_s18 = sphi %s4072_s18, %s5125_s18  }
   0x3   : > { %p30_p1 = scmp.ge.s32.totalorder %s28_s21, 2  ;;  %p224_p2 = scmp.lt.s32.totalorder %s4031_s20, 3 }
   0x5   : > { %s5128_s21 = smov (%p30_p1, %s28_s21), 0  ;;  %p225_p3 = pnand %p3524_p0, %p224_p2 }
   0x7   : > { %228 = sbr.rel (%p225_p3) target bundleno = 678 (0x2a6), region = 36 }
   0xc   : > { %p273_p4 = scmp.lt.s32.totalorder %s4023_s18, 1  ;;  %s4033_s26 = smov 127   ;;  %v2172_v11 = vld [vmem:[%s5057_s1] sm:$0x44]  ;;  %v4241_v12 = vld [vmem:[%s5058_s2 + $0x8] sm:$0xff]  ;;  %v361_v15 = vlaneseq  ;;  %vm3175_vm0 = vcmask 392192  }
   0xd   : > { %s4034_s27 = smov 120   ;;  %s4035_s28 = smov 121   ;;  %v3702_v13 = vcombine.high %v2172_v11, %v2172_v11  ;;  %v4247_v14 = vcombine.high %v4241_v12, %v4241_v12  ;;  %v3701_v16 = vcombine.low %v2172_v11, %v2172_v11  ;;  %v890_v17 = vld [vmem:[%s5057_s1] sm:$0x88]  ;;  %vm698_vm1 = vcmask 1039360  }
   0xe   : > { %s5130_s18 = smov (!%p273_p4, %s4023_s18), 1  ;;  %s4036_s29 = smov 1   ;;  %v3582_v19 = vcombine.high %v890_v17, %v890_v17  ;;  %v4260_v20 = vshrl.u32 %v361_v15, 7  ;;  %v3581_v22 = vcombine.low %v890_v17, %v890_v17  ;;  %v802_v29 = vld [vmem:[%s5057_s1] sm:$0x88]  ;;  %vm878_vm2 = vcmask 982016  }
   0xf   : > { %s3850_s22 = smul.u32 96, %s5130_s18  ;;  %s4037_s30 = smov 7   ;;  %3845 = vmatprep.mubr.msk.bf16.mxu1 %vm3175_vm0, %v4247_v14  ;;  %v2193_v18 = vshrl.u32 %v3702_v13, 16  ;;  %v2185_v21 = vshrl.u32 %v3701_v16, 16  ;;  %v3574_v36 = vcombine.high %v802_v29, %v802_v29  ;;  %v2078_v38 = vld [vmem:[%s5057_s1] sm:$0x22]  ;;  %v3573_v45 = vcombine.low %v802_v29, %v802_v29 }
  0x10   : > { %s4038_s6 = smov 8   ;;  %s4039_s7 = smov 9   ;;  %v911_v24 = vshrl.u32 %v3582_v19, 16  ;;  %v4267_v25 = vsub.s32 2, %v4260_v20  ;;  %v903_v27 = vshrl.u32 %v3581_v22, 16  ;;  %v4280_v32 = vsub.s32 3, %v4260_v20 }
  0x11   : > { %s4096_s25 = scalar_lea.vmem %s5056_s0, %s3850_s22  ;;  %s4040_s8 = smov 119   ;;  %v2194_v23 = vpack.i.b16 %v2193_v18, %v2193_v18  ;;  %v2186_v26 = vpack.i.b16 %v2185_v21, %v2185_v21  ;;  %v3694_v46 = vcombine.high %v2078_v38, %v2078_v38  ;;  %v822_v48 = vpack.i.b16 %v3574_v36, %v3574_v36  ;;  %v710_v52 = vld [vmem:[%s5057_s1] sm:$0x44] }
  0x12   : > { %v4099_v0 = vld [vmem:[%s4096_s25 + $0x44] ss:$16 sps:$4 sm:$0xff]   ;;  %v4102_v1 = vld [vmem:[%s4096_s25 + $0x40] ss:$16 sps:$4 sm:$0xff]   ;;  %v4107_v2 = vld [vmem:[%s4096_s25 + $0x48] ss:$16 sps:$4 sm:$0xff]   ;;  %v912_v34 = vpack.i.b16 %v911_v24, %v911_v24  ;;  %v904_v37 = vpack.i.b16 %v903_v27, %v903_v27  ;;  %v3693_v50 = vcombine.low %v2078_v38, %v2078_v38  ;;  %v815_v57 = vpack.i.b16 %v3573_v45, %v3573_v45 }
  0x13   : > { %2156 = vrot.lane.b32.xlu0 %v4099_v0, %s4033_s26  ;;  %2154 = vrot.lane.b32.xlu1 %v4102_v1, %s4033_s26  ;;  %v4112_v3 = vld [vmem:[%s4096_s25 + $0x4] ss:$16 sps:$4 sm:$0xff]   ;;  %v4117_v4 = vld [vmem:[%s4096_s25 + $0x8] ss:$16 sps:$4 sm:$0xff]   ;;  %v2199_v33 = vrot.slane %v2194_v23, %v4267_v25  ;;  %v2191_v35 = vrot.slane %v2186_v26, %v4267_v25  ;;  %vm790_vm3 = vcmask 990208   ;;  %v2099_v58 = vshrl.u32 %v3694_v46, 16 }
  0x14   : > { %v4122_v5 = vld [vmem:[%s4096_s25] ss:$16 sps:$4 sm:$0xff]   ;;  %v4137_v6 = vld [vmem:[%s4096_s25 + $0x4c] ss:$16 sps:$4 sm:$0xff]   ;;  %v4181_v8 = vld [vmem:[%s4096_s25 + $0x24] ss:$16 sps:$4 sm:$0xff]   ;;  %v917_v44 = vrot.slane %v912_v34, %v4280_v32  ;;  %v909_v49 = vrot.slane %v904_v37, %v4280_v32  ;;  %v827_v59 = vrot.slane %v822_v48, %v4280_v32  ;;  %v3566_v62 = vcombine.high %v710_v52, %v710_v52 }
  0x15   : > { %v4164_v7 = vld [vmem:[%s4096_s25 + $0xc] ss:$16 sps:$4 sm:$0xff]   ;;  %v4186_v9 = vld [vmem:[%s4096_s25 + $0x28] ss:$16 sps:$4 sm:$0xff]   ;;  %v4191_v10 = vld [vmem:[%s4096_s25 + $0x20] ss:$16 sps:$4 sm:$0xff]   ;;  %v3565_v13 = vcombine.low %v710_v52, %v710_v52  ;;  %v820_v16 = vrot.slane %v815_v57, %v4280_v32  ;;  %v2100_v17 = vpack.i.b16 %v2099_v58, %v2099_v58 }
  0x16   : > { %v4277_v31 = vld [vmem:[%s4096_s25 + $0x2c] ss:$16 sps:$4 sm:$0xff]   ;;  %v2091_v61 = vshrl.u32 %v3693_v50, 16  ;;  %v4322_v15 = vsub.s32 1, %v4260_v20  ;;  %v731_v21 = vshrl.u32 %v3566_v62, 16  ;;  %vm602_vm4 = vcmask 7168  }
  0x17   : > { %2158 = vrot.lane.b32.xlu0 %v4107_v2, %s4033_s26  ;;  %872 = vrot.lane.b32.xlu1 %v4112_v3, %s4034_s27  ;;  %v723_v24 = vshrl.u32 %v3565_v13, 16  ;;  %v4366_v50 = vld [vmem:[%s5058_s2] sm:$0xff]  ;;  %vm514_vm5 = vcmask 56320   ;;  %vm422_vm6 = vcmask 64512   ;;  %vm334_vm7 = vcmask 72704   ;;  %s3528_s10 = sshll.u32 %s5130_s18, 3 }
  0x18   : > { %v2092_v19 = vpack.i.b16 %v2091_v61, %v2091_v61  ;;  %v2105_v27 = vrot.slane %v2100_v17, %v4322_v15  ;;  %v732_v29 = vpack.i.b16 %v731_v21, %v731_v21  ;;  %vm970_vm8 = vcmask 973824  }
  0x19   : > { %v724_v38 = vpack.i.b16 %v723_v24, %v723_v24  ;;  %vm3374_vm13 = vcmask 15368  }
  0x1b   : > { %874 = vrot.lane.b32.xlu0 %v4117_v4, %s4034_s27  ;;  %870 = vrot.lane.b32.xlu1 %v4122_v5, %s4034_s27 }
  0x1f   : > { %784 = vrot.lane.b32.xlu0 %v4112_v3, %s4035_s28  ;;  %786 = vrot.lane.b32.xlu1 %v4117_v4, %s4035_s28 }
  0x23   : > { %782 = vrot.lane.b32.xlu0 %v4122_v5, %s4035_s28  ;;  %2062 = vrot.lane.b32.xlu1 %v4102_v1, %s4036_s29 }
  0x27   : > { %2064 = vrot.lane.b32.xlu0 %v4099_v0, %s4036_s29  ;;  %2060 = vrot.lane.b32.xlu1 %v4137_v6, %s4036_s29 }
  0x2b   : > { %692 = vrot.lane.b32.xlu0 %v4112_v3, %s4033_s26  ;;  %694 = vrot.lane.b32.xlu1 %v4117_v4, %s4033_s26 }
  0x2f   : > { %690 = vrot.lane.b32.xlu0 %v4122_v5, %s4033_s26  ;;  %1976 = vrot.lane.b32.xlu1 %v4102_v1, %s4037_s30 }
  0x33   : > { %1978 = vrot.lane.b32.xlu0 %v4099_v0, %s4037_s30  ;;  %1974 = vrot.lane.b32.xlu1 %v4137_v6, %s4037_s30 }
  0x37   : > { %1886 = vrot.lane.b32.xlu0 %v4102_v1, %s4038_s6  ;;  %1888 = vrot.lane.b32.xlu1 %v4099_v0, %s4038_s6 }
  0x3b   : > { %1884 = vrot.lane.b32.xlu0 %v4137_v6, %s4038_s6  ;;  %596 = vrot.lane.b32.xlu1 %v4122_v5, %s4036_s29 }
  0x3f   : > { %598 = vrot.lane.b32.xlu0 %v4112_v3, %s4036_s29  ;;  %594 = vrot.lane.b32.xlu1 %v4164_v7, %s4036_s29 }
  0x43   : > { %1800 = vrot.lane.b32.xlu0 %v4102_v1, %s4039_s7  ;;  %1802 = vrot.lane.b32.xlu1 %v4099_v0, %s4039_s7 }
  0x47   : > { %1787 = vrot.lane.b32.xlu0 %v4137_v6, %s4039_s7  ;;  %508 = vrot.lane.b32.xlu1 %v4122_v5, %s4037_s30 }
  0x4b   : > { %510 = vrot.lane.b32.xlu0 %v4112_v3, %s4037_s30  ;;  %506 = vrot.lane.b32.xlu1 %v4164_v7, %s4037_s30 }
  0x4f   : > { %1694 = vrot.lane.b32.xlu0 %v4181_v8, %s4040_s8  ;;  %1696 = vrot.lane.b32.xlu1 %v4186_v9, %s4040_s8 }
  0x53   : > { %1692 = vrot.lane.b32.xlu0 %v4191_v10, %s4040_s8  ;;  %416 = vrot.lane.b32.xlu1 %v4122_v5, %s4038_s6 }
  0x57   : > { %418 = vrot.lane.b32.xlu0 %v4112_v3, %s4038_s6  ;;  %414 = vrot.lane.b32.xlu1 %v4164_v7, %s4038_s6 }
  0x5b   : > { %1604 = vrot.lane.b32.xlu0 %v4181_v8, %s4034_s27  ;;  %1606 = vrot.lane.b32.xlu1 %v4186_v9, %s4034_s27 }
  0x5f   : > { %1602 = vrot.lane.b32.xlu0 %v4191_v10, %s4034_s27  ;;  %328 = vrot.lane.b32.xlu1 %v4122_v5, %s4039_s7 }
  0x63   : > { %330 = vrot.lane.b32.xlu0 %v4112_v3, %s4039_s7  ;;  %315 = vrot.lane.b32.xlu1 %v4164_v7, %s4039_s7 }
  0x67   : > { %2422 = vrot.lane.b32.xlu0 %v4099_v0, %s4040_s8  ;;  %2424 = vrot.lane.b32.xlu1 %v4107_v2, %s4040_s8 }
  0x6b   : > { %2420 = vrot.lane.b32.xlu0 %v4102_v1, %s4040_s8  ;;  %1518 = vrot.lane.b32.xlu1 %v4181_v8, %s4035_s28 }
  0x6f   : > { %1520 = vrot.lane.b32.xlu0 %v4186_v9, %s4035_s28  ;;  %1516 = vrot.lane.b32.xlu1 %v4191_v10, %s4035_s28 }
  0x73   : > { %2332 = vrot.lane.b32.xlu0 %v4099_v0, %s4034_s27  ;;  %2334 = vrot.lane.b32.xlu1 %v4107_v2, %s4034_s27 }
  0x77   : > { %2330 = vrot.lane.b32.xlu0 %v4102_v1, %s4034_s27  ;;  %1428 = vrot.lane.b32.xlu1 %v4181_v8, %s4033_s26 }
  0x7b   : > { %1430 = vrot.lane.b32.xlu0 %v4186_v9, %s4033_s26  ;;  %1426 = vrot.lane.b32.xlu1 %v4191_v10, %s4033_s26 }
  0x7f   : > { %2246 = vrot.lane.b32.xlu0 %v4099_v0, %s4035_s28  ;;  %2248 = vrot.lane.b32.xlu1 %v4107_v2, %s4035_s28 }
  0x83   : > { %2244 = vrot.lane.b32.xlu0 %v4102_v1, %s4035_s28  ;;  %876 = vrot.lane.b32.xlu1 %v4164_v7, %s4034_s27 }
  0x85   : > { %v2157_v28 = vpop.permute.xlu0 %2156  ;;  %v4272_v30 = vpop.permute.xlu1 %2154 }
  0x86   : > { %v2162_v39 = vsel %vm698_vm1, %v4272_v30, %v2157_v28 }
  0x87   : > { %1334 = vrot.lane.b32.xlu0 %v4191_v10, %s4036_s29  ;;  %1336 = vrot.lane.b32.xlu1 %v4181_v8, %s4036_s29  ;;  %v2216_v47 = vmul.bf16 %v2191_v35, %v2162_v39  ;;  %v1902_v35 = vld [vmem:[%s5057_s1] sm:$0x11] }
  0x88   : > { %v3678_v46 = vcombine.high %v1902_v35, %v1902_v35 }
  0x89   : > { %v4291_v40 = vpop.permute.xlu0 %2158  ;;  %v873_v41 = vpop.permute.xlu1 %872 }
  0x8a   : > { %v2163_v42 = vsel %vm698_vm1, %v2157_v28, %v4291_v40  ;;  %v2097_v28 = vrot.slane %v2092_v19, %v4322_v15 }
  0x8b   : > { %1332 = vrot.lane.b32.xlu0 %v4277_v31, %s4036_s29  ;;  %v2217_v43 = vmul.bf16 %v2199_v33, %v2163_v42  ;;  %788 = vrot.lane.b32.xlu1 %v4164_v7, %s4035_s28  ;;  %v1992_v33 = vld [vmem:[%s5057_s1] sm:$0x22] }
  0x8c   : > { %v3686_v42 = vcombine.high %v1992_v33, %v1992_v33  ;;  %v3685_v45 = vcombine.low %v1992_v33, %v1992_v33 }
  0x8d   : > { %3220 = vmatprep.subr.bf16.mxu1 %v2217_v43  ;;  %v4301_v51 = vpop.permute.xlu0 %874  ;;  %v4306_v53 = vpop.permute.xlu1 %870 }
  0x8e   : > { %3221 = vmatpush1.bf16.msra.mxu1 %v2216_v47  ;;  %v880_v54 = vsel %vm878_vm2, %v873_v41, %v4301_v51  ;;  %v879_v55 = vsel %vm878_vm2, %v4306_v53, %v873_v41  ;;  %v2005_v58 = vpack.i.b16 %v3685_v45, %v3685_v45 }
  0x8f   : > { %1248 = vrot.lane.b32.xlu0 %v4191_v10, %s4037_s30  ;;  %v935_v56 = vmul.bf16 %v917_v44, %v880_v54  ;;  %3222 = vmatprep.subr.bf16.mxu1 %v4099_v0  ;;  %v934_v60 = vmul.bf16 %v909_v49, %v879_v55  ;;  %v737_v44 = vrot.slane %v732_v29, %v4267_v25 }
  0x90   : > { %1250 = vrot.lane.b32.xlu1 %v4181_v8, %s4037_s30  ;;  %v729_v49 = vrot.slane %v724_v38, %v4267_v25  ;;  %v2012_v54 = vpack.i.b16 %v3686_v42, %v3686_v42  ;;  %v3677_v55 = vcombine.low %v1902_v35, %v1902_v35  ;;  %v2010_v19 = vrot.slane %v2005_v58, %v4322_v15 }
  0x91   : > { %v785_v63 = vpop.permute.xlu0 %784  ;;  %3179 = vmatprep.subr.bf16.mxu0 %v935_v56  ;;  %v4318_v11 = vpop.permute.xlu1 %786  ;;  %v4374_v56 = vcombine.high %v4366_v50, %v4366_v50 }
  0x92   : > { %3180 = vmatpush1.bf16.msra.mxu0 %v934_v60  ;;  %3223 = vmatpush1.bf16.msra.mxu1 %v4102_v1  ;;  %v792_v0 = vsel %vm790_vm3, %v785_v63, %v4318_v11  ;;  %v614_v60 = vld [vmem:[%s5057_s1] sm:$0x22] }
  0x93   : > { %1246 = vrot.lane.b32.xlu0 %v4277_v31, %s4037_s30  ;;  %v843_v18 = vmul.bf16 %v827_v59, %v792_v0  ;;  %v1923_v59 = vshrl.u32 %v3678_v46, 16  ;;  %3211 = vmatprep.mubr.bf16.mxu0 %v4374_v56  ;;  %v2017_v0 = vrot.slane %v2012_v54, %v4322_v15  ;;  %v3558_v17 = vcombine.high %v614_v60, %v614_v60 }
  0x94   : > { %696 = vrot.lane.b32.xlu1 %v4164_v7, %s4033_s26 }
  0x95   : > { %v4331_v1 = vpop.permute.xlu0 %782  ;;  %3181 = vmatprep.subr.bf16.mxu0 %v843_v18  ;;  %v2063_v23 = vpop.permute.xlu1 %2062  ;;  %v4390_v18 = vsub.s32 0, %v4260_v20  ;;  %v1924_v21 = vpack.i.b16 %v1923_v59, %v1923_v59  ;;  %v635_v29 = vshrl.u32 %v3558_v17, 16  ;;  %v526_v59 = vld [vmem:[%s5057_s1] sm:$0x22] }
  0x96   : > { %v791_v22 = vsel %vm790_vm3, %v4331_v1, %v785_v63 }
  0x97   : > { %v842_v26 = vmul.bf16 %v820_v16, %v791_v22  ;;  %1158 = vrot.lane.b32.xlu0 %v4191_v10, %s4038_s6  ;;  %v1915_v16 = vshrl.u32 %v3677_v55, 16  ;;  %v3557_v22 = vcombine.low %v614_v60, %v614_v60  ;;  %v1929_v35 = vrot.slane %v1924_v21, %v4390_v18 }
  0x98   : > { %1160 = vrot.lane.b32.xlu1 %v4181_v8, %s4038_s6  ;;  %v3549_v21 = vcombine.low %v526_v59, %v526_v59 }
  0x99   : > { %v4344_v34 = vpop.permute.xlu0 %2064  ;;  %3182 = vmatpush1.bf16.msra.mxu0 %v842_v26  ;;  %v4351_v37 = vpop.permute.xlu1 %2060 }
  0x9a   : > { %v2068_v36 = vsel %vm602_vm4, %v2063_v23, %v4344_v34  ;;  %v2076_v41 = vsel %vm602_vm4, %v4351_v37, %v2063_v23 }
  0x9b   : > { %v2123_v39 = vmul.bf16 %v2105_v27, %v2068_v36  ;;  %1156 = vrot.lane.b32.xlu0 %v4277_v31, %s4038_s6  ;;  %v2122_v43 = vmul.bf16 %v2097_v28, %v2076_v41  ;;  %v1916_v28 = vpack.i.b16 %v1915_v16, %v1915_v16  ;;  %v627_v36 = vshrl.u32 %v3557_v22, 16 }
  0x9c   : > { %1072 = vrot.lane.b32.xlu1 %v4191_v10, %s4039_s7  ;;  %v3550_v16 = vcombine.high %v526_v59, %v526_v59 }
  0x9d   : > { %v693_v47 = vpop.permute.xlu0 %692  ;;  %3224 = vmatprep.subr.bf16.mxu1 %v2123_v39  ;;  %v4360_v48 = vpop.permute.xlu1 %694  ;;  %v1921_v42 = vrot.slane %v1916_v28, %v4390_v18 }
  0x9e   : > { %3225 = vmatpush1.bf16.msra.mxu1 %v2122_v43  ;;  %v700_v52 = vsel %vm698_vm1, %v693_v47, %v4360_v48  ;;  %v636_v43 = vpack.i.b16 %v635_v29, %v635_v29  ;;  %v546_v29 = vpack.i.b16 %v3550_v16, %v3550_v16 }
  0x9f   : > { %1074 = vrot.lane.b32.xlu0 %v4181_v8, %s4039_s7  ;;  %v755_v57 = vmul.bf16 %v737_v44, %v700_v52 }
  0xa0   : > { %1059 = vrot.lane.b32.xlu1 %v4277_v31, %s4039_s7  ;;  %v641_v54 = vrot.slane %v636_v43, %v4322_v15 }
  0xa1   : > { %v4381_v61 = vpop.permute.xlu0 %690  ;;  %3183 = vmatprep.subr.bf16.mxu0 %v755_v57  ;;  %v1977_v63 = vpop.permute.xlu1 %1976 }
  0xa2   : > { %v699_v62 = vsel %vm698_vm1, %v4381_v61, %v693_v47 }
  0xa3   : > { %v754_v13 = vmul.bf16 %v729_v49, %v699_v62  ;;  %600 = vrot.lane.b32.xlu0 %v4117_v4, %s4036_s29 }
  0xa4   : > { %964 = vrot.lane.b32.xlu1 %v4112_v3, %s4040_s8 }
  0xa5   : > { %v4395_v23 = vpop.permute.xlu0 %1978  ;;  %3184 = vmatpush1.bf16.msra.mxu0 %v754_v13  ;;  %v4399_v26 = vpop.permute.xlu1 %1974 }
  0xa6   : > { %v1982_v24 = vsel %vm514_vm5, %v1977_v63, %v4395_v23  ;;  %3185 = vmatprep.subr.bf16.mxu0 %v4112_v3  ;;  %v1990_v20 = vsel %vm514_vm5, %v4399_v26, %v1977_v63  ;;  %v1816_v3 = vld [vmem:[%s5057_s1] sm:$0x11] }
  0xa7   : > { %v2033_v27 = vmul.bf16 %v2017_v0, %v1982_v24  ;;  %966 = vrot.lane.b32.xlu0 %v4117_v4, %s4040_s8  ;;  %v2032_v33 = vmul.bf16 %v2010_v19, %v1990_v20  ;;  %v3670_v45 = vcombine.high %v1816_v3, %v1816_v3  ;;  %v3669_v55 = vcombine.low %v1816_v3, %v1816_v3  ;;  %v1710_v24 = vld [vmem:[%s5057_s1 + $0x10] sm:$0x11] }
  0xa8   : > { %962 = vrot.lane.b32.xlu1 %v4122_v5, %s4040_s8 }
  0xa9   : > { %v1887_v38 = vpop.permute.xlu0 %1886  ;;  %3226 = vmatprep.subr.bf16.mxu1 %v2033_v27  ;;  %3186 = vmatpush1.bf16.msra.mxu0 %v4122_v5  ;;  %v4413_v39 = vpop.permute.xlu1 %1888  ;;  %v628_v5 = vpack.i.b16 %v627_v36, %v627_v36  ;;  %v1836_v58 = vpack.i.b16 %v3670_v45, %v3670_v45  ;;  %v3658_v36 = vcombine.high %v1710_v24, %v1710_v24 }
  0xaa   : > { %3227 = vmatpush1.bf16.msra.mxu1 %v2032_v33  ;;  %v1892_v41 = vsel %vm422_vm6, %v1887_v38, %v4413_v39 }
  0xab   : > { %512 = vrot.lane.b32.xlu0 %v4117_v4, %s4037_s30  ;;  %v1947_v44 = vmul.bf16 %v1929_v35, %v1892_v41  ;;  %v633_v57 = vrot.slane %v628_v5, %v4322_v15  ;;  %v1841_v19 = vrot.slane %v1836_v58, %v4390_v18  ;;  %v539_v35 = vpack.i.b16 %v3549_v21, %v3549_v21 }
  0xac   : > { %2160 = vrot.lane.b32.xlu1 %v4137_v6, %s4033_s26  ;;  %v3657_v5 = vcombine.low %v1710_v24, %v1710_v24 }
  0xad   : > { %v4422_v46 = vpop.permute.xlu0 %1884  ;;  %3228 = vmatprep.subr.bf16.mxu1 %v1947_v44  ;;  %v597_v49 = vpop.permute.xlu1 %596  ;;  %v551_v44 = vrot.slane %v546_v29, %v4322_v15 }
  0xae   : > { %5083 = vst [vmem:[#allocation3_spill] sm:$0xff] %v4422_v46  ;;  %v1900_v47 = vsel %vm422_vm6, %v4422_v46, %v1887_v38  ;;  %v434_v38 = vld [vmem:[%s5057_s1] sm:$0x11] }
  0xaf   : > { %v1946_v52 = vmul.bf16 %v1921_v42, %v1900_v47  ;;  %420 = vrot.lane.b32.xlu0 %v4117_v4, %s4038_s6  ;;  %v3542_v45 = vcombine.high %v434_v38, %v434_v38  ;;  %v544_v47 = vrot.slane %v539_v35, %v4322_v15 }
  0xb0   : > { %332 = vrot.lane.b32.xlu1 %v4117_v4, %s4039_s7  ;;  %v1829_v4 = vpack.i.b16 %v3669_v55, %v3669_v55  ;;  %v1620_v55 = vld [vmem:[%s5057_s1] sm:$0x88] }
  0xb1   : > { %v4435_v60 = vpop.permute.xlu0 %598  ;;  %3229 = vmatpush1.bf16.msra.mxu1 %v1946_v52  ;;  %v4439_v63 = vpop.permute.xlu1 %594  ;;  %v3541_v52 = vcombine.low %v434_v38, %v434_v38 }
  0xb2   : > { %v603_v62 = vsel %vm602_vm4, %v597_v49, %v4435_v60  ;;  %v612_v0 = vsel %vm602_vm4, %v4439_v63, %v597_v49  ;;  %v1834_v28 = vrot.slane %v1829_v4, %v4390_v18  ;;  %v1730_v49 = vpack.i.b16 %v3658_v36, %v3658_v36 }
  0xb3   : > { %v659_v13 = vmul.bf16 %v641_v54, %v603_v62  ;;  %2066 = vrot.lane.b32.xlu0 %v4107_v2, %s4036_s29  ;;  %v658_v17 = vmul.bf16 %v633_v57, %v612_v0  ;;  %v1723_v62 = vpack.i.b16 %v3657_v5, %v3657_v5  ;;  %v447_v16 = vshrl.u32 %v3541_v52, 16 }
  0xb4   : > { %1522 = vrot.lane.b32.xlu1 %v4277_v31, %s4035_s28  ;;  %v1735_v4 = vrot.slane %v1730_v49, %v4390_v18 }
  0xb5   : > { %v1801_v22 = vpop.permute.xlu0 %1800  ;;  %3187 = vmatprep.subr.bf16.mxu0 %v659_v13  ;;  %v4451_v27 = vpop.permute.xlu1 %1802  ;;  %v455_v13 = vshrl.u32 %v3542_v45, 16  ;;  %v1728_v24 = vrot.slane %v1723_v62, %v4390_v18  ;;  %v346_v45 = vld [vmem:[%s5057_s1] sm:$0x11] }
  0xb6   : > { %5084 = vst [vmem:[#allocation4_spill] sm:$0xff] %v4451_v27  ;;  %3188 = vmatpush1.bf16.msra.mxu0 %v658_v17  ;;  %v1806_v20 = vsel %vm334_vm7, %v1801_v22, %v4451_v27  ;;  %v3650_v17 = vcombine.high %v1620_v55, %v1620_v55 }
  0xb7   : > { %1980 = vrot.lane.b32.xlu0 %v4107_v2, %s4037_s30  ;;  %v1857_v33 = vmul.bf16 %v1841_v19, %v1806_v20  ;;  %v456_v20 = vpack.i.b16 %v455_v13, %v455_v13 }
  0xb8   : > { %1432 = vrot.lane.b32.xlu1 %v4277_v31, %s4033_s26  ;;  %v1641_v35 = vshrl.u32 %v3650_v17, 16  ;;  %s304_s26 = scalar_lea.vmem %s5061_s5, %s3528_s10 }
  0xb9   : > { %v4463_v3 = vpop.permute.xlu0 %1787  ;;  %3230 = vmatprep.subr.bf16.mxu1 %v1857_v33  ;;  %v509_v42 = vpop.permute.xlu1 %508  ;;  %v448_v33 = vpack.i.b16 %v447_v16, %v447_v16  ;;  %v2438_v16 = vld [vmem:[%s5057_s1 + $0x10] sm:$0x11] }
  0xba   : > { %5085 = vst [vmem:[#allocation5_spill] sm:$0xff] %v4463_v3  ;;  %v1814_v41 = vsel %vm334_vm7, %v4463_v3, %v1801_v22  ;;  %v1642_v5 = vpack.i.b16 %v1641_v35, %v1641_v35 }
  0xbb   : > { %v1856_v43 = vmul.bf16 %v1834_v28, %v1814_v41  ;;  %1890 = vrot.lane.b32.xlu0 %v4107_v2, %s4038_s6  ;;  %v3649_v28 = vcombine.low %v1620_v55, %v1620_v55 }
  0xbc   : > { %1804 = vrot.lane.b32.xlu1 %v4107_v2, %s4039_s7  ;;  %v1647_v13 = vrot.slane %v1642_v5, %v4280_v32 }
  0xbd   : > { %v4473_v54 = vpop.permute.xlu0 %510  ;;  %3231 = vmatpush1.bf16.msra.mxu1 %v1856_v43  ;;  %v4480_v58 = vpop.permute.xlu1 %506  ;;  %v461_v43 = vrot.slane %v456_v20, %v4390_v18 }
  0xbe   : > { %v515_v57 = vsel %vm514_vm5, %v509_v42, %v4473_v54  ;;  %v524_v2 = vsel %vm514_vm5, %v4480_v58, %v509_v42 }
  0xbf   : > { %v567_v59 = vmul.bf16 %v551_v44, %v515_v57  ;;  %1338 = vrot.lane.b32.xlu0 %v4186_v9, %s4036_s29  ;;  %v566_v0 = vmul.bf16 %v544_v47, %v524_v2  ;;  %v1633_v44 = vshrl.u32 %v3649_v28, 16  ;;  %v3534_v2 = vcombine.high %v346_v45, %v346_v45 }
  0xc0   : > { %1698 = vrot.lane.b32.xlu1 %v4277_v31, %s4040_s8  ;;  %v3726_v28 = vcombine.high %v2438_v16, %v2438_v16 }
  0xc1   : > { %v1695_v19 = vpop.permute.xlu0 %1694  ;;  %3189 = vmatprep.subr.bf16.mxu0 %v567_v59  ;;  %v4489_v21 = vpop.permute.xlu1 %1696  ;;  %v1634_v59 = vpack.i.b16 %v1633_v44, %v1633_v44 }
  0xc2   : > { %5086 = vst [vmem:[#allocation6_spill] sm:$0xff] %v4489_v21  ;;  %3190 = vmatpush1.bf16.msra.mxu0 %v566_v0  ;;  %v1701_v22 = vsel %vm970_vm8, %v1695_v19, %v4489_v21  ;;  %v3533_v0 = vcombine.low %v346_v45, %v346_v45  ;;  %v2458_v44 = vpack.i.b16 %v3726_v28, %v3726_v28  ;;  %v2348_v45 = vld [vmem:[%s5057_s1] sm:$0x88] }
  0xc3   : > { %1252 = vrot.lane.b32.xlu0 %v4186_v9, %s4037_s30  ;;  %v1751_v29 = vmul.bf16 %v1735_v4, %v1701_v22  ;;  %v366_v22 = vpack.i.b16 %v3534_v2, %v3534_v2  ;;  %v3717_v28 = vcombine.low %v2348_v45, %v2348_v45 }
  0xc4   : > { %1608 = vrot.lane.b32.xlu1 %v4277_v31, %s4034_s27  ;;  %v453_v31 = vrot.slane %v448_v33, %v4390_v18  ;;  %v359_v20 = vpack.i.b16 %v3533_v0, %v3533_v0  ;;  %v2616_v33 = vld [vmem:[%s5059_s3] sm:$0xff]  ;;  %v2463_v0 = vrot.slane %v2458_v44, %v4390_v18 }
  0xc5   : > { %v4498_v36 = vpop.permute.xlu0 %1692  ;;  %3232 = vmatprep.subr.bf16.mxu1 %v1751_v29  ;;  %v417_v41 = vpop.permute.xlu1 %416  ;;  %v4041_v29 = vmov 0  }
  0xc6   : > { %5087 = vst [vmem:[#allocation7_spill] sm:$0xff] %v4498_v36  ;;  %v1700_v38 = vsel %vm970_vm8, %v4498_v36, %v1695_v19  ;;  %v1639_v19 = vrot.slane %v1634_v59, %v4280_v32  ;;  %3884 = vset.pattern.permute.xlu0 %v4041_v29 }
  0xc7   : > { %v1750_v42 = vmul.bf16 %v1728_v24, %v1700_v38  ;;  %1162 = vrot.lane.b32.xlu0 %v4186_v9, %s4038_s6 }
  0xc8   : > { %2426 = vrot.lane.b32.xlu1 %v4137_v6, %s4040_s8 }
  0xc9   : > { %v4511_v47 = vpop.permute.xlu0 %418  ;;  %3233 = vmatpush1.bf16.msra.mxu1 %v1750_v42  ;;  %v4515_v52 = vpop.permute.xlu1 %414  ;;  %v371_v42 = vrot.slane %v366_v22, %v4390_v18 }
  0xca   : > { %v423_v49 = vsel %vm422_vm6, %v417_v41, %v4511_v47  ;;  %v432_v57 = vsel %vm422_vm6, %v4515_v52, %v417_v41 }
  0xcb   : > { %v479_v55 = vmul.bf16 %v461_v43, %v423_v49  ;;  %1076 = vrot.lane.b32.xlu0 %v4186_v9, %s4039_s7  ;;  %v478_v62 = vmul.bf16 %v453_v31, %v432_v57  ;;  %v3725_v43 = vcombine.low %v2438_v16, %v2438_v16  ;;  %v1534_v31 = vld [vmem:[%s5057_s1] sm:$0x88]  ;;  %v3718_v16 = vcombine.high %v2348_v45, %v2348_v45 }
  0xcc   : > { %2336 = vrot.lane.b32.xlu1 %v4137_v6, %s4034_s27 }
  0xcd   : > { %v1605_v4 = vpop.permute.xlu0 %1604  ;;  %3191 = vmatprep.subr.bf16.mxu0 %v479_v55  ;;  %v4527_v17 = vpop.permute.xlu1 %1606  ;;  %v2451_v2 = vpack.i.b16 %v3725_v43, %v3725_v43 }
  0xce   : > { %5088 = vst [vmem:[#allocation8_spill] sm:$0xff] %v4527_v17  ;;  %3192 = vmatpush1.bf16.msra.mxu0 %v478_v62  ;;  %v1611_v9 = vsel %vm878_vm2, %v1605_v4, %v4527_v17  ;;  %v3642_v62 = vcombine.high %v1534_v31, %v1534_v31 }
  0xcf   : > { %968 = vrot.lane.b32.xlu0 %v4164_v7, %s4040_s8  ;;  %v1665_v24 = vmul.bf16 %v1647_v13, %v1611_v9 }
  0xd0   : > { %2250 = vrot.lane.b32.xlu1 %v4137_v6, %s4035_s28  ;;  %v364_v6 = vrot.slane %v359_v20, %v4390_v18  ;;  %v1554_v20 = vpack.i.b16 %v3642_v62, %v3642_v62 }
  0xd1   : > { %v4539_v35 = vpop.permute.xlu0 %1602  ;;  %3234 = vmatprep.subr.bf16.mxu1 %v1665_v24  ;;  %v329_v38 = vpop.permute.xlu1 %328  ;;  %v2456_v24 = vrot.slane %v2451_v2, %v4390_v18 }
  0xd2   : > { %5089 = vst [vmem:[#allocation9_spill] sm:$0xff] %v4539_v35  ;;  %v1610_v7 = vsel %vm878_vm2, %v4539_v35, %v1605_v4  ;;  %v3641_v4 = vcombine.low %v1534_v31, %v1534_v31  ;;  %v1559_v44 = vrot.slane %v1554_v20, %v4280_v32  ;;  %v2361_v31 = vshrl.u32 %v3717_v28, 16 }
  0xd3   : > { %v1664_v41 = vmul.bf16 %v1639_v19, %v1610_v7  ;;  %2619 = vperm.xlu0 %3884, %v2616_v33   ;;  %v2369_v7 = vshrl.u32 %v3718_v16, 16 }
  0xd4   : > { %v1547_v33 = vpack.i.b16 %v3641_v4, %v3641_v4  ;;  %v2362_v16 = vpack.i.b16 %v2361_v31, %v2361_v31 }
  0xd5   : > { %v4548_v5 = vpop.permute.xlu0 %330  ;;  %3235 = vmatpush1.bf16.msra.mxu1 %v1664_v41  ;;  %v4555_v55 = vpop.permute.xlu1 %315 }
  0xd6   : > { %v335_v49 = vsel %vm334_vm7, %v329_v38, %v4548_v5  ;;  %v344_v59 = vsel %vm334_vm7, %v4555_v55, %v329_v38  ;;  %v1444_v38 = vld [vmem:[%s5057_s1] sm:$0x44]  ;;  %v1552_v45 = vrot.slane %v1547_v33, %v4280_v32  ;;  %v891_v33 = vld [vmem:[%s5057_s1 + $0x8] sm:$0x88] }
  0xd7   : > { %v387_v57 = vmul.bf16 %v371_v42, %v335_v49  ;;  %v386_v13 = vmul.bf16 %v364_v6, %v344_v59  ;;  %v3634_v49 = vcombine.high %v1444_v38, %v1444_v38  ;;  %v3633_v59 = vcombine.low %v1444_v38, %v1444_v38  ;;  %v1350_v38 = vld [vmem:[%s5057_s1] sm:$0x22] }
  0xd9   : > { %v2423_v9 = vpop.permute.xlu0 %2422  ;;  %3193 = vmatprep.subr.bf16.mxu0 %v387_v57  ;;  %v4560_v19 = vpop.permute.xlu1 %2424  ;;  %v2370_v57 = vpack.i.b16 %v2369_v7, %v2369_v7  ;;  %v1457_v20 = vshrl.u32 %v3633_v59, 16  ;;  %v3583_v59 = vcombine.low %v891_v33, %v891_v33 }
  0xda   : > { %5090 = vst [vmem:[#allocation10_spill] sm:$0xff] %v4560_v19  ;;  %3194 = vmatpush1.bf16.msra.mxu0 %v386_v13  ;;  %v2429_v22 = vsel %vm970_vm8, %v2423_v9, %v4560_v19 }
  0xdb   : > { %v2479_v29 = vmul.bf16 %v2463_v0, %v2429_v22  ;;  %v1458_v31 = vpack.i.b16 %v1457_v20, %v1457_v20 }
  0xdd   : > { %v4568_v41 = vpop.permute.xlu0 %2420  ;;  %3246 = vmatprep.subr.bf16.mxu1 %v2479_v29  ;;  %v1519_v43 = vpop.permute.xlu1 %1518  ;;  %v2262_v29 = vld [vmem:[%s5057_s1] sm:$0x88] }
  0xde   : > { %5091 = vst [vmem:[#allocation11_spill] sm:$0xff] %v4568_v41  ;;  %v2428_v42 = vsel %vm970_vm8, %v4568_v41, %v2423_v9  ;;  %v1465_v9 = vshrl.u32 %v3634_v49, 16  ;;  %v3710_v49 = vcombine.high %v2262_v29, %v2262_v29 }
  0xdf   : > { %v2478_v6 = vmul.bf16 %v2456_v24, %v2428_v42  ;;  %v2375_v24 = vrot.slane %v2370_v57, %v4280_v32 }
  0xe1   : > { %v4574_v2 = vpop.permute.xlu0 %1520  ;;  %3247 = vmatpush2.bf16.msra.mxu1 %v2478_v6  ;;  %v4578_v13 = vpop.permute.xlu1 %1516  ;;  %v1466_v6 = vpack.i.b16 %v1465_v9, %v1465_v9  ;;  %v2282_v9 = vpack.i.b16 %v3710_v49, %v3710_v49 }
  0xe2   : > { %v1525_v62 = vsel %vm790_vm3, %v1519_v43, %v4574_v2  ;;  %v1524_v4 = vsel %vm790_vm3, %v4578_v13, %v1519_v43  ;;  %v2367_v43 = vrot.slane %v2362_v16, %v4280_v32  ;;  %v1463_v16 = vrot.slane %v1458_v31, %v4267_v25 }
  0xe3   : > { %v1575_v0 = vmul.bf16 %v1559_v44, %v1525_v62  ;;  %v1574_v22 = vmul.bf16 %v1552_v45, %v1524_v4  ;;  %v3584_v45 = vcombine.high %v891_v33, %v891_v33  ;;  %v3626_v62 = vcombine.high %v1350_v38, %v1350_v38 }
  0xe4   : > { %v1471_v19 = vrot.slane %v1466_v6, %v4267_v25  ;;  %v2287_v31 = vrot.slane %v2282_v9, %v4280_v32 }
  0xe5   : > { %v2333_v28 = vpop.permute.xlu0 %2332  ;;  %3195 = vmatprep.subr.bf16.mxu0 %v1575_v0  ;;  %v4589_v7 = vpop.permute.xlu1 %2334  ;;  %v1371_v41 = vshrl.u32 %v3626_v62, 16 }
  0xe6   : > { %5092 = vst [vmem:[#allocation12_spill] sm:$0xff] %v4589_v7  ;;  %3196 = vmatpush2.bf16.msra.mxu0 %v1574_v22  ;;  %v2339_v42 = vsel %vm878_vm2, %v2333_v28, %v4589_v7  ;;  %v3709_v7 = vcombine.low %v2262_v29, %v2262_v29  ;;  %v3625_v29 = vcombine.low %v1350_v38, %v1350_v38 }
  0xe7   : > { %v2393_v44 = vmul.bf16 %v2375_v24, %v2339_v42  ;;  %v927_v24 = vshrl.u32 %v3584_v45, 16  ;;  %v919_v42 = vshrl.u32 %v3583_v59, 16  ;;  %v803_v45 = vld [vmem:[%s5057_s1 + $0x8] sm:$0x88] }
  0xe8   : > { %v2275_v6 = vpack.i.b16 %v3709_v7, %v3709_v7 }
  0xe9   : > { %v4597_v57 = vpop.permute.xlu0 %2330  ;;  %3248 = vmatprep.subr.bf16.mxu1 %v2393_v44  ;;  %v1429_v4 = vpop.permute.xlu1 %1428  ;;  %v928_v49 = vpack.i.b16 %v927_v24, %v927_v24  ;;  %v920_v62 = vpack.i.b16 %v919_v42, %v919_v42  ;;  %v3576_v42 = vcombine.high %v803_v45, %v803_v45 }
  0xea   : > { %5093 = vst [vmem:[#allocation13_spill] sm:$0xff] %v4597_v57  ;;  %v2338_v0 = vsel %vm878_vm2, %v4597_v57, %v2333_v28  ;;  %v2280_v38 = vrot.slane %v2275_v6, %v4280_v32  ;;  %v4634_v6 = vcombine.low %v4241_v12, %v4241_v12 }
  0xeb   : > { %v2392_v22 = vmul.bf16 %v2367_v43, %v2338_v0  ;;  %v1372_v0 = vpack.i.b16 %v1371_v41, %v1371_v41  ;;  %v1174_v41 = vld [vmem:[%s5057_s1] sm:$0x11]  ;;  %v933_v24 = vrot.slane %v928_v49, %v4280_v32  ;;  %v836_v35 = vpack.i.b16 %v3576_v42, %v3576_v42 }
  0xec   : > { %5096 = vst [vmem:[#allocation16_spill] sm:$0xff] %v4634_v6 }
  0xed   : > { %v4603_v20 = vpop.permute.xlu0 %1430  ;;  %3249 = vmatpush2.bf16.msra.mxu1 %v2392_v22  ;;  %v4607_v17 = vpop.permute.xlu1 %1426 }
  0xee   : > { %v1435_v33 = vsel %vm698_vm1, %v1429_v4, %v4603_v20  ;;  %v1434_v43 = vsel %vm698_vm1, %v4607_v17, %v1429_v4  ;;  %v1363_v4 = vshrl.u32 %v3625_v29, 16 }
  0xef   : > { %v1489_v28 = vmul.bf16 %v1471_v19, %v1435_v33  ;;  %v1488_v44 = vmul.bf16 %v1463_v16, %v1434_v43  ;;  %v711_v19 = vld [vmem:[%s5057_s1 + $0x8] sm:$0x44]  ;;  %v3575_v16 = vcombine.low %v803_v45, %v803_v45  ;;  %v1377_v43 = vrot.slane %v1372_v0, %v4322_v15 }
  0xf0   : > { %v3567_v29 = vcombine.low %v711_v19, %v711_v19  ;;  %v3568_v49 = vcombine.high %v711_v19, %v711_v19  ;;  %v3610_v45 = vcombine.high %v1174_v41, %v1174_v41  ;;  %v1364_v12 = vpack.i.b16 %v1363_v4, %v1363_v4 }
  0xf1   : > { %v2247_v59 = vpop.permute.xlu0 %2246  ;;  %3197 = vmatprep.subr.bf16.mxu0 %v1489_v28  ;;  %v4615_v22 = vpop.permute.xlu1 %2248  ;;  %v925_v28 = vrot.slane %v920_v62, %v4280_v32 }
  0xf2   : > { %5094 = vst [vmem:[#allocation14_spill] sm:$0xff] %v4615_v22  ;;  %3198 = vmatpush2.bf16.msra.mxu0 %v1488_v44  ;;  %v2253_v7 = vsel %vm790_vm3, %v2247_v59, %v4615_v22  ;;  %v1195_v19 = vshrl.u32 %v3610_v45, 16  ;;  %v1369_v4 = vrot.slane %v1364_v12, %v4322_v15 }
  0xf3   : > { %3199 = vmatprep.subr.bf16.mxu0 %v4181_v8  ;;  %v2303_v9 = vmul.bf16 %v2287_v31, %v2253_v7  ;;  %v1264_v8 = vld [vmem:[%s5057_s1] sm:$0x22]  ;;  %v829_v7 = vpack.i.b16 %v3575_v16, %v3575_v16  ;;  %v3609_v16 = vcombine.low %v1174_v41, %v1174_v41  ;;  %v1088_v41 = vld [vmem:[%s5057_s1] sm:$0x11] }
  0xf4   : > { %v3618_v21 = vcombine.high %v1264_v8, %v1264_v8 }
  0xf5   : > { %v4628_v33 = vpop.permute.xlu0 %2244  ;;  %3250 = vmatprep.subr.bf16.mxu1 %v2303_v9  ;;  %v877_v31 = vpop.permute.xlu1 %876  ;;  %v739_v9 = vshrl.u32 %v3567_v29, 16  ;;  %v834_v42 = vrot.slane %v829_v7, %v4280_v32 }
  0xf6   : > { %5095 = vst [vmem:[#allocation15_spill] sm:$0xff] %v4628_v33  ;;  %v2252_v44 = vsel %vm790_vm3, %v4628_v33, %v2247_v59  ;;  %3200 = vmatpush2.bf16.msra.mxu0 %v4191_v10  ;;  %v888_v0 = vsel %vm878_vm2, %v877_v31, %v4306_v53  ;;  %v881_v22 = vsel %vm878_vm2, %v4301_v51, %v877_v31  ;;  %v747_v10 = vshrl.u32 %v3568_v49, 16  ;;  %v615_v51 = vld [vmem:[%s5057_s1 + $0x8] sm:$0x22] }
  0xf7   : > { %v2302_v62 = vmul.bf16 %v2280_v38, %v2252_v44  ;;  %v937_v57 = vmul.bf16 %v933_v24, %v888_v0  ;;  %v3617_v59 = vcombine.low %v1264_v8, %v1264_v8  ;;  %v936_v38 = vmul.bf16 %v925_v28, %v881_v22 }
  0xf8   : > { %v1284_v8 = vpack.i.b16 %v3618_v21, %v3618_v21  ;;  %v740_v28 = vpack.i.b16 %v739_v9, %v739_v9  ;;  %v748_v31 = vpack.i.b16 %v747_v10, %v747_v10  ;;  %v1196_v49 = vpack.i.b16 %v1195_v19, %v1195_v19  ;;  %v2173_v10 = vld [vmem:[%s5057_s1 + $0x8] sm:$0x44] }
  0xf9   : > { %v1335_v36 = vpop.permute.xlu0 %1334  ;;  %3251 = vmatpush2.bf16.msra.mxu1 %v2302_v62  ;;  %v4646_v33 = vpop.permute.xlu1 %1336  ;;  %v1277_v22 = vpack.i.b16 %v3617_v59, %v3617_v59  ;;  %v1187_v0 = vshrl.u32 %v3609_v16, 16  ;;  %v3602_v59 = vcombine.high %v1088_v41, %v1088_v41  ;;  %v4683_v16 = vld [vmem:[%s5057_s1 + $0x8] sm:$0x11] }
  0xfa   : > { %5097 = vst [vmem:[#allocation17_spill] sm:$0xff] %v4646_v33  ;;  %3261 = vmatprep.subr.bf16.mxu1 %v937_v57  ;;  %v1340_v53 = vsel %vm602_vm4, %v1335_v36, %v4646_v33  ;;  %v841_v57 = vrot.slane %v836_v35, %v4280_v32  ;;  %v3559_v35 = vcombine.low %v615_v51, %v615_v51 }
  0xfb   : > { %v1395_v24 = vmul.bf16 %v1377_v43, %v1340_v53 }
  0xfc   : > { %3253 = vmatmul.mubr.bf16.vlgmr.msra.gmra.mxu1 %v4634_v6  ;;  %v643_v53 = vshrl.u32 %v3559_v35, 16 }
  0xfd   : > { %v4657_v29 = vpop.permute.xlu0 %1332  ;;  %3262 = vmatpush1.bf16.msra.mxu1 %v936_v38  ;;  %3293 = vmatprep.mubr.bf16.mxu1 %v4374_v56  ;;  %v789_v44 = vpop.permute.xlu1 %788  ;;  %v1289_v56 = vrot.slane %v1284_v8, %v4322_v15  ;;  %v3560_v38 = vcombine.high %v615_v51, %v615_v51  ;;  %v527_v8 = vld [vmem:[%s5057_s1 + $0x8] sm:$0x22] }
  0xfe   : > { %5098 = vst [vmem:[#allocation18_spill] sm:$0xff] %v4657_v29  ;;  %v1348_v43 = vsel %vm602_vm4, %v4657_v29, %v1335_v36  ;;  %3201 = vmatprep.subr.bf16.mxu0 %v1395_v24  ;;  %v793_v45 = vsel %vm790_vm3, %v4318_v11, %v789_v44  ;;  %v800_v62 = vsel %vm790_vm3, %v789_v44, %v4331_v1 }
  0xff   : > { %v1394_v21 = vmul.bf16 %v1369_v4, %v1348_v43  ;;  %v844_v12 = vmul.bf16 %v834_v42, %v793_v45  ;;  %v845_v7 = vmul.bf16 %v841_v57, %v800_v62  ;;  %v3601_v36 = vcombine.low %v1088_v41, %v1088_v41  ;;  %v982_v4 = vld [vmem:[%s5057_s1 + $0x10] sm:$0x11] }
 0x100   : > { %v1282_v11 = vrot.slane %v1277_v22, %v4322_v15  ;;  %v745_v1 = vrot.slane %v740_v28, %v4267_v25  ;;  %v753_v24 = vrot.slane %v748_v31, %v4267_v25  ;;  %v1201_v42 = vrot.slane %v1196_v49, %v4390_v18 }
 0x101   : > { %v1249_v9 = vpop.permute.xlu0 %1248  ;;  %3202 = vmatpush2.bf16.msra.mxu0 %v1394_v21  ;;  %3263 = vmatprep.subr.bf16.mxu1 %v845_v7  ;;  %v1188_v57 = vpack.i.b16 %v1187_v0, %v1187_v0  ;;  %v1108_v28 = vpack.i.b16 %v3602_v59, %v3602_v59  ;;  %v3703_v41 = vcombine.low %v2173_v10, %v2173_v10  ;;  %v651_v21 = vshrl.u32 %v3560_v38, 16 }
 0x102   : > { %v4673_v19 = vpop.permute.xlu1 %1250  ;;  %3264 = vmatpush1.bf16.msra.mxu1 %v844_v12  ;;  %v3704_v43 = vcombine.high %v2173_v10, %v2173_v10  ;;  %v1101_v35 = vpack.i.b16 %v3601_v36, %v3601_v36  ;;  %v3590_v45 = vcombine.high %v982_v4, %v982_v4  ;;  %v3543_v62 = vcombine.low %v4683_v16, %v4683_v16  ;;  %v347_v10 = vld [vmem:[%s5057_s1 + $0x8] sm:$0x11] }
 0x103   : > { %5099 = vst [vmem:[#allocation19_spill] sm:$0xff] %v4673_v19  ;;  %v1254_v51 = vsel %vm514_vm5, %v1249_v9, %v4673_v19  ;;  %v644_v0 = vpack.i.b16 %v643_v53, %v643_v53  ;;  %v3589_v12 = vcombine.low %v982_v4, %v982_v4  ;;  %v3551_v7 = vcombine.low %v527_v8, %v527_v8 }
 0x104   : > { %v1305_v22 = vmul.bf16 %v1289_v56, %v1254_v51  ;;  %v3552_v38 = vcombine.high %v527_v8, %v527_v8  ;;  %v1193_v53 = vrot.slane %v1188_v57, %v4390_v18  ;;  %v1002_v4 = vpack.i.b16 %v3590_v45, %v3590_v45  ;;  %v2079_v57 = vld [vmem:[%s5057_s1 + $0x8] sm:$0x22] }
 0x105   : > { %v4692_v44 = vpop.permute.xlu0 %1246  ;;  %v4710_v8 = vrot.slane %v1101_v35, %v4390_v18  ;;  %v4003_v35 = vld [vmem:[%s4096_s25 + $0xc] ss:$16 sps:$4 sm:$0xff]  }
 0x106   : > { %5100 = vst [vmem:[#allocation20_spill] sm:$0xff] %v4692_v44  ;;  %v1262_v31 = vsel %vm514_vm5, %v4692_v44, %v1249_v9  ;;  %3203 = vmatprep.subr.bf16.mxu0 %v1305_v22  ;;  %v697_v49 = vpop.permute.xlu1 %696  ;;  %v2201_v9 = vshrl.u32 %v3703_v41, 16  ;;  %v2209_v22 = vshrl.u32 %v3704_v43, 16  ;;  %v553_v43 = vpack.i.b16 %v3551_v7, %v3551_v7 }
 0x107   : > { %v1304_v56 = vmul.bf16 %v1282_v11, %v1262_v31  ;;  %v701_v59 = vsel %vm698_vm1, %v4360_v48, %v697_v49  ;;  %v708_v36 = vsel %vm698_vm1, %v697_v49, %v4381_v61  ;;  %v652_v11 = vpack.i.b16 %v651_v21, %v651_v21 }
 0x108   : > { %v756_v51 = vmul.bf16 %v745_v1, %v701_v59  ;;  %v757_v6 = vmul.bf16 %v753_v24, %v708_v36  ;;  %v463_v48 = vshrl.u32 %v3543_v62, 16  ;;  %v1113_v61 = vrot.slane %v1108_v28, %v4390_v18 }
 0x109   : > { %v1159_v19 = vpop.permute.xlu0 %1158  ;;  %3204 = vmatpush2.bf16.msra.mxu0 %v1304_v56  ;;  %v3544_v1 = vcombine.high %v4683_v16, %v4683_v16  ;;  %v3535_v24 = vcombine.low %v347_v10, %v347_v10  ;;  %v560_v21 = vpack.i.b16 %v3552_v38, %v3552_v38  ;;  %v4720_v28 = vrot.slane %v644_v0, %v4322_v15 }
 0x10a   : > { %3265 = vmatprep.subr.bf16.mxu1 %v757_v6  ;;  %v4706_v31 = vpop.permute.xlu1 %1160  ;;  %v995_v6 = vpack.i.b16 %v3589_v12, %v3589_v12  ;;  %v2202_v62 = vpack.i.b16 %v2201_v9, %v2201_v9  ;;  %v2210_v16 = vpack.i.b16 %v2209_v22, %v2209_v22  ;;  %v4726_v56 = vrot.slane %v652_v11, %v4322_v15  ;;  %v1445_v22 = vld [vmem:[%s5057_s1 + $0x8] sm:$0x44] }
 0x10b   : > { %5101 = vst [vmem:[#allocation21_spill] sm:$0xff] %v4706_v31  ;;  %v1164_v41 = vsel %vm422_vm6, %v1159_v19, %v4706_v31  ;;  %3266 = vmatpush1.bf16.msra.mxu1 %v756_v51  ;;  %v4729_v59 = vrot.slane %v1002_v4, %v4390_v18  ;;  %v464_v12 = vpack.i.b16 %v463_v48, %v463_v48  ;;  %v471_v38 = vshrl.u32 %v3544_v1, 16  ;;  %v4004_v4 = vld [vmem:[%s4096_s25 + $0x8] ss:$16 sps:$4 sm:$0xff]  }
 0x10c   : > { %v1219_v45 = vmul.bf16 %v1201_v42, %v1164_v41  ;;  %3267 = vmatprep.subr.bf16.mxu1 %v4003_v35  ;;  %v3695_v7 = vcombine.low %v2079_v57, %v2079_v57  ;;  %v1535_v42 = vld [vmem:[%s5057_s1 + $0x8] sm:$0x88]  ;;  %v373_v51 = vpack.i.b16 %v3535_v24, %v3535_v24  ;;  %v3696_v9 = vcombine.high %v2079_v57, %v2079_v57 }
 0x10d   : > { %v4723_v49 = vpop.permute.xlu0 %1156  ;;  %v4741_v48 = vrot.slane %v995_v6, %v4390_v18  ;;  %v4744_v41 = vrot.slane %v553_v43, %v4322_v15  ;;  %v4750_v1 = vrot.slane %v2202_v62, %v4267_v25  ;;  %v4753_v24 = vrot.slane %v2210_v16, %v4267_v25 }
 0x10e   : > { %5102 = vst [vmem:[#allocation22_spill] sm:$0xff] %v4723_v49  ;;  %v1172_v0 = vsel %vm422_vm6, %v4723_v49, %v1159_v19  ;;  %3205 = vmatprep.subr.bf16.mxu0 %v1219_v45  ;;  %v1073_v36 = vpop.permute.xlu1 %1072  ;;  %v4747_v19 = vrot.slane %v560_v21, %v4322_v15  ;;  %v3536_v57 = vcombine.high %v347_v10, %v347_v10  ;;  %v2107_v35 = vshrl.u32 %v3695_v7, 16 }
 0x10f   : > { %v1218_v11 = vmul.bf16 %v1193_v53, %v1172_v0  ;;  %3268 = vmatpush1.bf16.msra.mxu1 %v4004_v4  ;;  %v3643_v45 = vcombine.low %v1535_v42, %v1535_v42  ;;  %v1993_v53 = vld [vmem:[%s5057_s1 + $0x8] sm:$0x22]  ;;  %v4762_v43 = vcombine.low %v4366_v50, %v4366_v50  ;;  %v4765_v21 = vrot.slane %v464_v12, %v4390_v18  ;;  %v1903_v50 = vld [vmem:[%s5057_s1 + $0x8] sm:$0x11] }
 0x110   : > { %v3635_v62 = vcombine.low %v1445_v22, %v1445_v22  ;;  %v472_v0 = vpack.i.b16 %v471_v38, %v471_v38  ;;  %v4772_v4 = vrot.slane %v373_v51, %v4390_v18  ;;  %v2115_v31 = vshrl.u32 %v3696_v9, 16 }
 0x111   : > { %v4758_v6 = vpop.permute.xlu0 %1074  ;;  %3206 = vmatpush2.bf16.msra.mxu0 %v1218_v11  ;;  %v3644_v7 = vcombine.high %v1535_v42, %v1535_v42  ;;  %v3687_v49 = vcombine.low %v1993_v53, %v1993_v53  ;;  %v1561_v33 = vpack.i.b16 %v3643_v45, %v3643_v45  ;;  %v3636_v29 = vcombine.high %v1445_v22, %v1445_v22 }
 0x112   : > { %5103 = vst [vmem:[#allocation23_spill] sm:$0xff] %v4758_v6  ;;  %v1078_v10 = vsel %vm334_vm7, %v1073_v36, %v4758_v6  ;;  %v4769_v16 = vpop.permute.xlu1 %1059  ;;  %v380_v6 = vpack.i.b16 %v3536_v57, %v3536_v57  ;;  %v2108_v51 = vpack.i.b16 %v2107_v35, %v2107_v35  ;;  %v3688_v27 = vcombine.high %v1993_v53, %v1993_v53 }
 0x113   : > { %v1129_v11 = vmul.bf16 %v1113_v61, %v1078_v10  ;;  %v1086_v12 = vsel %vm334_vm7, %v4769_v16, %v1073_v36  ;;  %v1473_v9 = vshrl.u32 %v3635_v62, 16  ;;  %v3679_v3 = vcombine.low %v1903_v50, %v1903_v50 }
 0x114   : > { %v1128_v44 = vmul.bf16 %v4710_v8, %v1086_v12  ;;  %v2116_v42 = vpack.i.b16 %v2115_v31, %v2115_v31  ;;  %v3680_v10 = vcombine.high %v1903_v50, %v1903_v50  ;;  %v1817_v8 = vld [vmem:[%s5057_s1 + $0x8] sm:$0x11]  ;;  %v1568_v45 = vpack.i.b16 %v3644_v7, %v3644_v7 }
 0x115   : > { %v601_v38 = vpop.permute.xlu0 %600  ;;  %3207 = vmatprep.subr.bf16.mxu0 %v1129_v11  ;;  %v2019_v53 = vpack.i.b16 %v3687_v49, %v3687_v49  ;;  %v4790_v35 = vrot.slane %v472_v0, %v4390_v18  ;;  %v2026_v62 = vpack.i.b16 %v3688_v27, %v3688_v27  ;;  %v1474_v50 = vpack.i.b16 %v1473_v9, %v1473_v9  ;;  %v1351_v49 = vld [vmem:[%s5057_s1 + $0x8] sm:$0x22] }
 0x116   : > { %v604_v46 = vsel %vm602_vm4, %v4435_v60, %v601_v38  ;;  %v605_v61 = vsel %vm602_vm4, %v601_v38, %v4439_v63  ;;  %v965_v36 = vpop.permute.xlu1 %964  ;;  %3208 = vmatpush2.bf16.msra.mxu0 %v1128_v44  ;;  %v4793_v60 = vrot.slane %v380_v6, %v4390_v18  ;;  %v4796_v63 = vrot.slane %v1561_v33, %v4280_v32 }
 0x117   : > { %v660_v22 = vmul.bf16 %v4720_v28, %v604_v46  ;;  %v661_v57 = vmul.bf16 %v4726_v56, %v605_v61  ;;  %v1481_v44 = vshrl.u32 %v3636_v29, 16  ;;  %v1931_v46 = vshrl.u32 %v3679_v3, 16 }
 0x118   : > { %v3671_v28 = vcombine.low %v1817_v8, %v1817_v8  ;;  %v4808_v33 = vrot.slane %v2108_v51, %v4322_v15  ;;  %v4811_v29 = vrot.slane %v2116_v42, %v4322_v15  ;;  %v1939_v27 = vshrl.u32 %v3680_v10, 16 }
 0x119   : > { %v4798_v31 = vpop.permute.xlu0 %966  ;;  %3269 = vmatprep.subr.bf16.mxu1 %v661_v57  ;;  %v4817_v11 = vrot.slane %v1568_v45, %v4280_v32  ;;  %v4820_v12 = vrot.slane %v2019_v53, %v4322_v15  ;;  %v1482_v38 = vpack.i.b16 %v1481_v44, %v1481_v44  ;;  %v3672_v51 = vcombine.high %v1817_v8, %v1817_v8  ;;  %v1711_v53 = vld [vmem:[%s5057_s1 + $0x18] sm:$0x11] }
 0x11a   : > { %v972_v56 = vsel %vm970_vm8, %v965_v36, %v4798_v31  ;;  %v4805_v6 = vpop.permute.xlu1 %962  ;;  %3270 = vmatpush1.bf16.msra.mxu1 %v660_v22  ;;  %v3627_v9 = vcombine.low %v1351_v49, %v1351_v49  ;;  %v4824_v42 = vrot.slane %v2026_v62, %v4322_v15  ;;  %v1843_v10 = vpack.i.b16 %v3671_v28, %v3671_v28 }
 0x11b   : > { %v1023_v3 = vmul.bf16 %v4729_v59, %v972_v56  ;;  %v971_v0 = vsel %vm970_vm8, %v4805_v6, %v965_v36  ;;  %v4827_v59 = vrot.slane %v1474_v50, %v4267_v25  ;;  %v1932_v36 = vpack.i.b16 %v1931_v46, %v1931_v46 }
 0x11c   : > { %v1022_v7 = vmul.bf16 %v4741_v48, %v971_v0  ;;  %v1940_v8 = vpack.i.b16 %v1939_v27, %v1939_v27  ;;  %v3628_v45 = vcombine.high %v1351_v49, %v1351_v49  ;;  %v1850_v28 = vpack.i.b16 %v3672_v51, %v3672_v51  ;;  %v1621_v0 = vld [vmem:[%s5057_s1 + $0x8] sm:$0x88] }
 0x11d   : > { %v513_v61 = vpop.permute.xlu0 %512  ;;  %3209 = vmatprep.subr.bf16.mxu0 %v1023_v3  ;;  %v1379_v49 = vshrl.u32 %v3627_v9, 16  ;;  %v4856_v27 = vrot.slane %v1932_v36, %v4390_v18  ;;  %v4005_v51 = vld [vmem:[%s4096_s25 + $0x4c] ss:$16 sps:$4 sm:$0xff]   ;;  %v3660_v36 = vcombine.high %v1711_v53, %v1711_v53 }
 0x11e   : > { %v516_v22 = vsel %vm514_vm5, %v4473_v54, %v513_v61  ;;  %v517_v57 = vsel %vm514_vm5, %v513_v61, %v4480_v58  ;;  %v2161_v48 = vpop.permute.xlu1 %2160  ;;  %3210 = vmatpush2.bf16.msra.mxu0 %v1022_v7  ;;  %v1387_v3 = vshrl.u32 %v3628_v45, 16  ;;  %v4873_v9 = vrot.slane %v1850_v28, %v4390_v18 }
 0x11f   : > { %v568_v44 = vmul.bf16 %v4744_v41, %v516_v22  ;;  %v569_v62 = vmul.bf16 %v4747_v19, %v517_v57  ;;  %v2164_v50 = vsel %vm698_vm1, %v4291_v40, %v2161_v48  ;;  %v2170_v54 = vsel %vm698_vm1, %v2161_v48, %v4272_v30 }
 0x120   : > { %v2218_v58 = vmul.bf16 %v4750_v1, %v2164_v50  ;;  %v2219_v46 = vmul.bf16 %v4753_v24, %v2170_v54  ;;  %v4846_v41 = vrot.slane %v1482_v38, %v4267_v25  ;;  %v4849_v19 = vrot.slane %v1843_v10, %v4390_v18  ;;  %v1265_v25 = vld [vmem:[%s5057_s1 + $0x8] sm:$0x22] }
 0x121   : > { %v421_v56 = vpop.permute.xlu0 %420  ;;  %3212 = vmatmul.mubr.bf16.vlgmr.msra.gmra.mxu0 %v4762_v43  ;;  %3271 = vmatprep.subr.bf16.mxu1 %v569_v62  ;;  %v3659_v40 = vcombine.low %v1711_v53, %v1711_v53  ;;  %v4869_v38 = vrot.slane %v1940_v8, %v4390_v18  ;;  %v1380_v61 = vpack.i.b16 %v1379_v49, %v1379_v49  ;;  %v4006_v62 = vld [vmem:[%s4096_s25 + $0x48] ss:$16 sps:$4 sm:$0xff]  }
 0x122   : > { %v424_v30 = vsel %vm422_vm6, %v4511_v47, %v421_v56  ;;  %v425_v1 = vsel %vm422_vm6, %v421_v56, %v4515_v52  ;;  %3302 = vmatprep.subr.bf16.mxu0 %v2219_v46  ;;  %v333_v24 = vpop.permute.xlu1 %332  ;;  %3272 = vmatpush1.bf16.msra.mxu1 %v568_v44  ;;  %v4879_v10 = vcombine.low %v1265_v25, %v1265_v25 }
 0x123   : > { %v480_v47 = vmul.bf16 %v4765_v21, %v424_v30  ;;  %v481_v7 = vmul.bf16 %v4790_v35, %v425_v1  ;;  %v337_v52 = vsel %vm334_vm7, %v333_v24, %v4555_v55  ;;  %3303 = vmatpush1.bf16.msra.mxu0 %v2218_v58  ;;  %3846 = vmatprep.mubr.msk.bf16.mxu0 %vm3175_vm0, %v4247_v14 }
 0x124   : > { %3304 = vmatprep.subr.bf16.mxu0 %v4005_v51  ;;  %v336_v21 = vsel %vm334_vm7, %v4548_v5, %v333_v24  ;;  %v1737_v55 = vpack.i.b16 %v3659_v40, %v3659_v40  ;;  %v3651_v22 = vcombine.low %v1621_v0, %v1621_v0  ;;  %v389_v57 = vmul.bf16 %v4793_v60, %v337_v52  ;;  %v1175_v5 = vld [vmem:[%s5057_s1 + $0x8] sm:$0x11] }
 0x125   : > { %v2067_v35 = vpop.permute.xlu0 %2066  ;;  %3273 = vmatprep.subr.bf16.mxu1 %v481_v7  ;;  %v1388_v14 = vpack.i.b16 %v1387_v3, %v1387_v3  ;;  %v388_v50 = vmul.bf16 %v4772_v4, %v336_v21  ;;  %v1744_v54 = vpack.i.b16 %v3660_v36, %v3660_v36  ;;  %v3620_v58 = vcombine.high %v1265_v25, %v1265_v25 }
 0x126   : > { %v2069_v48 = vsel %vm602_vm4, %v4344_v34, %v2067_v35  ;;  %v2070_v8 = vsel %vm602_vm4, %v2067_v35, %v4351_v37  ;;  %v1523_v45 = vpop.permute.xlu1 %1522  ;;  %3274 = vmatpush1.bf16.msra.mxu1 %v480_v47  ;;  %v3652_v34 = vcombine.high %v1621_v0, %v1621_v0  ;;  %v4896_v37 = vrot.slane %v1380_v61, %v4322_v15 }
 0x127   : > { %v2124_v53 = vmul.bf16 %v4808_v33, %v2069_v48  ;;  %v2125_v44 = vmul.bf16 %v4811_v29, %v2070_v8  ;;  %v1532_v60 = vsel %vm790_vm3, %v1523_v45, %v4578_v13  ;;  %3305 = vmatpush1.bf16.msra.mxu0 %v4006_v62  ;;  %3275 = vmatprep.subr.bf16.mxu1 %v389_v57  ;;  %v1649_v13 = vshrl.u32 %v3651_v22, 16 }
 0x128   : > { %v1526_v46 = vsel %vm790_vm3, %v4574_v2, %v1523_v45  ;;  %v4901_v29 = vrot.slane %v1737_v55, %v4390_v18  ;;  %v3611_v28 = vcombine.low %v1175_v5, %v1175_v5  ;;  %v1577_v49 = vmul.bf16 %v4817_v11, %v1532_v60  ;;  %v2439_v2 = vld [vmem:[%s5057_s1 + $0x18] sm:$0x11]  ;;  %v5105_v55 = vld [vmem:[#allocation5_spill] sm:$0xff] }
 0x129   : > { %v1981_v33 = vpop.permute.xlu0 %1980  ;;  %3306 = vmatprep.subr.bf16.mxu0 %v2125_v44  ;;  %v4909_v30 = vrot.slane %v1388_v14, %v4322_v15  ;;  %v1291_v3 = vpack.i.b16 %v4879_v10, %v4879_v10  ;;  %v1298_v25 = vpack.i.b16 %v3620_v58, %v3620_v58  ;;  %v3612_v0 = vcombine.high %v1175_v5, %v1175_v5  ;;  %v5106_v44 = vld [vmem:[#allocation4_spill] sm:$0xff]  ;;  %v5108_v58 = vld [vmem:[#allocation7_spill] sm:$0xff] }
 0x12a   : > { %v1983_v4 = vsel %vm514_vm5, %v4395_v23, %v1981_v33  ;;  %v1984_v56 = vsel %vm514_vm5, %v1981_v33, %v4399_v26  ;;  %v1433_v40 = vpop.permute.xlu1 %1432  ;;  %3276 = vmatpush1.bf16.msra.mxu1 %v388_v50  ;;  %v1657_v23 = vshrl.u32 %v3652_v34, 16  ;;  %v1576_v26 = vmul.bf16 %v4796_v63, %v1526_v46  ;;  %v5104_v63 = vld [vmem:[#allocation3_spill] sm:$0xff] }
 0x12b   : > { %v2034_v1 = vmul.bf16 %v4820_v12, %v1983_v4  ;;  %v2035_v24 = vmul.bf16 %v4824_v42, %v1984_v56  ;;  %v1442_v11 = vsel %vm698_vm1, %v1433_v40, %v4607_v17  ;;  %3307 = vmatpush1.bf16.msra.mxu0 %v2124_v53  ;;  %3277 = vmatprep.subr.bf16.mxu1 %v1577_v49  ;;  %v1203_v42 = vshrl.u32 %v3611_v28, 16  ;;  %v4007_v28 = vld [vmem:[%s4096_s25 + $0x2c] ss:$16 sps:$4 sm:$0xff]  }
 0x12c   : > { %v1436_v47 = vsel %vm698_vm1, %v4603_v20, %v1433_v40  ;;  %v1650_v12 = vpack.i.b16 %v1649_v13, %v1649_v13  ;;  %v3727_v52 = vcombine.low %v2439_v2, %v2439_v2  ;;  %v1491_v17 = vmul.bf16 %v4846_v41, %v1442_v11  ;;  %v2349_v41 = vld [vmem:[%s5057_s1 + $0x8] sm:$0x88]  ;;  %v5109_v40 = vld [vmem:[#allocation17_spill] sm:$0xff] }
 0x12d   : > { %v1891_v7 = vpop.permute.xlu0 %1890  ;;  %3308 = vmatprep.subr.bf16.mxu0 %v2035_v24  ;;  %v1749_v21 = vrot.slane %v1744_v54, %v4390_v18  ;;  %v1658_v22 = vpack.i.b16 %v1657_v23, %v1657_v23  ;;  %v1490_v57 = vmul.bf16 %v4827_v59, %v1436_v47  ;;  %v3728_v48 = vcombine.high %v2439_v2, %v2439_v2  ;;  %v5107_v54 = vld [vmem:[#allocation18_spill] sm:$0xff] }
 0x12e   : > { %v1893_v51 = vsel %vm422_vm6, %v4413_v39, %v1891_v7  ;;  %v1894_v61 = vsel %vm422_vm6, %v1891_v7, %v5104_v63  ;;  %v1805_v36 = vpop.permute.xlu1 %1804  ;;  %3278 = vmatpush2.bf16.msra.mxu1 %v1576_v26  ;;  %v1089_v39 = vld [vmem:[%s5057_s1 + $0x8] sm:$0x11]  ;;  %v4944_v45 = vrot.slane %v1298_v25, %v4322_v15  ;;  %v4947_v14 = vrot.slane %v1650_v12, %v4280_v32  ;;  %v5110_v26 = vld [vmem:[#allocation6_spill] sm:$0xff]  ;;  %v2263_v12 = vld [vmem:[%s5057_s1 + $0x8] sm:$0x88] }
 0x12f   : > { %v1948_v35 = vmul.bf16 %v4856_v27, %v1893_v51  ;;  %v1949_v20 = vmul.bf16 %v4869_v38, %v1894_v61  ;;  %v1808_v10 = vsel %vm334_vm7, %v1805_v36, %v5105_v55  ;;  %3309 = vmatpush1.bf16.msra.mxu0 %v2034_v1  ;;  %3279 = vmatprep.subr.bf16.mxu1 %v1491_v17  ;;  %v1211_v38 = vshrl.u32 %v3612_v0, 16  ;;  %v4008_v47 = vld [vmem:[%s4096_s25 + $0x28] ss:$16 sps:$4 sm:$0xff]   ;;  %v5113_v55 = vld [vmem:[#allocation19_spill] sm:$0xff]  ;;  %s3849_s25 = sshll.u32 %s5130_s18, 5 }
 0x130   : > { %v4941_v27 = vrot.slane %v1291_v3, %v4322_v15  ;;  %v1204_v5 = vpack.i.b16 %v1203_v42, %v1203_v42  ;;  %v2465_v53 = vpack.i.b16 %v3727_v52, %v3727_v52  ;;  %v1807_v59 = vsel %vm334_vm7, %v5106_v44, %v1805_v36  ;;  %v983_v7 = vld [vmem:[%s5057_s1 + $0x18] sm:$0x11]  ;;  %v5111_v42 = vld [vmem:[#allocation20_spill] sm:$0xff]  ;;  %s5036_s9 = scalar_lea.vmem %s5060_s4, %s3849_s25 }
 0x131   : > { %v1339_v8 = vpop.permute.xlu0 %1338  ;;  %3310 = vmatprep.subr.bf16.mxu0 %v1949_v20  ;;  %v1859_v60 = vmul.bf16 %v4873_v9, %v1808_v10  ;;  %v4952_v34 = vcombine.low %v1089_v39, %v1089_v39  ;;  %v3720_v50 = vcombine.high %v2349_v41, %v2349_v41  ;;  %v1663_v33 = vrot.slane %v1658_v22, %v4280_v32 }
 0x132   : > { %v1699_v62 = vpop.permute.xlu1 %1698  ;;  %3280 = vmatpush2.bf16.msra.mxu1 %v1490_v57  ;;  %v1342_v15 = vsel %vm602_vm4, %v1339_v8, %v5107_v54  ;;  %v3604_v13 = vcombine.high %v1089_v39, %v1089_v39  ;;  %v1212_v9 = vpack.i.b16 %v1211_v38, %v1211_v38  ;;  %v2472_v49 = vpack.i.b16 %v3728_v48, %v3728_v48  ;;  %v5114_v38 = vld [vmem:[#allocation8_spill] sm:$0xff] }
 0x133   : > { %v1708_v46 = vsel %vm970_vm8, %v1699_v62, %v5108_v58  ;;  %3311 = vmatpush1.bf16.msra.mxu0 %v1948_v35  ;;  %3281 = vmatprep.subr.bf16.mxu1 %v4007_v28  ;;  %v3719_v4 = vcombine.low %v2349_v41, %v2349_v41  ;;  %v1858_v56 = vmul.bf16 %v4849_v19, %v1807_v59  ;;  %v2385_v19 = vshrl.u32 %v3720_v50, 16  ;;  %v5116_v59 = vld [vmem:[#allocation11_spill] sm:$0xff] }
 0x134   : > { %3312 = vmatprep.subr.bf16.mxu0 %v1859_v60  ;;  %v1341_v2 = vsel %vm602_vm4, %v5109_v40, %v1339_v8  ;;  %v4964_v24 = vrot.slane %v1204_v5, %v4390_v18  ;;  %v4967_v11 = vrot.slane %v2465_v53, %v4390_v18  ;;  %v1397_v23 = vmul.bf16 %v4909_v30, %v1342_v15  ;;  %v5112_v30 = vld [vmem:[#allocation9_spill] sm:$0xff]  ;;  %v5115_v53 = vld [vmem:[#allocation22_spill] sm:$0xff] }
 0x135   : > { %v1253_v1 = vpop.permute.xlu0 %1252  ;;  %v1702_v3 = vsel %vm970_vm8, %v5110_v26, %v1699_v62  ;;  %v1753_v25 = vmul.bf16 %v1749_v21, %v1708_v46  ;;  %v1115_v51 = vpack.i.b16 %v4952_v34, %v4952_v34  ;;  %v1122_v63 = vpack.i.b16 %v3604_v13, %v3604_v13  ;;  %v5117_v15 = vld [vmem:[#allocation21_spill] sm:$0xff] }
 0x136   : > { %v1609_v0 = vpop.permute.xlu1 %1608  ;;  %3282 = vmatpush2.bf16.msra.mxu1 %v4008_v47  ;;  %v1256_v52 = vsel %vm514_vm5, %v1253_v1, %v5111_v42  ;;  %v1396_v61 = vmul.bf16 %v4896_v37, %v1341_v2  ;;  %v1217_v36 = vrot.slane %v1212_v9, %v4390_v18  ;;  %v2477_v21 = vrot.slane %v2472_v49, %v4390_v18  ;;  %v5118_v9 = vld [vmem:[#allocation10_spill] sm:$0xff]  ;;  %v5119_v2 = vld [vmem:[#allocation13_spill] sm:$0xff]  ;;  %v5120_v47 = vld [vmem:[#allocation23_spill] sm:$0xff] }
 0x137   : > { %v1618_v17 = vsel %vm878_vm2, %v1609_v0, %v5112_v30  ;;  %3313 = vmatpush1.bf16.msra.mxu0 %v1858_v56  ;;  %3283 = vmatprep.subr.bf16.mxu1 %v1397_v23  ;;  %v2377_v35 = vshrl.u32 %v3719_v4, 16  ;;  %v1752_v20 = vmul.bf16 %v4901_v29, %v1702_v3  ;;  %v1255_v10 = vsel %vm514_vm5, %v5113_v55, %v1253_v1 }
 0x138   : > { %3314 = vmatprep.subr.bf16.mxu0 %v1753_v25  ;;  %v3592_v39 = vcombine.high %v983_v7, %v983_v7  ;;  %v3712_v41 = vcombine.high %v2263_v12, %v2263_v12  ;;  %v1307_v57 = vmul.bf16 %v4944_v45, %v1256_v52  ;;  %v1612_v37 = vsel %vm878_vm2, %v5114_v38, %v1609_v0  ;;  %v5121_v52 = vld [vmem:[#allocation12_spill] sm:$0xff] }
 0x139   : > { %v1163_v22 = vpop.permute.xlu0 %1162  ;;  %v1667_v48 = vmul.bf16 %v1663_v33, %v1618_v17  ;;  %v2386_v5 = vpack.i.b16 %v2385_v19, %v2385_v19  ;;  %v1127_v60 = vrot.slane %v1122_v63, %v4390_v18  ;;  %v3591_v62 = vcombine.low %v983_v7, %v983_v7  ;;  %v5122_v63 = vld [vmem:[#allocation15_spill] sm:$0xff] }
 0x13a   : > { %v2427_v8 = vpop.permute.xlu1 %2426  ;;  %3284 = vmatpush2.bf16.msra.mxu1 %v1396_v61  ;;  %v1166_v44 = vsel %vm422_vm6, %v1163_v22, %v5115_v53  ;;  %v1306_v34 = vmul.bf16 %v4941_v27, %v1255_v10  ;;  %v2378_v45 = vpack.i.b16 %v2377_v35, %v2377_v35  ;;  %v3711_v50 = vcombine.low %v2263_v12, %v2263_v12  ;;  %v5123_v10 = vld [vmem:[#allocation14_spill] sm:$0xff] }
 0x13b   : > { %v2436_v29 = vsel %vm970_vm8, %v2427_v8, %v5116_v59  ;;  %3315 = vmatpush1.bf16.msra.mxu0 %v1752_v20  ;;  %3285 = vmatprep.subr.bf16.mxu1 %v1307_v57  ;;  %v1666_v54 = vmul.bf16 %v4947_v14, %v1612_v37  ;;  %v1165_v58 = vsel %vm422_vm6, %v5117_v15, %v1163_v22 }
 0x13c   : > { %3316 = vmatprep.subr.bf16.mxu0 %v1667_v48  ;;  %v1016_v33 = vpack.i.b16 %v3592_v39, %v3592_v39  ;;  %v2296_v13 = vpack.i.b16 %v3712_v41, %v3712_v41  ;;  %v1221_v28 = vmul.bf16 %v1217_v36, %v1166_v44  ;;  %v2430_v49 = vsel %vm970_vm8, %v5118_v9, %v2427_v8  ;;  %v5124_v41 = vld [vmem:[#allocation16_spill] sm:$0xff] }
 0x13d   : > { %v1077_v46 = vpop.permute.xlu0 %1076  ;;  %v2481_v4 = vmul.bf16 %v2477_v21, %v2436_v29  ;;  %v2391_v56 = vrot.slane %v2386_v5, %v4280_v32  ;;  %v1120_v40 = vrot.slane %v1115_v51, %v4390_v18  ;;  %v1009_v23 = vpack.i.b16 %v3591_v62, %v3591_v62 }
 0x13e   : > { %v2337_v27 = vpop.permute.xlu1 %2336  ;;  %3286 = vmatpush2.bf16.msra.mxu1 %v1306_v34  ;;  %v1080_v14 = vsel %vm334_vm7, %v1077_v46, %v4769_v16  ;;  %v1220_v26 = vmul.bf16 %v4964_v24, %v1165_v58  ;;  %v2383_v3 = vrot.slane %v2378_v45, %v4280_v32  ;;  %v2289_v25 = vpack.i.b16 %v3711_v50, %v3711_v50 }
 0x13f   : > { %v2346_v1 = vsel %vm878_vm2, %v2337_v27, %v5119_v2  ;;  %3317 = vmatpush1.bf16.msra.mxu0 %v1666_v54  ;;  %3287 = vmatprep.subr.bf16.mxu1 %v1221_v28  ;;  %v2480_v0 = vmul.bf16 %v4967_v11, %v2430_v49  ;;  %v1079_v19 = vsel %vm334_vm7, %v5120_v47, %v1077_v46 }
 0x140   : > { %3328 = vmatprep.subr.bf16.mxu0 %v2481_v4  ;;  %v1021_v7 = vrot.slane %v1016_v33, %v4390_v18  ;;  %v2301_v12 = vrot.slane %v2296_v13, %v4280_v32  ;;  %v1131_v42 = vmul.bf16 %v1127_v60, %v1080_v14  ;;  %v2340_v30 = vsel %vm878_vm2, %v5121_v52, %v2337_v27 }
 0x141   : > { %v969_v16 = vpop.permute.xlu0 %968  ;;  %v2395_v24 = vmul.bf16 %v2391_v56, %v2346_v1  ;;  %v1130_v61 = vmul.bf16 %v1120_v40, %v1079_v19  ;;  %v1014_v36 = vrot.slane %v1009_v23, %v4390_v18  ;;  %v2394_v21 = vmul.bf16 %v2383_v3, %v2340_v30 }
 0x142   : > { %v980_v17 = vsel %vm970_vm8, %v969_v16, %v4805_v6  ;;  %v2251_v51 = vpop.permute.xlu1 %2250  ;;  %3288 = vmatpush2.bf16.msra.mxu1 %v1220_v26  ;;  %v973_v35 = vsel %vm970_vm8, %v4798_v31, %v969_v16  ;;  %v2294_v55 = vrot.slane %v2289_v25, %v4280_v32 }
 0x143   : > { %v2260_v11 = vsel %vm790_vm3, %v2251_v51, %v5122_v63  ;;  %3329 = vmatpush2.bf16.msra.mxu0 %v2480_v0  ;;  %3289 = vmatprep.subr.bf16.mxu1 %v1131_v42  ;;  %v1025_v20 = vmul.bf16 %v1021_v7, %v980_v17  ;;  %v2254_v6 = vsel %vm790_vm3, %v5123_v10, %v2251_v51 }
 0x144   : > { %3330 = vmatprep.subr.bf16.mxu0 %v2395_v24  ;;  %v2305_v22 = vmul.bf16 %v2301_v12, %v2260_v11  ;;  %v1024_v39 = vmul.bf16 %v1014_v36, %v973_v35  ;;  %v2304_v18 = vmul.bf16 %v2294_v55, %v2254_v6 }
 0x146   : > { %3290 = vmatpush2.bf16.msra.mxu1 %v1130_v61 }
 0x147   : > { %3331 = vmatpush2.bf16.msra.mxu0 %v2394_v21  ;;  %3291 = vmatprep.subr.bf16.mxu1 %v1025_v20 }
 0x148   : > { %3332 = vmatprep.subr.bf16.mxu0 %v2305_v22 }
 0x14a   : > { %3292 = vmatpush2.bf16.msra.mxu1 %v1024_v39 }
 0x14b   : > { %3333 = vmatpush2.bf16.msra.mxu0 %v2304_v18 }
 0x14d   : > { %3294 = vmatmul.mubr.bf16.vlgmr.msra.gmra.mxu1 %v4762_v43 }
 0x14e   : > { %3335 = vmatmul.mubr.bf16.vlgmr.msra.gmra.mxu0 %v5124_v41  ;;  %v2620_v37 = vpop.permute.xlu0 %2619 }
 0x1bc   : > { %v3254_v31 = vpop.f32.mrf.mxu1 }
 0x1be   : > { %v3256_v57 = vpop.f32.mrf.mxu1 }
 0x1c0   : > { %v3258_v32 = vpop.f32.mrf.mxu1 }
 0x1c2   : > { %v3259_v38 = vpop.f32.mrf.mxu1 }
 0x1e1   : > { %v3213_v48 = vpop.f32.mrf.mxu0 }
 0x1e2   : > { %v3214_v8 = vadd.f32 %v3213_v48, %v2620_v37 }
 0x1e3   : > { %v3215_v5 = vpop.f32.mrf.mxu0 }
 0x1e4   : > { %v3255_v53 = vadd.f32 %v3254_v31, %v3214_v8  ;;  %v3216_v44 = vadd.f32 %v3215_v5, %v2620_v37 }
 0x1e5   : > { %v3217_v59 = vpop.f32.mrf.mxu0 }
 0x1e6   : > { %vm3343_vm9 = vcmp.ge.f32.partialorder %v3255_v53, 0.0  ;;  %v3347_v43 = vmul.f32 0.01, %v3255_v53  ;;  %v3257_v29 = vadd.f32 %v3256_v57, %v3216_v44 }
 0x1e7   : > { %v3218_v60 = vpop.f32.mrf.mxu0 }
 0x1e8   : > { %v3351_v62 = vsel %vm3343_vm9, %v3255_v53, %v3347_v43  ;;  %vm3344_vm10 = vcmp.ge.f32.partialorder %v3257_v29, 0.0  ;;  %v3348_v34 = vmul.f32 0.01, %v3257_v29 }
 0x1e9   : > { %3355 = vst [vmem:[%s5036_s9] sm:$0xff] %v3351_v62  ;;  %v3365_v27 = vmul.f32 %v3351_v62, %v3351_v62 }
 0x1ea   : > { %v3352_v45 = vsel %vm3344_vm10, %v3257_v29, %v3348_v34 }
 0x1eb   : > { %3356 = vst [vmem:[%s5036_s9 + $0x8] sm:$0xff] %v3352_v45  ;;  %v3366_v28 = vmul.f32 %v3352_v45, %v3352_v45  ;;  %v3359_v14 = vadd.f32 %v3352_v45, %v3351_v62 }
 0x1ed   : > { %v3369_v25 = vadd.f32 %v3366_v28, %v3365_v27 }
 0x20d   : > { %v3295_v50 = vpop.f32.mrf.mxu1 }
 0x20e   : > { %v3296_v54 = vadd.f32 %v3295_v50, %v2620_v37  ;;  %v3336_v15 = vpop.f32.mrf.mxu0 }
 0x20f   : > { %v3297_v58 = vpop.f32.mrf.mxu1 }
 0x210   : > { %v3337_v46 = vadd.f32 %v3336_v15, %v3296_v54  ;;  %v3298_v33 = vadd.f32 %v3297_v58, %v2620_v37  ;;  %v3338_v13 = vpop.f32.mrf.mxu0 }
 0x211   : > { %v3299_v9 = vpop.f32.mrf.mxu1 }
 0x212   : > { %vm3345_vm11 = vcmp.ge.f32.partialorder %v3337_v46, 0.0  ;;  %v3349_v49 = vmul.f32 0.01, %v3337_v46  ;;  %v3339_v4 = vadd.f32 %v3338_v13, %v3298_v33  ;;  %v3340_v56 = vpop.f32.mrf.mxu0 }
 0x213   : > { %v3300_v40 = vpop.f32.mrf.mxu1 }
 0x214   : > { %v3353_v2 = vsel %vm3345_vm11, %v3337_v46, %v3349_v49  ;;  %vm3346_vm12 = vcmp.ge.f32.partialorder %v3339_v4, 0.0  ;;  %v3350_v1 = vmul.f32 0.01, %v3339_v4  ;;  %v3341_v23 = vpop.f32.mrf.mxu0 }
 0x215   : > { %3357 = vst [vmem:[%s5036_s9 + $0x10] sm:$0xff] %v3353_v2  ;;  %v3367_v26 = vmul.f32 %v3353_v2, %v3353_v2  ;;  %v3360_v3 = vadd.f32 %v3359_v14, %v3353_v2 }
 0x216   : > { %v3354_v0 = vsel %vm3346_vm12, %v3339_v4, %v3350_v1 }
 0x217   : > { %3358 = vst [vmem:[%s5036_s9 + $0x18] sm:$0xff] %v3354_v0  ;;  %v3361_v47 = vadd.f32 %v3360_v3, %v3354_v0  ;;  %v3368_v19 = vmul.f32 %v3354_v0, %v3354_v0  ;;  %v3370_v7 = vadd.f32 %v3369_v25, %v3367_v26 }
 0x219   : > { %3362 = vadd.xlane.f32.xlu1 %v3361_v47  ;;  %v3371_v16 = vadd.f32 %v3370_v7, %v3368_v19 }
 0x21b   : > { %3372 = vadd.xlane.f32.xlu0 %v3371_v16 }
 0x2a2   : > { %v3363_v12 = vpop.xlane.xlu1 %3362 }
 0x2a3   : > { %3364 = vst.msk [vmem:[%s304_s26] sm:$0xff] %vm602_vm4, %v3363_v12 }
 0x2a4   : > { %v3373_v42 = vpop.xlane.xlu0 %3372 }
 0x2a5   : > { %3375 = vst.msk [vmem:[%s304_s26] sm:$0xff] %vm3374_vm13, %v3373_v42 }
 0x2a6 PF: > { %s16_s20 = sadd.s32 1, %s4031_s20   ;;  %s5125_s18 = smov %s4027_s19 }
 0x2a7   : > { %p13_p5 = scmp.ge.s32.totalorder %s16_s20, 4   ;;  %s5126_s19 = smov %s5128_s21 }
 0x2a9   :  { %15 = sbr.rel (!%p13_p5) target bundleno = 2 (0x2), region = 81 }

</bundles_post_ra>
